<compile_context>
chip_gen: v7x
topology: tpu7x:2x2x1
jax: 0.10.0
libtpu: 0.0.40
codegen_flags: <defaults>
</compile_context>

<pallas_src>
import functools

import jax
import jax.numpy as jnp
import numpy as np
from jax.experimental import pallas as pl
from jax.experimental.pallas import tpu as pltpu

EPS = 1e-5
LANE = 128
MM_DTYPE = jnp.bfloat16      # MXU operand dtype; accumulation stays f32
VMEM_LIMIT = 48 * 1024 * 1024


def _round_up(x, m):
    return (x + m - 1) // m * m


# ------------------------------ Pallas kernels ------------------------------

def _conv3x3(pad_ref, w_ref, b_ref, H, W):
    """9 shifted (H*W, Cin) @ (Cin, Cout) matmuls against a padded VMEM plane."""
    ci = pad_ref.shape[-1]
    co = b_ref.shape[-1]
    acc = jnp.zeros((H * W, co), jnp.float32)
    for t in range(9):                       # fully unrolled at trace time
        kh, kw = divmod(t, 3)
        win = pad_ref[kh:kh + H, kw:kw + W, :].reshape(H * W, ci)
        acc = acc + jnp.dot(win.astype(MM_DTYPE), w_ref[t],
                            preferred_element_type=jnp.float32)
    return acc + b_ref[...]


def _conv1_kernel(H, W, has_sc, *refs):
    """conv1(+bias) -> y1, with fused per-channel sum / sum-of-squares for bn1
    (and for the 1x1 projection shortcut, whose values are recomputed later)."""
    if has_sc:
        (x_ref, w1_ref, b1_ref, ws_ref, bs_ref,
         y1_ref, s1_ref, q1_ref, ss_ref, qs_ref, xpad) = refs
    else:
        (x_ref, w1_ref, b1_ref, y1_ref, s1_ref, q1_ref, xpad) = refs

    @pl.when(pl.program_id(0) == 0)
    def _():
        xpad[...] = jnp.zeros_like(xpad)     # zero halo border; stays zero
        s1_ref[...] = jnp.zeros_like(s1_ref)
        q1_ref[...] = jnp.zeros_like(q1_ref)
        if has_sc:
            ss_ref[...] = jnp.zeros_like(ss_ref)
            qs_ref[...] = jnp.zeros_like(qs_ref)

    x = x_ref[0]                             # (H, W, Ci) f32
    xpad[1:H + 1, 1:W + 1, :] = x            # interior only; border stays zero

    y1 = _conv3x3(xpad, w1_ref, b1_ref, H, W)            # (H*W, Co) f32
    y1_ref[0] = y1.astype(y1_ref.dtype)                  # flat bf16 store
    s1_ref[...] += jnp.sum(y1, axis=0, keepdims=True)
    q1_ref[...] += jnp.sum(y1 * y1, axis=0, keepdims=True)

    if has_sc:
        xs = x.reshape(H * W, x.shape[-1]).astype(MM_DTYPE)
        ys = jnp.dot(xs, ws_ref[...],
                     preferred_element_type=jnp.float32) + bs_ref[...]
        ss_ref[...] += jnp.sum(ys, axis=0, keepdims=True)
        qs_ref[...] += jnp.sum(ys * ys, axis=0, keepdims=True)


def _conv2_kernel(H, W, *refs):
    """relu(bn1(.)) fused into conv2's load path; conv2(+bias) -> y2 with
    fused bn2 statistics."""
    (y1_ref, sc1_ref, sh1_ref, w2_ref, b2_ref,
     y2_ref, s2_ref, q2_ref, apad) = refs

    @pl.when(pl.program_id(0) == 0)
    def _():
        apad[...] = jnp.zeros_like(apad)
        s2_ref[...] = jnp.zeros_like(s2_ref)
        q2_ref[...] = jnp.zeros_like(q2_ref)

    co = sc1_ref.shape[-1]
    y1 = y1_ref[0].astype(jnp.float32)                        # (H*W, Co) f32
    a1 = jnp.maximum(y1 * sc1_ref[...] + sh1_ref[...], 0.0)   # relu(bn1(conv1))
    apad[1:H + 1, 1:W + 1, :] = a1.reshape(H, W, co)

    y2 = _conv3x3(apad, w2_ref, b2_ref, H, W)                 # (H*W, Co) f32
    y2_ref[0] = y2
    s2_ref[...] += jnp.sum(y2, axis=0, keepdims=True)
    q2_ref[...] += jnp.sum(y2 * y2, axis=0, keepdims=True)


def _final_proj_kernel(H, W, *refs):
    """out = bn2(y2) + bn_s(conv1x1(x)); shortcut matmul recomputed in-kernel."""
    (y2_ref, sc2_ref, sh2_ref, x_ref, ws_ref, bs_ref,
     scs_ref, shs_ref, o_ref) = refs
    ci = x_ref.shape[-1]
    xs = x_ref[0].reshape(H * W, ci).astype(MM_DTYPE)
    ys = jnp.dot(xs, ws_ref[...],
                 preferred_element_type=jnp.float32) + bs_ref[...]
    o_ref[0] = (y2_ref[0] * sc2_ref[...] + sh2_ref[...]
                + ys * scs_ref[...] + shs_ref[...])


def _final_id_kernel(H, W, *refs):
    """out = bn2(y2) + x   (identity shortcut)."""
    (y2_ref, sc2_ref, sh2_ref, x_ref, o_ref) = refs
    co = sc2_ref.shape[-1]
    x = x_ref[0].reshape(H * W, co)
    o_ref[0] = y2_ref[0] * sc2_ref[...] + sh2_ref[...] + x


# ------------------------------ kernel wrappers ------------------------------

def _chan_spec(co):
    return pl.BlockSpec((1, co), lambda n: (0, 0))


def _conv1_call(x4, w1, b1, ws, bs, H, W, ci, co, has_sc):
    N = x4.shape[0]
    stat = jax.ShapeDtypeStruct((1, co), jnp.float32)
    in_specs = [pl.BlockSpec((1, H, W, ci), lambda n: (n, 0, 0, 0)),
                pl.BlockSpec((9, ci, co), lambda n: (0, 0, 0)),
                _chan_spec(co)]
    args = [x4, w1, b1]
    out_shape = [jax.ShapeDtypeStruct((N, H * W, co), MM_DTYPE), stat, stat]
    out_specs = [pl.BlockSpec((1, H * W, co), lambda n: (n, 0, 0)),
                 _chan_spec(co), _chan_spec(co)]
    if has_sc:
        in_specs += [pl.BlockSpec((ci, co), lambda n: (0, 0)), _chan_spec(co)]
        args += [ws, bs]
        out_shape += [stat, stat]
        out_specs += [_chan_spec(co), _chan_spec(co)]
    return pl.pallas_call(
        functools.partial(_conv1_kernel, H, W, has_sc),
        out_shape=tuple(out_shape),
        grid=(N,),
        in_specs=in_specs,
        out_specs=tuple(out_specs),
        scratch_shapes=[pltpu.VMEM((H + 2, W + 2, ci), jnp.float32)],
        compiler_params=pltpu.CompilerParams(
            # stats accumulate across the grid -> must stay on one core
            dimension_semantics=("arbitrary",),
            vmem_limit_bytes=VMEM_LIMIT),
    )(*args)


def _conv2_call(y1, sc1, sh1, w2, b2, H, W, co):
    N = y1.shape[0]
    stat = jax.ShapeDtypeStruct((1, co), jnp.float32)
    return pl.pallas_call(
        functools.partial(_conv2_kernel, H, W),
        out_shape=(jax.ShapeDtypeStruct((N, H * W, co), jnp.float32), stat, stat),
        grid=(N,),
        in_specs=[pl.BlockSpec((1, H * W, co), lambda n: (n, 0, 0)),
                  _chan_spec(co), _chan_spec(co),
                  pl.BlockSpec((9, co, co), lambda n: (0, 0, 0)),
                  _chan_spec(co)],
        out_specs=(pl.BlockSpec((1, H * W, co), lambda n: (n, 0, 0)),
                   _chan_spec(co), _chan_spec(co)),
        scratch_shapes=[pltpu.VMEM((H + 2, W + 2, co), jnp.float32)],
        compiler_params=pltpu.CompilerParams(
            dimension_semantics=("arbitrary",),
            vmem_limit_bytes=VMEM_LIMIT),
    )(y1, sc1, sh1, w2, b2)


def _final_call(y2, sc2, sh2, x4, proj, H, W, ci, co):
    N = y2.shape[0]
    if proj is None:
        kernel = functools.partial(_final_id_kernel, H, W)
        in_specs = [pl.BlockSpec((1, H * W, co), lambda n: (n, 0, 0)),
                    _chan_spec(co), _chan_spec(co),
                    pl.BlockSpec((1, H, W, ci), lambda n: (n, 0, 0, 0))]
        args = (y2, sc2, sh2, x4)
    else:
        ws, bs, scs, shs = proj
        kernel = functools.partial(_final_proj_kernel, H, W)
        in_specs = [pl.BlockSpec((1, H * W, co), lambda n: (n, 0, 0)),
                    _chan_spec(co), _chan_spec(co),
                    pl.BlockSpec((1, H, W, ci), lambda n: (n, 0, 0, 0)),
                    pl.BlockSpec((ci, co), lambda n: (0, 0)),
                    _chan_spec(co), _chan_spec(co), _chan_spec(co)]
        args = (y2, sc2, sh2, x4, ws, bs, scs, shs)
    return pl.pallas_call(
        kernel,
        out_shape=jax.ShapeDtypeStruct((N, H * W, co), jnp.float32),
        grid=(N,),
        in_specs=in_specs,
        out_specs=pl.BlockSpec((1, H * W, co), lambda n: (n, 0, 0)),
        compiler_params=pltpu.CompilerParams(
            dimension_semantics=("parallel",),   # no cross-step state here
            vmem_limit_bytes=VMEM_LIMIT),
    )(*args)


# ------------------------------- glue (JAX) ---------------------------------

def _fold_bn(gamma, beta, s, q, m):
    mean = s[0] / m
    var = jnp.maximum(q[0] / m - mean * mean, 0.0)   # clamp f32 cancellation
    scale = gamma / jnp.sqrt(var + EPS)
    shift = beta - mean * scale
    return scale.reshape(1, -1), shift.reshape(1, -1)


def prepare_params(params, ch_in, ch_out):
    """One-time parameter prep: OIHW -> (9, Cin_pad, Cout_pad), channel padding
    to 128 lanes, bf16 cast of matmul weights (done outside the timed path)."""
    ci, co = _round_up(ch_in, LANE), _round_up(ch_out, LANE)

    def vec(v):
        return jnp.pad(v.astype(jnp.float32), (0, co - v.shape[0]))

    def conv3(w):                     # (Cout, Cin, 3, 3) -> (9, Cin_pad, Co_pad)
        o, i = w.shape[0], w.shape[1]
        wt = jnp.transpose(w, (2, 3, 1, 0)).reshape(9, i, o)
        return jnp.pad(wt, ((0, 0), (0, _round_up(i, LANE) - i),
                            (0, co - o))).astype(MM_DTYPE)

    prep = {
        "w1": conv3(params["w1"]), "b1": vec(params["b1"]).reshape(1, co),
        "g1": vec(params["g1"]), "be1": vec(params["be1"]),
        "w2": conv3(params["w2"]), "b2": vec(params["b2"]).reshape(1, co),
        "g2": vec(params["g2"]), "be2": vec(params["be2"]),
    }
    if ch_in != ch_out:
        ws = jnp.transpose(params["ws"], (2, 3, 1, 0)).reshape(ch_in, ch_out)
        prep["ws"] = jnp.pad(ws, ((0, ci - ch_in),
                                  (0, co - ch_out))).astype(MM_DTYPE)
        prep["bs"] = vec(params["bs"]).reshape(1, co)
        prep["gs"] = vec(params["gs"])
        prep["bes"] = vec(params["bes"])
    return prep


def resblk_forward(x_nchw, prep, ch_in, ch_out):
    N, C, H, W = x_nchw.shape
    assert C == ch_in
    ci, co = _round_up(ch_in, LANE), _round_up(ch_out, LANE)
    m = N * H * W
    has_sc = ch_in != ch_out

    x = jnp.transpose(x_nchw, (0, 2, 3, 1)).astype(jnp.float32)
    x = jnp.pad(x, ((0, 0), (0, 0), (0, 0), (0, ci - ch_in)))   # lane-dense C

    # conv1 (+bias) with fused bn1 / shortcut-bn statistics
    if has_sc:
        y1, s1, q1, ss, qs = _conv1_call(x, prep["w1"], prep["b1"],
                                         prep["ws"], prep["bs"],
                                         H, W, ci, co, True)
    else:
        y1, s1, q1 = _conv1_call(x, prep["w1"], prep["b1"], None, None,
                                 H, W, ci, co, False)
    sc1, sh1 = _fold_bn(prep["g1"], prep["be1"], s1, q1, m)

    # relu(bn1) fused into conv2 load path; conv2 (+bias) with fused bn2 stats
    y2, s2, q2 = _conv2_call(y1, sc1, sh1, prep["w2"], prep["b2"], H, W, co)
    sc2, sh2 = _fold_bn(prep["g2"], prep["be2"], s2, q2, m)

    # fused epilogue: bn2(y2) + shortcut (projection recomputed in-kernel)
    if has_sc:
        scs, shs = _fold_bn(prep["gs"], prep["bes"], ss, qs, m)
        out = _final_call(y2, sc2, sh2, x,
                          (prep["ws"], prep["bs"], scs, shs), H, W, ci, co)
    else:
        out = _final_call(y2, sc2, sh2, x, None, H, W, ci, co)

    out = out.reshape(N, H, W, co)[..., :ch_out]
    return jnp.transpose(out, (0, 3, 1, 2))        # back to NCHW
    # TODO(synk): BatchNorm running_mean/running_var buffer updates (training
    # side effect) are not tracked; they do not affect the returned tensor.


# --------------------------- pure-JAX reference ------------------------------

def resblk_reference(x_nchw, params, ch_in, ch_out):
    x = jnp.transpose(x_nchw, (0, 2, 3, 1)).astype(jnp.float32)

    def conv(inp, w_oihw, b, same):
        w_hwio = jnp.transpose(w_oihw, (2, 3, 1, 0))
        y = jax.lax.conv_general_dilated(
            inp, w_hwio, (1, 1), "SAME" if same else "VALID",
            dimension_numbers=("NHWC", "HWIO", "NHWC"))
        return y + b

    def bn(y, gamma, beta):
        mean = jnp.mean(y, axis=(0, 1, 2))
        var = jnp.mean((y - mean) ** 2, axis=(0, 1, 2))
        return (y - mean) / jnp.sqrt(var + EPS) * gamma + beta

    out = jax.nn.relu(bn(conv(x, params["w1"], params["b1"], True),
                         params["g1"], params["be1"]))
    out = bn(conv(out, params["w2"], params["b2"], True),
             params["g2"], params["be2"])
    if ch_in != ch_out:
        sc = bn(conv(x, params["ws"], params["bs"], False),
                params["gs"], params["bes"])
    else:
        sc = x
    return jnp.transpose(sc + out, (0, 3, 1, 2))


# ----------------------------------- main ------------------------------------

if __name__ == "__main__":
    N, ch_in, ch_out, H, W = 2, 4, 8, 16, 16

    key = jax.random.PRNGKey(0)
    keys = jax.random.split(key, 16)
    f32 = jnp.float32
    params = {
        "w1": 0.1 * jax.random.normal(keys[0], (ch_out, ch_in, 3, 3), f32),
        "b1": 0.1 * jax.random.normal(keys[1], (ch_out,), f32),
        "g1": 1.0 + 0.1 * jax.random.normal(keys[2], (ch_out,), f32),
        "be1": 0.1 * jax.random.normal(keys[3], (ch_out,), f32),
        "w2": 0.1 * jax.random.normal(keys[4], (ch_out, ch_out, 3, 3), f32),
        "b2": 0.1 * jax.random.normal(keys[5], (ch_out,), f32),
        "g2": 1.0 + 0.1 * jax.random.normal(keys[6], (ch_out,), f32),
        "be2": 0.1 * jax.random.normal(keys[7], (ch_out,), f32),
        "ws": 0.1 * jax.random.normal(keys[8], (ch_out, ch_in, 1, 1), f32),
        "bs": 0.1 * jax.random.normal(keys[9], (ch_out,), f32),
        "gs": 1.0 + 0.1 * jax.random.normal(keys[10], (ch_out,), f32),
        "bes": 0.1 * jax.random.normal(keys[11], (ch_out,), f32),
    }

    x = jax.random.normal(keys[12], (N, ch_in, H, W), f32)

    prep = prepare_params(params, ch_in, ch_out)        # one-time weight prep
    fwd = jax.jit(functools.partial(resblk_forward, ch_in=ch_in, ch_out=ch_out))

    out = jax.block_until_ready(fwd(x, prep))
    ref = jax.block_until_ready(resblk_reference(x, params, ch_in, ch_out))

    # bf16 MXU operands vs f32 reference through two convs + two batchnorms:
    # 3e-2 comfortably covers the bf16 rounding while catching real bugs.
    np.testing.assert_allclose(np.asarray(out), np.asarray(ref),
                               rtol=3e-2, atol=3e-2)
    assert out.shape == (N, ch_out, H, W)

    print("KERNEL_OK")
</pallas_src>

<mosaic_0001>
module attributes {stable_mosaic.version = 11 : i64} {
  func.func @_conv1_kernel(%arg0: i32, %arg1: memref<1x16x16x128xf32, #tpu.memory_space<vmem>>, %arg2: memref<9x128x128xbf16, #tpu.memory_space<vmem>>, %arg3: memref<1x128xf32, #tpu.memory_space<vmem>>, %arg4: memref<128x128xbf16, #tpu.memory_space<vmem>>, %arg5: memref<1x128xf32, #tpu.memory_space<vmem>>, %arg6: memref<1x256x128xbf16, #tpu.memory_space<vmem>>, %arg7: memref<1x128xf32, #tpu.memory_space<vmem>>, %arg8: memref<1x128xf32, #tpu.memory_space<vmem>>, %arg9: memref<1x128xf32, #tpu.memory_space<vmem>>, %arg10: memref<1x128xf32, #tpu.memory_space<vmem>>, %arg11: memref<18x18x128xf32, #tpu.memory_space<vmem>>) attributes {dimension_semantics = [#tpu.dimension_semantics<arbitrary>], iteration_bounds = array<i64: 2>, scalar_prefetch = 0 : i64, scratch_operands = 1 : i64, tpu.core_type = #tpu.core_type<tc>, window_params = [{transform_indices = @transform_0, window_bounds = array<i64: 1, 16, 16, 128>}, {pipeline_mode = #tpu.pipeline_mode<synchronous>, transform_indices = @transform_1, window_bounds = array<i64: 9, 128, 128>}, {pipeline_mode = #tpu.pipeline_mode<synchronous>, transform_indices = @transform_2, window_bounds = array<i64: 1, 128>}, {pipeline_mode = #tpu.pipeline_mode<synchronous>, transform_indices = @transform_3, window_bounds = array<i64: 128, 128>}, {pipeline_mode = #tpu.pipeline_mode<synchronous>, transform_indices = @transform_4, window_bounds = array<i64: 1, 128>}, {transform_indices = @transform_5, window_bounds = array<i64: 1, 256, 128>}, {pipeline_mode = #tpu.pipeline_mode<synchronous>, transform_indices = @transform_6, window_bounds = array<i64: 1, 128>}, {pipeline_mode = #tpu.pipeline_mode<synchronous>, transform_indices = @transform_7, window_bounds = array<i64: 1, 128>}, {pipeline_mode = #tpu.pipeline_mode<synchronous>, transform_indices = @transform_8, window_bounds = array<i64: 1, 128>}, {pipeline_mode = #tpu.pipeline_mode<synchronous>, transform_indices = @transform_9, window_bounds = array<i64: 1, 128>}]} {
    %c0_i32 = arith.constant 0 : i32
    %0 = arith.cmpi eq, %arg0, %c0_i32 : i32
    %1 = arith.extui %0 : i1 to i32
    %c0_i32_0 = arith.constant 0 : i32
    %2 = arith.cmpi ne, %1, %c0_i32_0 : i32
    scf.if %2 {
      %cst_92 = arith.constant 0.000000e+00 : f32
      %106 = vector.broadcast %cst_92 : f32 to vector<18x18x128xf32>
      %c0_93 = arith.constant 0 : index
      %c0_94 = arith.constant 0 : index
      %c0_95 = arith.constant 0 : index
      %107 = vector.load %arg11[%c0_93, %c0_94, %c0_95] : memref<18x18x128xf32, #tpu.memory_space<vmem>>, vector<18x18x128xf32>
      tpu.vector_store %arg11[%c0_93, %c0_94, %c0_95], %106 {strides = array<i32>} : memref<18x18x128xf32, #tpu.memory_space<vmem>>, vector<18x18x128xf32>,
      %cst_96 = arith.constant 0.000000e+00 : f32
      %108 = vector.broadcast %cst_96 : f32 to vector<1x128xf32>
      %c0_97 = arith.constant 0 : index
      %c0_98 = arith.constant 0 : index
      %109 = vector.load %arg7[%c0_97, %c0_98] : memref<1x128xf32, #tpu.memory_space<vmem>>, vector<1x128xf32>
      tpu.vector_store %arg7[%c0_97, %c0_98], %108 {strides = array<i32>} : memref<1x128xf32, #tpu.memory_space<vmem>>, vector<1x128xf32>,
      %cst_99 = arith.constant 0.000000e+00 : f32
      %110 = vector.broadcast %cst_99 : f32 to vector<1x128xf32>
      %c0_100 = arith.constant 0 : index
      %c0_101 = arith.constant 0 : index
      %111 = vector.load %arg8[%c0_100, %c0_101] : memref<1x128xf32, #tpu.memory_space<vmem>>, vector<1x128xf32>
      tpu.vector_store %arg8[%c0_100, %c0_101], %110 {strides = array<i32>} : memref<1x128xf32, #tpu.memory_space<vmem>>, vector<1x128xf32>,
      %cst_102 = arith.constant 0.000000e+00 : f32
      %112 = vector.broadcast %cst_102 : f32 to vector<1x128xf32>
      %c0_103 = arith.constant 0 : index
      %c0_104 = arith.constant 0 : index
      %113 = vector.load %arg9[%c0_103, %c0_104] : memref<1x128xf32, #tpu.memory_space<vmem>>, vector<1x128xf32>
      tpu.vector_store %arg9[%c0_103, %c0_104], %112 {strides = array<i32>} : memref<1x128xf32, #tpu.memory_space<vmem>>, vector<1x128xf32>,
      %cst_105 = arith.constant 0.000000e+00 : f32
      %114 = vector.broadcast %cst_105 : f32 to vector<1x128xf32>
      %c0_106 = arith.constant 0 : index
      %c0_107 = arith.constant 0 : index
      %115 = vector.load %arg10[%c0_106, %c0_107] : memref<1x128xf32, #tpu.memory_space<vmem>>, vector<1x128xf32>
      tpu.vector_store %arg10[%c0_106, %c0_107], %114 {strides = array<i32>} : memref<1x128xf32, #tpu.memory_space<vmem>>, vector<1x128xf32>,
    } else {
    }
    %c0 = arith.constant 0 : index
    %c0_1 = arith.constant 0 : index
    %c0_2 = arith.constant 0 : index
    %c0_3 = arith.constant 0 : index
    %3 = vector.load %arg1[%c0, %c0_1, %c0_2, %c0_3] : memref<1x16x16x128xf32, #tpu.memory_space<vmem>>, vector<1x16x16x128xf32>
    %4 = vector.shape_cast %3 : vector<1x16x16x128xf32> to vector<16x16x128xf32>
    %c1 = arith.constant 1 : index
    %c1_4 = arith.constant 1 : index
    %c0_5 = arith.constant 0 : index
    %5 = vector.load %arg11[%c1, %c1_4, %c0_5] : memref<18x18x128xf32, #tpu.memory_space<vmem>>, vector<16x16x128xf32>
    tpu.vector_store %arg11[%c1, %c1_4, %c0_5], %4 {strides = array<i32>} : memref<18x18x128xf32, #tpu.memory_space<vmem>>, vector<16x16x128xf32>,
    %cst = arith.constant 0.000000e+00 : f32
    %6 = vector.broadcast %cst : f32 to vector<256x128xf32>
    %c0_6 = arith.constant 0 : index
    %c0_7 = arith.constant 0 : index
    %c0_8 = arith.constant 0 : index
    %7 = vector.load %arg11[%c0_6, %c0_7, %c0_8] : memref<18x18x128xf32, #tpu.memory_space<vmem>>, vector<16x16x128xf32>
    %8 = vector.shape_cast %7 : vector<16x16x128xf32> to vector<256x128xf32>
    %9 = arith.truncf %8 : vector<256x128xf32> to vector<256x128xbf16>
    %c0_9 = arith.constant 0 : index
    %c0_10 = arith.constant 0 : index
    %c0_11 = arith.constant 0 : index
    %10 = vector.load %arg2[%c0_9, %c0_10, %c0_11] : memref<9x128x128xbf16, #tpu.memory_space<vmem>>, vector<1x128x128xbf16>
    %11 = vector.shape_cast %10 : vector<1x128x128xbf16> to vector<128x128xbf16>
    %cst_12 = arith.constant dense<0.000000e+00> : vector<256x128xf32>
    %12 = tpu.matmul %9, %11, %cst_12 {dimension_numbers = #tpu.dot_dimension_numbers<[1], [0], [0], [1], [0, 0, 1, 1], [], []>} : vector<256x128xbf16>, vector<128x128xbf16>, vector<256x128xf32> -> vector<256x128xf32>
    %13 = arith.addf %6, %12 : vector<256x128xf32>
    %c0_13 = arith.constant 0 : index
    %c1_14 = arith.constant 1 : index
    %c0_15 = arith.constant 0 : index
    %14 = vector.load %arg11[%c0_13, %c1_14, %c0_15] : memref<18x18x128xf32, #tpu.memory_space<vmem>>, vector<16x16x128xf32>
    %15 = vector.shape_cast %14 : vector<16x16x128xf32> to vector<256x128xf32>
    %16 = arith.truncf %15 : vector<256x128xf32> to vector<256x128xbf16>
    %c1_16 = arith.constant 1 : index
    %c0_17 = arith.constant 0 : index
    %c0_18 = arith.constant 0 : index
    %17 = vector.load %arg2[%c1_16, %c0_17, %c0_18] : memref<9x128x128xbf16, #tpu.memory_space<vmem>>, vector<1x128x128xbf16>
    %18 = vector.shape_cast %17 : vector<1x128x128xbf16> to vector<128x128xbf16>
    %cst_19 = arith.constant dense<0.000000e+00> : vector<256x128xf32>
    %19 = tpu.matmul %16, %18, %cst_19 {dimension_numbers = #tpu.dot_dimension_numbers<[1], [0], [0], [1], [0, 0, 1, 1], [], []>} : vector<256x128xbf16>, vector<128x128xbf16>, vector<256x128xf32> -> vector<256x128xf32>
    %20 = arith.addf %13, %19 : vector<256x128xf32>
    %c0_20 = arith.constant 0 : index
    %c2 = arith.constant 2 : index
    %c0_21 = arith.constant 0 : index
    %21 = vector.load %arg11[%c0_20, %c2, %c0_21] : memref<18x18x128xf32, #tpu.memory_space<vmem>>, vector<16x16x128xf32>
    %22 = vector.shape_cast %21 : vector<16x16x128xf32> to vector<256x128xf32>
    %23 = arith.truncf %22 : vector<256x128xf32> to vector<256x128xbf16>
    %c2_22 = arith.constant 2 : index
    %c0_23 = arith.constant 0 : index
    %c0_24 = arith.constant 0 : index
    %24 = vector.load %arg2[%c2_22, %c0_23, %c0_24] : memref<9x128x128xbf16, #tpu.memory_space<vmem>>, vector<1x128x128xbf16>
    %25 = vector.shape_cast %24 : vector<1x128x128xbf16> to vector<128x128xbf16>
    %cst_25 = arith.constant dense<0.000000e+00> : vector<256x128xf32>
    %26 = tpu.matmul %23, %25, %cst_25 {dimension_numbers = #tpu.dot_dimension_numbers<[1], [0], [0], [1], [0, 0, 1, 1], [], []>} : vector<256x128xbf16>, vector<128x128xbf16>, vector<256x128xf32> -> vector<256x128xf32>
    %27 = arith.addf %20, %26 : vector<256x128xf32>
    %c1_26 = arith.constant 1 : index
    %c0_27 = arith.constant 0 : index
    %c0_28 = arith.constant 0 : index
    %28 = vector.load %arg11[%c1_26, %c0_27, %c0_28] : memref<18x18x128xf32, #tpu.memory_space<vmem>>, vector<16x16x128xf32>
    %29 = vector.shape_cast %28 : vector<16x16x128xf32> to vector<256x128xf32>
    %30 = arith.truncf %29 : vector<256x128xf32> to vector<256x128xbf16>
    %c3 = arith.constant 3 : index
    %c0_29 = arith.constant 0 : index
    %c0_30 = arith.constant 0 : index
    %31 = vector.load %arg2[%c3, %c0_29, %c0_30] : memref<9x128x128xbf16, #tpu.memory_space<vmem>>, vector<1x128x128xbf16>
    %32 = vector.shape_cast %31 : vector<1x128x128xbf16> to vector<128x128xbf16>
    %cst_31 = arith.constant dense<0.000000e+00> : vector<256x128xf32>
    %33 = tpu.matmul %30, %32, %cst_31 {dimension_numbers = #tpu.dot_dimension_numbers<[1], [0], [0], [1], [0, 0, 1, 1], [], []>} : vector<256x128xbf16>, vector<128x128xbf16>, vector<256x128xf32> -> vector<256x128xf32>
    %34 = arith.addf %27, %33 : vector<256x128xf32>
    %c1_32 = arith.constant 1 : index
    %c1_33 = arith.constant 1 : index
    %c0_34 = arith.constant 0 : index
    %35 = vector.load %arg11[%c1_32, %c1_33, %c0_34] : memref<18x18x128xf32, #tpu.memory_space<vmem>>, vector<16x16x128xf32>
    %36 = vector.shape_cast %35 : vector<16x16x128xf32> to vector<256x128xf32>
    %37 = arith.truncf %36 : vector<256x128xf32> to vector<256x128xbf16>
    %c4 = arith.constant 4 : index
    %c0_35 = arith.constant 0 : index
    %c0_36 = arith.constant 0 : index
    %38 = vector.load %arg2[%c4, %c0_35, %c0_36] : memref<9x128x128xbf16, #tpu.memory_space<vmem>>, vector<1x128x128xbf16>
    %39 = vector.shape_cast %38 : vector<1x128x128xbf16> to vector<128x128xbf16>
    %cst_37 = arith.constant dense<0.000000e+00> : vector<256x128xf32>
    %40 = tpu.matmul %37, %39, %cst_37 {dimension_numbers = #tpu.dot_dimension_numbers<[1], [0], [0], [1], [0, 0, 1, 1], [], []>} : vector<256x128xbf16>, vector<128x128xbf16>, vector<256x128xf32> -> vector<256x128xf32>
    %41 = arith.addf %34, %40 : vector<256x128xf32>
    %c1_38 = arith.constant 1 : index
    %c2_39 = arith.constant 2 : index
    %c0_40 = arith.constant 0 : index
    %42 = vector.load %arg11[%c1_38, %c2_39, %c0_40] : memref<18x18x128xf32, #tpu.memory_space<vmem>>, vector<16x16x128xf32>
    %43 = vector.shape_cast %42 : vector<16x16x128xf32> to vector<256x128xf32>
    %44 = arith.truncf %43 : vector<256x128xf32> to vector<256x128xbf16>
    %c5 = arith.constant 5 : index
    %c0_41 = arith.constant 0 : index
    %c0_42 = arith.constant 0 : index
    %45 = vector.load %arg2[%c5, %c0_41, %c0_42] : memref<9x128x128xbf16, #tpu.memory_space<vmem>>, vector<1x128x128xbf16>
    %46 = vector.shape_cast %45 : vector<1x128x128xbf16> to vector<128x128xbf16>
    %cst_43 = arith.constant dense<0.000000e+00> : vector<256x128xf32>
    %47 = tpu.matmul %44, %46, %cst_43 {dimension_numbers = #tpu.dot_dimension_numbers<[1], [0], [0], [1], [0, 0, 1, 1], [], []>} : vector<256x128xbf16>, vector<128x128xbf16>, vector<256x128xf32> -> vector<256x128xf32>
    %48 = arith.addf %41, %47 : vector<256x128xf32>
    %c2_44 = arith.constant 2 : index
    %c0_45 = arith.constant 0 : index
    %c0_46 = arith.constant 0 : index
    %49 = vector.load %arg11[%c2_44, %c0_45, %c0_46] : memref<18x18x128xf32, #tpu.memory_space<vmem>>, vector<16x16x128xf32>
    %50 = vector.shape_cast %49 : vector<16x16x128xf32> to vector<256x128xf32>
    %51 = arith.truncf %50 : vector<256x128xf32> to vector<256x128xbf16>
    %c6 = arith.constant 6 : index
    %c0_47 = arith.constant 0 : index
    %c0_48 = arith.constant 0 : index
    %52 = vector.load %arg2[%c6, %c0_47, %c0_48] : memref<9x128x128xbf16, #tpu.memory_space<vmem>>, vector<1x128x128xbf16>
    %53 = vector.shape_cast %52 : vector<1x128x128xbf16> to vector<128x128xbf16>
    %cst_49 = arith.constant dense<0.000000e+00> : vector<256x128xf32>
    %54 = tpu.matmul %51, %53, %cst_49 {dimension_numbers = #tpu.dot_dimension_numbers<[1], [0], [0], [1], [0, 0, 1, 1], [], []>} : vector<256x128xbf16>, vector<128x128xbf16>, vector<256x128xf32> -> vector<256x128xf32>
    %55 = arith.addf %48, %54 : vector<256x128xf32>
    %c2_50 = arith.constant 2 : index
    %c1_51 = arith.constant 1 : index
    %c0_52 = arith.constant 0 : index
    %56 = vector.load %arg11[%c2_50, %c1_51, %c0_52] : memref<18x18x128xf32, #tpu.memory_space<vmem>>, vector<16x16x128xf32>
    %57 = vector.shape_cast %56 : vector<16x16x128xf32> to vector<256x128xf32>
    %58 = arith.truncf %57 : vector<256x128xf32> to vector<256x128xbf16>
    %c7 = arith.constant 7 : index
    %c0_53 = arith.constant 0 : index
    %c0_54 = arith.constant 0 : index
    %59 = vector.load %arg2[%c7, %c0_53, %c0_54] : memref<9x128x128xbf16, #tpu.memory_space<vmem>>, vector<1x128x128xbf16>
    %60 = vector.shape_cast %59 : vector<1x128x128xbf16> to vector<128x128xbf16>
    %cst_55 = arith.constant dense<0.000000e+00> : vector<256x128xf32>
    %61 = tpu.matmul %58, %60, %cst_55 {dimension_numbers = #tpu.dot_dimension_numbers<[1], [0], [0], [1], [0, 0, 1, 1], [], []>} : vector<256x128xbf16>, vector<128x128xbf16>, vector<256x128xf32> -> vector<256x128xf32>
    %62 = arith.addf %55, %61 : vector<256x128xf32>
    %c2_56 = arith.constant 2 : index
    %c2_57 = arith.constant 2 : index
    %c0_58 = arith.constant 0 : index
    %63 = vector.load %arg11[%c2_56, %c2_57, %c0_58] : memref<18x18x128xf32, #tpu.memory_space<vmem>>, vector<16x16x128xf32>
    %64 = vector.shape_cast %63 : vector<16x16x128xf32> to vector<256x128xf32>
    %65 = arith.truncf %64 : vector<256x128xf32> to vector<256x128xbf16>
    %c8 = arith.constant 8 : index
    %c0_59 = arith.constant 0 : index
    %c0_60 = arith.constant 0 : index
    %66 = vector.load %arg2[%c8, %c0_59, %c0_60] : memref<9x128x128xbf16, #tpu.memory_space<vmem>>, vector<1x128x128xbf16>
    %67 = vector.shape_cast %66 : vector<1x128x128xbf16> to vector<128x128xbf16>
    %cst_61 = arith.constant dense<0.000000e+00> : vector<256x128xf32>
    %68 = tpu.matmul %65, %67, %cst_61 {dimension_numbers = #tpu.dot_dimension_numbers<[1], [0], [0], [1], [0, 0, 1, 1], [], []>} : vector<256x128xbf16>, vector<128x128xbf16>, vector<256x128xf32> -> vector<256x128xf32>
    %69 = arith.addf %62, %68 : vector<256x128xf32>
    %c0_62 = arith.constant 0 : index
    %c0_63 = arith.constant 0 : index
    %70 = vector.load %arg3[%c0_62, %c0_63] : memref<1x128xf32, #tpu.memory_space<vmem>>, vector<1x128xf32>
    %71 = vector.broadcast %70 : vector<1x128xf32> to vector<256x128xf32>
    %72 = arith.addf %69, %71 : vector<256x128xf32>
    %73 = arith.truncf %72 : vector<256x128xf32> to vector<256x128xbf16>
    %c0_64 = arith.constant 0 : index
    %c0_65 = arith.constant 0 : index
    %c0_66 = arith.constant 0 : index
    %74 = vector.load %arg6[%c0_64, %c0_65, %c0_66] : memref<1x256x128xbf16, #tpu.memory_space<vmem>>, vector<1x256x128xbf16>
    %75 = vector.shape_cast %74 : vector<1x256x128xbf16> to vector<256x128xbf16>
    %76 = vector.shape_cast %73 : vector<256x128xbf16> to vector<1x256x128xbf16>
    tpu.vector_store %arg6[%c0_64, %c0_65, %c0_66], %76 {strides = array<i32>} : memref<1x256x128xbf16, #tpu.memory_space<vmem>>, vector<1x256x128xbf16>,
    %c0_67 = arith.constant 0 : index
    %c0_68 = arith.constant 0 : index
    %77 = vector.load %arg7[%c0_67, %c0_68] : memref<1x128xf32, #tpu.memory_space<vmem>>, vector<1x128xf32>
    %cst_69 = arith.constant dense<0.000000e+00> : vector<128xf32>
    %78 = vector.multi_reduction <add>, %72, %cst_69 [0] : vector<256x128xf32> to vector<128xf32>
    %79 = vector.shape_cast %78 : vector<128xf32> to vector<1x128xf32>
    %80 = arith.addf %77, %79 : vector<1x128xf32>
    %c0_70 = arith.constant 0 : index
    %c0_71 = arith.constant 0 : index
    %81 = vector.load %arg7[%c0_70, %c0_71] : memref<1x128xf32, #tpu.memory_space<vmem>>, vector<1x128xf32>
    tpu.vector_store %arg7[%c0_70, %c0_71], %80 {strides = array<i32>} : memref<1x128xf32, #tpu.memory_space<vmem>>, vector<1x128xf32>,
    %c0_72 = arith.constant 0 : index
    %c0_73 = arith.constant 0 : index
    %82 = vector.load %arg8[%c0_72, %c0_73] : memref<1x128xf32, #tpu.memory_space<vmem>>, vector<1x128xf32>
    %83 = arith.mulf %72, %72 : vector<256x128xf32>
    %cst_74 = arith.constant dense<0.000000e+00> : vector<128xf32>
    %84 = vector.multi_reduction <add>, %83, %cst_74 [0] : vector<256x128xf32> to vector<128xf32>
    %85 = vector.shape_cast %84 : vector<128xf32> to vector<1x128xf32>
    %86 = arith.addf %82, %85 : vector<1x128xf32>
    %c0_75 = arith.constant 0 : index
    %c0_76 = arith.constant 0 : index
    %87 = vector.load %arg8[%c0_75, %c0_76] : memref<1x128xf32, #tpu.memory_space<vmem>>, vector<1x128xf32>
    tpu.vector_store %arg8[%c0_75, %c0_76], %86 {strides = array<i32>} : memref<1x128xf32, #tpu.memory_space<vmem>>, vector<1x128xf32>,
    %88 = vector.shape_cast %4 : vector<16x16x128xf32> to vector<256x128xf32>
    %89 = arith.truncf %88 : vector<256x128xf32> to vector<256x128xbf16>
    %c0_77 = arith.constant 0 : index
    %c0_78 = arith.constant 0 : index
    %90 = vector.load %arg4[%c0_77, %c0_78] : memref<128x128xbf16, #tpu.memory_space<vmem>>, vector<128x128xbf16>
    %cst_79 = arith.constant dense<0.000000e+00> : vector<256x128xf32>
    %91 = tpu.matmul %89, %90, %cst_79 {dimension_numbers = #tpu.dot_dimension_numbers<[1], [0], [0], [1], [0, 0, 1, 1], [], []>} : vector<256x128xbf16>, vector<128x128xbf16>, vector<256x128xf32> -> vector<256x128xf32>
    %c0_80 = arith.constant 0 : index
    %c0_81 = arith.constant 0 : index
    %92 = vector.load %arg5[%c0_80, %c0_81] : memref<1x128xf32, #tpu.memory_space<vmem>>, vector<1x128xf32>
    %93 = vector.broadcast %92 : vector<1x128xf32> to vector<256x128xf32>
    %94 = arith.addf %91, %93 : vector<256x128xf32>
    %c0_82 = arith.constant 0 : index
    %c0_83 = arith.constant 0 : index
    %95 = vector.load %arg9[%c0_82, %c0_83] : memref<1x128xf32, #tpu.memory_space<vmem>>, vector<1x128xf32>
    %cst_84 = arith.constant dense<0.000000e+00> : vector<128xf32>
    %96 = vector.multi_reduction <add>, %94, %cst_84 [0] : vector<256x128xf32> to vector<128xf32>
    %97 = vector.shape_cast %96 : vector<128xf32> to vector<1x128xf32>
    %98 = arith.addf %95, %97 : vector<1x128xf32>
    %c0_85 = arith.constant 0 : index
    %c0_86 = arith.constant 0 : index
    %99 = vector.load %arg9[%c0_85, %c0_86] : memref<1x128xf32, #tpu.memory_space<vmem>>, vector<1x128xf32>
    tpu.vector_store %arg9[%c0_85, %c0_86], %98 {strides = array<i32>} : memref<1x128xf32, #tpu.memory_space<vmem>>, vector<1x128xf32>,
    %c0_87 = arith.constant 0 : index
    %c0_88 = arith.constant 0 : index
    %100 = vector.load %arg10[%c0_87, %c0_88] : memref<1x128xf32, #tpu.memory_space<vmem>>, vector<1x128xf32>
    %101 = arith.mulf %94, %94 : vector<256x128xf32>
    %cst_89 = arith.constant dense<0.000000e+00> : vector<128xf32>
    %102 = vector.multi_reduction <add>, %101, %cst_89 [0] : vector<256x128xf32> to vector<128xf32>
    %103 = vector.shape_cast %102 : vector<128xf32> to vector<1x128xf32>
    %104 = arith.addf %100, %103 : vector<1x128xf32>
    %c0_90 = arith.constant 0 : index
    %c0_91 = arith.constant 0 : index
    %105 = vector.load %arg10[%c0_90, %c0_91] : memref<1x128xf32, #tpu.memory_space<vmem>>, vector<1x128xf32>
    tpu.vector_store %arg10[%c0_90, %c0_91], %104 {strides = array<i32>} : memref<1x128xf32, #tpu.memory_space<vmem>>, vector<1x128xf32>,
    return
  }
  func.func @transform_0(%arg0: i32) -> (i32, i32, i32, i32) {
    %c0_i32 = arith.constant 0 : i32
    %c0_i32_0 = arith.constant 0 : i32
    %c0_i32_1 = arith.constant 0 : i32
    %c0_i32_2 = arith.constant 0 : i32
    return %arg0, %c0_i32, %c0_i32_0, %c0_i32_1 : i32, i32, i32, i32
  }
  func.func @transform_1(%arg0: i32) -> (i32, i32, i32) {
    %c0_i32 = arith.constant 0 : i32
    %c0_i32_0 = arith.constant 0 : i32
    %c0_i32_1 = arith.constant 0 : i32
    %c0_i32_2 = arith.constant 0 : i32
    return %c0_i32, %c0_i32_0, %c0_i32_1 : i32, i32, i32
  }
  func.func @transform_2(%arg0: i32) -> (i32, i32) {
    %c0_i32 = arith.constant 0 : i32
    %c0_i32_0 = arith.constant 0 : i32
    %c0_i32_1 = arith.constant 0 : i32
    return %c0_i32, %c0_i32_0 : i32, i32
  }
  func.func @transform_3(%arg0: i32) -> (i32, i32) {
    %c0_i32 = arith.constant 0 : i32
    %c0_i32_0 = arith.constant 0 : i32
    %c0_i32_1 = arith.constant 0 : i32
    return %c0_i32, %c0_i32_0 : i32, i32
  }
  func.func @transform_4(%arg0: i32) -> (i32, i32) {
    %c0_i32 = arith.constant 0 : i32
    %c0_i32_0 = arith.constant 0 : i32
    %c0_i32_1 = arith.constant 0 : i32
    return %c0_i32, %c0_i32_0 : i32, i32
  }
  func.func @transform_5(%arg0: i32) -> (i32, i32, i32) {
    %c0_i32 = arith.constant 0 : i32
    %c0_i32_0 = arith.constant 0 : i32
    %c0_i32_1 = arith.constant 0 : i32
    return %arg0, %c0_i32, %c0_i32_0 : i32, i32, i32
  }
  func.func @transform_6(%arg0: i32) -> (i32, i32) {
    %c0_i32 = arith.constant 0 : i32
    %c0_i32_0 = arith.constant 0 : i32
    %c0_i32_1 = arith.constant 0 : i32
    return %c0_i32, %c0_i32_0 : i32, i32
  }
  func.func @transform_7(%arg0: i32) -> (i32, i32) {
    %c0_i32 = arith.constant 0 : i32
    %c0_i32_0 = arith.constant 0 : i32
    %c0_i32_1 = arith.constant 0 : i32
    return %c0_i32, %c0_i32_0 : i32, i32
  }
  func.func @transform_8(%arg0: i32) -> (i32, i32) {
    %c0_i32 = arith.constant 0 : i32
    %c0_i32_0 = arith.constant 0 : i32
    %c0_i32_1 = arith.constant 0 : i32
    return %c0_i32, %c0_i32_0 : i32, i32
  }
  func.func @transform_9(%arg0: i32) -> (i32, i32) {
    %c0_i32 = arith.constant 0 : i32
    %c0_i32_0 = arith.constant 0 : i32
    %c0_i32_1 = arith.constant 0 : i32
    return %c0_i32, %c0_i32_0 : i32, i32
  }
}

module attributes {stable_mosaic.version = 11 : i64} {
  func.func @_final_proj_kernel(%arg0: i32, %arg1: memref<1x256x128xf32, #tpu.memory_space<vmem>>, %arg2: memref<1x128xf32, #tpu.memory_space<vmem>>, %arg3: memref<1x128xf32, #tpu.memory_space<vmem>>, %arg4: memref<1x16x16x128xf32, #tpu.memory_space<vmem>>, %arg5: memref<128x128xbf16, #tpu.memory_space<vmem>>, %arg6: memref<1x128xf32, #tpu.memory_space<vmem>>, %arg7: memref<1x128xf32, #tpu.memory_space<vmem>>, %arg8: memref<1x128xf32, #tpu.memory_space<vmem>>, %arg9: memref<1x256x128xf32, #tpu.memory_space<vmem>>) attributes {dimension_semantics = [#tpu.dimension_semantics<parallel>], iteration_bounds = array<i64: 2>, scalar_prefetch = 0 : i64, scratch_operands = 0 : i64, tpu.core_type = #tpu.core_type<tc>, window_params = [{transform_indices = @transform_0, window_bounds = array<i64: 1, 256, 128>}, {pipeline_mode = #tpu.pipeline_mode<synchronous>, transform_indices = @transform_1, window_bounds = array<i64: 1, 128>}, {pipeline_mode = #tpu.pipeline_mode<synchronous>, transform_indices = @transform_2, window_bounds = array<i64: 1, 128>}, {transform_indices = @transform_3, window_bounds = array<i64: 1, 16, 16, 128>}, {pipeline_mode = #tpu.pipeline_mode<synchronous>, transform_indices = @transform_4, window_bounds = array<i64: 128, 128>}, {pipeline_mode = #tpu.pipeline_mode<synchronous>, transform_indices = @transform_5, window_bounds = array<i64: 1, 128>}, {pipeline_mode = #tpu.pipeline_mode<synchronous>, transform_indices = @transform_6, window_bounds = array<i64: 1, 128>}, {pipeline_mode = #tpu.pipeline_mode<synchronous>, transform_indices = @transform_7, window_bounds = array<i64: 1, 128>}, {transform_indices = @transform_8, window_bounds = array<i64: 1, 256, 128>}]} {
    %c0 = arith.constant 0 : index
    %c0_0 = arith.constant 0 : index
    %c0_1 = arith.constant 0 : index
    %c0_2 = arith.constant 0 : index
    %0 = vector.load %arg4[%c0, %c0_0, %c0_1, %c0_2] : memref<1x16x16x128xf32, #tpu.memory_space<vmem>>, vector<1x16x16x128xf32>
    %1 = vector.shape_cast %0 : vector<1x16x16x128xf32> to vector<16x16x128xf32>
    %2 = vector.shape_cast %1 : vector<16x16x128xf32> to vector<256x128xf32>
    %3 = arith.truncf %2 : vector<256x128xf32> to vector<256x128xbf16>
    %c0_3 = arith.constant 0 : index
    %c0_4 = arith.constant 0 : index
    %4 = vector.load %arg5[%c0_3, %c0_4] : memref<128x128xbf16, #tpu.memory_space<vmem>>, vector<128x128xbf16>
    %cst = arith.constant dense<0.000000e+00> : vector<256x128xf32>
    %5 = tpu.matmul %3, %4, %cst {dimension_numbers = #tpu.dot_dimension_numbers<[1], [0], [0], [1], [0, 0, 1, 1], [], []>} : vector<256x128xbf16>, vector<128x128xbf16>, vector<256x128xf32> -> vector<256x128xf32>
    %c0_5 = arith.constant 0 : index
    %c0_6 = arith.constant 0 : index
    %6 = vector.load %arg6[%c0_5, %c0_6] : memref<1x128xf32, #tpu.memory_space<vmem>>, vector<1x128xf32>
    %7 = vector.broadcast %6 : vector<1x128xf32> to vector<256x128xf32>
    %8 = arith.addf %5, %7 : vector<256x128xf32>
    %c0_7 = arith.constant 0 : index
    %c0_8 = arith.constant 0 : index
    %c0_9 = arith.constant 0 : index
    %9 = vector.load %arg1[%c0_7, %c0_8, %c0_9] : memref<1x256x128xf32, #tpu.memory_space<vmem>>, vector<1x256x128xf32>
    %10 = vector.shape_cast %9 : vector<1x256x128xf32> to vector<256x128xf32>
    %c0_10 = arith.constant 0 : index
    %c0_11 = arith.constant 0 : index
    %11 = vector.load %arg2[%c0_10, %c0_11] : memref<1x128xf32, #tpu.memory_space<vmem>>, vector<1x128xf32>
    %12 = vector.broadcast %11 : vector<1x128xf32> to vector<256x128xf32>
    %13 = arith.mulf %10, %12 : vector<256x128xf32>
    %c0_12 = arith.constant 0 : index
    %c0_13 = arith.constant 0 : index
    %14 = vector.load %arg3[%c0_12, %c0_13] : memref<1x128xf32, #tpu.memory_space<vmem>>, vector<1x128xf32>
    %15 = vector.broadcast %14 : vector<1x128xf32> to vector<256x128xf32>
    %16 = arith.addf %13, %15 : vector<256x128xf32>
    %c0_14 = arith.constant 0 : index
    %c0_15 = arith.constant 0 : index
    %17 = vector.load %arg7[%c0_14, %c0_15] : memref<1x128xf32, #tpu.memory_space<vmem>>, vector<1x128xf32>
    %18 = vector.broadcast %17 : vector<1x128xf32> to vector<256x128xf32>
    %19 = arith.mulf %8, %18 : vector<256x128xf32>
    %20 = arith.addf %16, %19 : vector<256x128xf32>
    %c0_16 = arith.constant 0 : index
    %c0_17 = arith.constant 0 : index
    %21 = vector.load %arg8[%c0_16, %c0_17] : memref<1x128xf32, #tpu.memory_space<vmem>>, vector<1x128xf32>
    %22 = vector.broadcast %21 : vector<1x128xf32> to vector<256x128xf32>
    %23 = arith.addf %20, %22 : vector<256x128xf32>
    %c0_18 = arith.constant 0 : index
    %c0_19 = arith.constant 0 : index
    %c0_20 = arith.constant 0 : index
    %24 = vector.load %arg9[%c0_18, %c0_19, %c0_20] : memref<1x256x128xf32, #tpu.memory_space<vmem>>, vector<1x256x128xf32>
    %25 = vector.shape_cast %24 : vector<1x256x128xf32> to vector<256x128xf32>
    %26 = vector.shape_cast %23 : vector<256x128xf32> to vector<1x256x128xf32>
    tpu.vector_store %arg9[%c0_18, %c0_19, %c0_20], %26 {strides = array<i32>} : memref<1x256x128xf32, #tpu.memory_space<vmem>>, vector<1x256x128xf32>,
    return
  }
  func.func @transform_0(%arg0: i32) -> (i32, i32, i32) {
    %c0_i32 = arith.constant 0 : i32
    %c0_i32_0 = arith.constant 0 : i32
    %c0_i32_1 = arith.constant 0 : i32
    return %arg0, %c0_i32, %c0_i32_0 : i32, i32, i32
  }
  func.func @transform_1(%arg0: i32) -> (i32, i32) {
    %c0_i32 = arith.constant 0 : i32
    %c0_i32_0 = arith.constant 0 : i32
    %c0_i32_1 = arith.constant 0 : i32
    return %c0_i32, %c0_i32_0 : i32, i32
  }
  func.func @transform_2(%arg0: i32) -> (i32, i32) {
    %c0_i32 = arith.constant 0 : i32
    %c0_i32_0 = arith.constant 0 : i32
    %c0_i32_1 = arith.constant 0 : i32
    return %c0_i32, %c0_i32_0 : i32, i32
  }
  func.func @transform_3(%arg0: i32) -> (i32, i32, i32, i32) {
    %c0_i32 = arith.constant 0 : i32
    %c0_i32_0 = arith.constant 0 : i32
    %c0_i32_1 = arith.constant 0 : i32
    %c0_i32_2 = arith.constant 0 : i32
    return %arg0, %c0_i32, %c0_i32_0, %c0_i32_1 : i32, i32, i32, i32
  }
  func.func @transform_4(%arg0: i32) -> (i32, i32) {
    %c0_i32 = arith.constant 0 : i32
    %c0_i32_0 = arith.constant 0 : i32
    %c0_i32_1 = arith.constant 0 : i32
    return %c0_i32, %c0_i32_0 : i32, i32
  }
  func.func @transform_5(%arg0: i32) -> (i32, i32) {
    %c0_i32 = arith.constant 0 : i32
    %c0_i32_0 = arith.constant 0 : i32
    %c0_i32_1 = arith.constant 0 : i32
    return %c0_i32, %c0_i32_0 : i32, i32
  }
  func.func @transform_6(%arg0: i32) -> (i32, i32) {
    %c0_i32 = arith.constant 0 : i32
    %c0_i32_0 = arith.constant 0 : i32
    %c0_i32_1 = arith.constant 0 : i32
    return %c0_i32, %c0_i32_0 : i32, i32
  }
  func.func @transform_7(%arg0: i32) -> (i32, i32) {
    %c0_i32 = arith.constant 0 : i32
    %c0_i32_0 = arith.constant 0 : i32
    %c0_i32_1 = arith.constant 0 : i32
    return %c0_i32, %c0_i32_0 : i32, i32
  }
  func.func @transform_8(%arg0: i32) -> (i32, i32, i32) {
    %c0_i32 = arith.constant 0 : i32
    %c0_i32_0 = arith.constant 0 : i32
    %c0_i32_1 = arith.constant 0 : i32
    return %arg0, %c0_i32, %c0_i32_0 : i32, i32, i32
  }
}

module attributes {stable_mosaic.version = 11 : i64} {
  func.func @_conv2_kernel(%arg0: i32, %arg1: memref<1x256x128xbf16, #tpu.memory_space<vmem>>, %arg2: memref<1x128xf32, #tpu.memory_space<vmem>>, %arg3: memref<1x128xf32, #tpu.memory_space<vmem>>, %arg4: memref<9x128x128xbf16, #tpu.memory_space<vmem>>, %arg5: memref<1x128xf32, #tpu.memory_space<vmem>>, %arg6: memref<1x256x128xf32, #tpu.memory_space<vmem>>, %arg7: memref<1x128xf32, #tpu.memory_space<vmem>>, %arg8: memref<1x128xf32, #tpu.memory_space<vmem>>, %arg9: memref<18x18x128xf32, #tpu.memory_space<vmem>>) attributes {dimension_semantics = [#tpu.dimension_semantics<arbitrary>], iteration_bounds = array<i64: 2>, scalar_prefetch = 0 : i64, scratch_operands = 1 : i64, tpu.core_type = #tpu.core_type<tc>, window_params = [{transform_indices = @transform_0, window_bounds = array<i64: 1, 256, 128>}, {pipeline_mode = #tpu.pipeline_mode<synchronous>, transform_indices = @transform_1, window_bounds = array<i64: 1, 128>}, {pipeline_mode = #tpu.pipeline_mode<synchronous>, transform_indices = @transform_2, window_bounds = array<i64: 1, 128>}, {pipeline_mode = #tpu.pipeline_mode<synchronous>, transform_indices = @transform_3, window_bounds = array<i64: 9, 128, 128>}, {pipeline_mode = #tpu.pipeline_mode<synchronous>, transform_indices = @transform_4, window_bounds = array<i64: 1, 128>}, {transform_indices = @transform_5, window_bounds = array<i64: 1, 256, 128>}, {pipeline_mode = #tpu.pipeline_mode<synchronous>, transform_indices = @transform_6, window_bounds = array<i64: 1, 128>}, {pipeline_mode = #tpu.pipeline_mode<synchronous>, transform_indices = @transform_7, window_bounds = array<i64: 1, 128>}]} {
    %c0_i32 = arith.constant 0 : i32
    %0 = arith.cmpi eq, %arg0, %c0_i32 : i32
    %1 = arith.extui %0 : i1 to i32
    %c0_i32_0 = arith.constant 0 : i32
    %2 = arith.cmpi ne, %1, %c0_i32_0 : i32
    scf.if %2 {
      %cst_81 = arith.constant 0.000000e+00 : f32
      %97 = vector.broadcast %cst_81 : f32 to vector<18x18x128xf32>
      %c0_82 = arith.constant 0 : index
      %c0_83 = arith.constant 0 : index
      %c0_84 = arith.constant 0 : index
      %98 = vector.load %arg9[%c0_82, %c0_83, %c0_84] : memref<18x18x128xf32, #tpu.memory_space<vmem>>, vector<18x18x128xf32>
      tpu.vector_store %arg9[%c0_82, %c0_83, %c0_84], %97 {strides = array<i32>} : memref<18x18x128xf32, #tpu.memory_space<vmem>>, vector<18x18x128xf32>,
      %cst_85 = arith.constant 0.000000e+00 : f32
      %99 = vector.broadcast %cst_85 : f32 to vector<1x128xf32>
      %c0_86 = arith.constant 0 : index
      %c0_87 = arith.constant 0 : index
      %100 = vector.load %arg7[%c0_86, %c0_87] : memref<1x128xf32, #tpu.memory_space<vmem>>, vector<1x128xf32>
      tpu.vector_store %arg7[%c0_86, %c0_87], %99 {strides = array<i32>} : memref<1x128xf32, #tpu.memory_space<vmem>>, vector<1x128xf32>,
      %cst_88 = arith.constant 0.000000e+00 : f32
      %101 = vector.broadcast %cst_88 : f32 to vector<1x128xf32>
      %c0_89 = arith.constant 0 : index
      %c0_90 = arith.constant 0 : index
      %102 = vector.load %arg8[%c0_89, %c0_90] : memref<1x128xf32, #tpu.memory_space<vmem>>, vector<1x128xf32>
      tpu.vector_store %arg8[%c0_89, %c0_90], %101 {strides = array<i32>} : memref<1x128xf32, #tpu.memory_space<vmem>>, vector<1x128xf32>,
    } else {
    }
    %c0 = arith.constant 0 : index
    %c0_1 = arith.constant 0 : index
    %c0_2 = arith.constant 0 : index
    %3 = vector.load %arg1[%c0, %c0_1, %c0_2] : memref<1x256x128xbf16, #tpu.memory_space<vmem>>, vector<1x256x128xbf16>
    %4 = vector.shape_cast %3 : vector<1x256x128xbf16> to vector<256x128xbf16>
    %5 = arith.extf %4 : vector<256x128xbf16> to vector<256x128xf32>
    %c0_3 = arith.constant 0 : index
    %c0_4 = arith.constant 0 : index
    %6 = vector.load %arg2[%c0_3, %c0_4] : memref<1x128xf32, #tpu.memory_space<vmem>>, vector<1x128xf32>
    %7 = vector.broadcast %6 : vector<1x128xf32> to vector<256x128xf32>
    %8 = arith.mulf %5, %7 : vector<256x128xf32>
    %c0_5 = arith.constant 0 : index
    %c0_6 = arith.constant 0 : index
    %9 = vector.load %arg3[%c0_5, %c0_6] : memref<1x128xf32, #tpu.memory_space<vmem>>, vector<1x128xf32>
    %10 = vector.broadcast %9 : vector<1x128xf32> to vector<256x128xf32>
    %11 = arith.addf %8, %10 : vector<256x128xf32>
    %cst = arith.constant 0.000000e+00 : f32
    %12 = vector.broadcast %cst : f32 to vector<256x128xf32>
    %13 = arith.maximumf %11, %12 : vector<256x128xf32>
    %14 = vector.shape_cast %13 : vector<256x128xf32> to vector<16x16x128xf32>
    %c1 = arith.constant 1 : index
    %c1_7 = arith.constant 1 : index
    %c0_8 = arith.constant 0 : index
    %15 = vector.load %arg9[%c1, %c1_7, %c0_8] : memref<18x18x128xf32, #tpu.memory_space<vmem>>, vector<16x16x128xf32>
    tpu.vector_store %arg9[%c1, %c1_7, %c0_8], %14 {strides = array<i32>} : memref<18x18x128xf32, #tpu.memory_space<vmem>>, vector<16x16x128xf32>,
    %cst_9 = arith.constant 0.000000e+00 : f32
    %16 = vector.broadcast %cst_9 : f32 to vector<256x128xf32>
    %c0_10 = arith.constant 0 : index
    %c0_11 = arith.constant 0 : index
    %c0_12 = arith.constant 0 : index
    %17 = vector.load %arg9[%c0_10, %c0_11, %c0_12] : memref<18x18x128xf32, #tpu.memory_space<vmem>>, vector<16x16x128xf32>
    %18 = vector.shape_cast %17 : vector<16x16x128xf32> to vector<256x128xf32>
    %19 = arith.truncf %18 : vector<256x128xf32> to vector<256x128xbf16>
    %c0_13 = arith.constant 0 : index
    %c0_14 = arith.constant 0 : index
    %c0_15 = arith.constant 0 : index
    %20 = vector.load %arg4[%c0_13, %c0_14, %c0_15] : memref<9x128x128xbf16, #tpu.memory_space<vmem>>, vector<1x128x128xbf16>
    %21 = vector.shape_cast %20 : vector<1x128x128xbf16> to vector<128x128xbf16>
    %cst_16 = arith.constant dense<0.000000e+00> : vector<256x128xf32>
    %22 = tpu.matmul %19, %21, %cst_16 {dimension_numbers = #tpu.dot_dimension_numbers<[1], [0], [0], [1], [0, 0, 1, 1], [], []>} : vector<256x128xbf16>, vector<128x128xbf16>, vector<256x128xf32> -> vector<256x128xf32>
    %23 = arith.addf %16, %22 : vector<256x128xf32>
    %c0_17 = arith.constant 0 : index
    %c1_18 = arith.constant 1 : index
    %c0_19 = arith.constant 0 : index
    %24 = vector.load %arg9[%c0_17, %c1_18, %c0_19] : memref<18x18x128xf32, #tpu.memory_space<vmem>>, vector<16x16x128xf32>
    %25 = vector.shape_cast %24 : vector<16x16x128xf32> to vector<256x128xf32>
    %26 = arith.truncf %25 : vector<256x128xf32> to vector<256x128xbf16>
    %c1_20 = arith.constant 1 : index
    %c0_21 = arith.constant 0 : index
    %c0_22 = arith.constant 0 : index
    %27 = vector.load %arg4[%c1_20, %c0_21, %c0_22] : memref<9x128x128xbf16, #tpu.memory_space<vmem>>, vector<1x128x128xbf16>
    %28 = vector.shape_cast %27 : vector<1x128x128xbf16> to vector<128x128xbf16>
    %cst_23 = arith.constant dense<0.000000e+00> : vector<256x128xf32>
    %29 = tpu.matmul %26, %28, %cst_23 {dimension_numbers = #tpu.dot_dimension_numbers<[1], [0], [0], [1], [0, 0, 1, 1], [], []>} : vector<256x128xbf16>, vector<128x128xbf16>, vector<256x128xf32> -> vector<256x128xf32>
    %30 = arith.addf %23, %29 : vector<256x128xf32>
    %c0_24 = arith.constant 0 : index
    %c2 = arith.constant 2 : index
    %c0_25 = arith.constant 0 : index
    %31 = vector.load %arg9[%c0_24, %c2, %c0_25] : memref<18x18x128xf32, #tpu.memory_space<vmem>>, vector<16x16x128xf32>
    %32 = vector.shape_cast %31 : vector<16x16x128xf32> to vector<256x128xf32>
    %33 = arith.truncf %32 : vector<256x128xf32> to vector<256x128xbf16>
    %c2_26 = arith.constant 2 : index
    %c0_27 = arith.constant 0 : index
    %c0_28 = arith.constant 0 : index
    %34 = vector.load %arg4[%c2_26, %c0_27, %c0_28] : memref<9x128x128xbf16, #tpu.memory_space<vmem>>, vector<1x128x128xbf16>
    %35 = vector.shape_cast %34 : vector<1x128x128xbf16> to vector<128x128xbf16>
    %cst_29 = arith.constant dense<0.000000e+00> : vector<256x128xf32>
    %36 = tpu.matmul %33, %35, %cst_29 {dimension_numbers = #tpu.dot_dimension_numbers<[1], [0], [0], [1], [0, 0, 1, 1], [], []>} : vector<256x128xbf16>, vector<128x128xbf16>, vector<256x128xf32> -> vector<256x128xf32>
    %37 = arith.addf %30, %36 : vector<256x128xf32>
    %c1_30 = arith.constant 1 : index
    %c0_31 = arith.constant 0 : index
    %c0_32 = arith.constant 0 : index
    %38 = vector.load %arg9[%c1_30, %c0_31, %c0_32] : memref<18x18x128xf32, #tpu.memory_space<vmem>>, vector<16x16x128xf32>
    %39 = vector.shape_cast %38 : vector<16x16x128xf32> to vector<256x128xf32>
    %40 = arith.truncf %39 : vector<256x128xf32> to vector<256x128xbf16>
    %c3 = arith.constant 3 : index
    %c0_33 = arith.constant 0 : index
    %c0_34 = arith.constant 0 : index
    %41 = vector.load %arg4[%c3, %c0_33, %c0_34] : memref<9x128x128xbf16, #tpu.memory_space<vmem>>, vector<1x128x128xbf16>
    %42 = vector.shape_cast %41 : vector<1x128x128xbf16> to vector<128x128xbf16>
    %cst_35 = arith.constant dense<0.000000e+00> : vector<256x128xf32>
    %43 = tpu.matmul %40, %42, %cst_35 {dimension_numbers = #tpu.dot_dimension_numbers<[1], [0], [0], [1], [0, 0, 1, 1], [], []>} : vector<256x128xbf16>, vector<128x128xbf16>, vector<256x128xf32> -> vector<256x128xf32>
    %44 = arith.addf %37, %43 : vector<256x128xf32>
    %c1_36 = arith.constant 1 : index
    %c1_37 = arith.constant 1 : index
    %c0_38 = arith.constant 0 : index
    %45 = vector.load %arg9[%c1_36, %c1_37, %c0_38] : memref<18x18x128xf32, #tpu.memory_space<vmem>>, vector<16x16x128xf32>
    %46 = vector.shape_cast %45 : vector<16x16x128xf32> to vector<256x128xf32>
    %47 = arith.truncf %46 : vector<256x128xf32> to vector<256x128xbf16>
    %c4 = arith.constant 4 : index
    %c0_39 = arith.constant 0 : index
    %c0_40 = arith.constant 0 : index
    %48 = vector.load %arg4[%c4, %c0_39, %c0_40] : memref<9x128x128xbf16, #tpu.memory_space<vmem>>, vector<1x128x128xbf16>
    %49 = vector.shape_cast %48 : vector<1x128x128xbf16> to vector<128x128xbf16>
    %cst_41 = arith.constant dense<0.000000e+00> : vector<256x128xf32>
    %50 = tpu.matmul %47, %49, %cst_41 {dimension_numbers = #tpu.dot_dimension_numbers<[1], [0], [0], [1], [0, 0, 1, 1], [], []>} : vector<256x128xbf16>, vector<128x128xbf16>, vector<256x128xf32> -> vector<256x128xf32>
    %51 = arith.addf %44, %50 : vector<256x128xf32>
    %c1_42 = arith.constant 1 : index
    %c2_43 = arith.constant 2 : index
    %c0_44 = arith.constant 0 : index
    %52 = vector.load %arg9[%c1_42, %c2_43, %c0_44] : memref<18x18x128xf32, #tpu.memory_space<vmem>>, vector<16x16x128xf32>
    %53 = vector.shape_cast %52 : vector<16x16x128xf32> to vector<256x128xf32>
    %54 = arith.truncf %53 : vector<256x128xf32> to vector<256x128xbf16>
    %c5 = arith.constant 5 : index
    %c0_45 = arith.constant 0 : index
    %c0_46 = arith.constant 0 : index
    %55 = vector.load %arg4[%c5, %c0_45, %c0_46] : memref<9x128x128xbf16, #tpu.memory_space<vmem>>, vector<1x128x128xbf16>
    %56 = vector.shape_cast %55 : vector<1x128x128xbf16> to vector<128x128xbf16>
    %cst_47 = arith.constant dense<0.000000e+00> : vector<256x128xf32>
    %57 = tpu.matmul %54, %56, %cst_47 {dimension_numbers = #tpu.dot_dimension_numbers<[1], [0], [0], [1], [0, 0, 1, 1], [], []>} : vector<256x128xbf16>, vector<128x128xbf16>, vector<256x128xf32> -> vector<256x128xf32>
    %58 = arith.addf %51, %57 : vector<256x128xf32>
    %c2_48 = arith.constant 2 : index
    %c0_49 = arith.constant 0 : index
    %c0_50 = arith.constant 0 : index
    %59 = vector.load %arg9[%c2_48, %c0_49, %c0_50] : memref<18x18x128xf32, #tpu.memory_space<vmem>>, vector<16x16x128xf32>
    %60 = vector.shape_cast %59 : vector<16x16x128xf32> to vector<256x128xf32>
    %61 = arith.truncf %60 : vector<256x128xf32> to vector<256x128xbf16>
    %c6 = arith.constant 6 : index
    %c0_51 = arith.constant 0 : index
    %c0_52 = arith.constant 0 : index
    %62 = vector.load %arg4[%c6, %c0_51, %c0_52] : memref<9x128x128xbf16, #tpu.memory_space<vmem>>, vector<1x128x128xbf16>
    %63 = vector.shape_cast %62 : vector<1x128x128xbf16> to vector<128x128xbf16>
    %cst_53 = arith.constant dense<0.000000e+00> : vector<256x128xf32>
    %64 = tpu.matmul %61, %63, %cst_53 {dimension_numbers = #tpu.dot_dimension_numbers<[1], [0], [0], [1], [0, 0, 1, 1], [], []>} : vector<256x128xbf16>, vector<128x128xbf16>, vector<256x128xf32> -> vector<256x128xf32>
    %65 = arith.addf %58, %64 : vector<256x128xf32>
    %c2_54 = arith.constant 2 : index
    %c1_55 = arith.constant 1 : index
    %c0_56 = arith.constant 0 : index
    %66 = vector.load %arg9[%c2_54, %c1_55, %c0_56] : memref<18x18x128xf32, #tpu.memory_space<vmem>>, vector<16x16x128xf32>
    %67 = vector.shape_cast %66 : vector<16x16x128xf32> to vector<256x128xf32>
    %68 = arith.truncf %67 : vector<256x128xf32> to vector<256x128xbf16>
    %c7 = arith.constant 7 : index
    %c0_57 = arith.constant 0 : index
    %c0_58 = arith.constant 0 : index
    %69 = vector.load %arg4[%c7, %c0_57, %c0_58] : memref<9x128x128xbf16, #tpu.memory_space<vmem>>, vector<1x128x128xbf16>
    %70 = vector.shape_cast %69 : vector<1x128x128xbf16> to vector<128x128xbf16>
    %cst_59 = arith.constant dense<0.000000e+00> : vector<256x128xf32>
    %71 = tpu.matmul %68, %70, %cst_59 {dimension_numbers = #tpu.dot_dimension_numbers<[1], [0], [0], [1], [0, 0, 1, 1], [], []>} : vector<256x128xbf16>, vector<128x128xbf16>, vector<256x128xf32> -> vector<256x128xf32>
    %72 = arith.addf %65, %71 : vector<256x128xf32>
    %c2_60 = arith.constant 2 : index
    %c2_61 = arith.constant 2 : index
    %c0_62 = arith.constant 0 : index
    %73 = vector.load %arg9[%c2_60, %c2_61, %c0_62] : memref<18x18x128xf32, #tpu.memory_space<vmem>>, vector<16x16x128xf32>
    %74 = vector.shape_cast %73 : vector<16x16x128xf32> to vector<256x128xf32>
    %75 = arith.truncf %74 : vector<256x128xf32> to vector<256x128xbf16>
    %c8 = arith.constant 8 : index
    %c0_63 = arith.constant 0 : index
    %c0_64 = arith.constant 0 : index
    %76 = vector.load %arg4[%c8, %c0_63, %c0_64] : memref<9x128x128xbf16, #tpu.memory_space<vmem>>, vector<1x128x128xbf16>
    %77 = vector.shape_cast %76 : vector<1x128x128xbf16> to vector<128x128xbf16>
    %cst_65 = arith.constant dense<0.000000e+00> : vector<256x128xf32>
    %78 = tpu.matmul %75, %77, %cst_65 {dimension_numbers = #tpu.dot_dimension_numbers<[1], [0], [0], [1], [0, 0, 1, 1], [], []>} : vector<256x128xbf16>, vector<128x128xbf16>, vector<256x128xf32> -> vector<256x128xf32>
    %79 = arith.addf %72, %78 : vector<256x128xf32>
    %c0_66 = arith.constant 0 : index
    %c0_67 = arith.constant 0 : index
    %80 = vector.load %arg5[%c0_66, %c0_67] : memref<1x128xf32, #tpu.memory_space<vmem>>, vector<1x128xf32>
    %81 = vector.broadcast %80 : vector<1x128xf32> to vector<256x128xf32>
    %82 = arith.addf %79, %81 : vector<256x128xf32>
    %c0_68 = arith.constant 0 : index
    %c0_69 = arith.constant 0 : index
    %c0_70 = arith.constant 0 : index
    %83 = vector.load %arg6[%c0_68, %c0_69, %c0_70] : memref<1x256x128xf32, #tpu.memory_space<vmem>>, vector<1x256x128xf32>
    %84 = vector.shape_cast %83 : vector<1x256x128xf32> to vector<256x128xf32>
    %85 = vector.shape_cast %82 : vector<256x128xf32> to vector<1x256x128xf32>
    tpu.vector_store %arg6[%c0_68, %c0_69, %c0_70], %85 {strides = array<i32>} : memref<1x256x128xf32, #tpu.memory_space<vmem>>, vector<1x256x128xf32>,
    %c0_71 = arith.constant 0 : index
    %c0_72 = arith.constant 0 : index
    %86 = vector.load %arg7[%c0_71, %c0_72] : memref<1x128xf32, #tpu.memory_space<vmem>>, vector<1x128xf32>
    %cst_73 = arith.constant dense<0.000000e+00> : vector<128xf32>
    %87 = vector.multi_reduction <add>, %82, %cst_73 [0] : vector<256x128xf32> to vector<128xf32>
    %88 = vector.shape_cast %87 : vector<128xf32> to vector<1x128xf32>
    %89 = arith.addf %86, %88 : vector<1x128xf32>
    %c0_74 = arith.constant 0 : index
    %c0_75 = arith.constant 0 : index
    %90 = vector.load %arg7[%c0_74, %c0_75] : memref<1x128xf32, #tpu.memory_space<vmem>>, vector<1x128xf32>
    tpu.vector_store %arg7[%c0_74, %c0_75], %89 {strides = array<i32>} : memref<1x128xf32, #tpu.memory_space<vmem>>, vector<1x128xf32>,
    %c0_76 = arith.constant 0 : index
    %c0_77 = arith.constant 0 : index
    %91 = vector.load %arg8[%c0_76, %c0_77] : memref<1x128xf32, #tpu.memory_space<vmem>>, vector<1x128xf32>
    %92 = arith.mulf %82, %82 : vector<256x128xf32>
    %cst_78 = arith.constant dense<0.000000e+00> : vector<128xf32>
    %93 = vector.multi_reduction <add>, %92, %cst_78 [0] : vector<256x128xf32> to vector<128xf32>
    %94 = vector.shape_cast %93 : vector<128xf32> to vector<1x128xf32>
    %95 = arith.addf %91, %94 : vector<1x128xf32>
    %c0_79 = arith.constant 0 : index
    %c0_80 = arith.constant 0 : index
    %96 = vector.load %arg8[%c0_79, %c0_80] : memref<1x128xf32, #tpu.memory_space<vmem>>, vector<1x128xf32>
    tpu.vector_store %arg8[%c0_79, %c0_80], %95 {strides = array<i32>} : memref<1x128xf32, #tpu.memory_space<vmem>>, vector<1x128xf32>,
    return
  }
  func.func @transform_0(%arg0: i32) -> (i32, i32, i32) {
    %c0_i32 = arith.constant 0 : i32
    %c0_i32_0 = arith.constant 0 : i32
    %c0_i32_1 = arith.constant 0 : i32
    return %arg0, %c0_i32, %c0_i32_0 : i32, i32, i32
  }
  func.func @transform_1(%arg0: i32) -> (i32, i32) {
    %c0_i32 = arith.constant 0 : i32
    %c0_i32_0 = arith.constant 0 : i32
    %c0_i32_1 = arith.constant 0 : i32
    return %c0_i32, %c0_i32_0 : i32, i32
  }
  func.func @transform_2(%arg0: i32) -> (i32, i32) {
    %c0_i32 = arith.constant 0 : i32
    %c0_i32_0 = arith.constant 0 : i32
    %c0_i32_1 = arith.constant 0 : i32
    return %c0_i32, %c0_i32_0 : i32, i32
  }
  func.func @transform_3(%arg0: i32) -> (i32, i32, i32) {
    %c0_i32 = arith.constant 0 : i32
    %c0_i32_0 = arith.constant 0 : i32
    %c0_i32_1 = arith.constant 0 : i32
    %c0_i32_2 = arith.constant 0 : i32
    return %c0_i32, %c0_i32_0, %c0_i32_1 : i32, i32, i32
  }
  func.func @transform_4(%arg0: i32) -> (i32, i32) {
    %c0_i32 = arith.constant 0 : i32
    %c0_i32_0 = arith.constant 0 : i32
    %c0_i32_1 = arith.constant 0 : i32
    return %c0_i32, %c0_i32_0 : i32, i32
  }
  func.func @transform_5(%arg0: i32) -> (i32, i32, i32) {
    %c0_i32 = arith.constant 0 : i32
    %c0_i32_0 = arith.constant 0 : i32
    %c0_i32_1 = arith.constant 0 : i32
    return %arg0, %c0_i32, %c0_i32_0 : i32, i32, i32
  }
  func.func @transform_6(%arg0: i32) -> (i32, i32) {
    %c0_i32 = arith.constant 0 : i32
    %c0_i32_0 = arith.constant 0 : i32
    %c0_i32_1 = arith.constant 0 : i32
    return %c0_i32, %c0_i32_0 : i32, i32
  }
  func.func @transform_7(%arg0: i32) -> (i32, i32) {
    %c0_i32 = arith.constant 0 : i32
    %c0_i32_0 = arith.constant 0 : i32
    %c0_i32_1 = arith.constant 0 : i32
    return %c0_i32, %c0_i32_0 : i32, i32
  }
}

</mosaic_0001>

<bundles_post_ra>
// kernel: resblk_forward.5
= control target key start
LH: loop header
LB: loop body
LE: loop exit
PB: predicated region body
PF: predicated region fallthrough
CT: control target
= control target key end

     0   :  { %s1112_s27 = smov 0   ;;  %s1544_s0 = inlined_call_operand.vmem [shape: f32[2,256,128], index: 0, kind: input, shape index: {}]   ;;  %s1545_s1 = inlined_call_operand.vmem [shape: f32[1,128], index: 1, kind: input, shape index: {}]   ;;  %s1546_s2 = inlined_call_operand.vmem [shape: f32[1,128], index: 2, kind: input, shape index: {}]   ;;  %s1547_s3 = inlined_call_operand.vmem [shape: f32[2,16,16,128], index: 3, kind: input, shape index: {}]   ;;  %s1548_s4 = inlined_call_operand.vmem [shape: bf16[128,128], index: 4, kind: input, shape index: {}]   ;;  %s1549_s5 = inlined_call_operand.vmem [shape: f32[1,128], index: 5, kind: input, shape index: {}]   ;;  %s1550_s6 = inlined_call_operand.vmem [shape: f32[1,128], index: 6, kind: input, shape index: {}]   ;;  %s1551_s7 = inlined_call_operand.vmem [shape: f32[1,128], index: 7, kind: input, shape index: {}]   ;;  %s1552_s8 = inlined_call_operand.vmem [shape: f32[2,256,128], index: 8, kind: output, shape index: {}]  }
   0x1 LB: > { %s926_s28 = sadd.s32 4294967295, %s1065_s27   ;;  %p930_p0 = scmp.ge.s32.totalorder %s1065_s27, 1  ;;  %s1065_s27 = sphi %s1112_s27, %s18_s27  }
   0x2   : > { %p272_p1 = scmp.lt.s32.totalorder %s1065_s27, 3 }
   0x4   : > { %p273_p2 = pnand %p930_p0, %p272_p1 }
   0x5   : > { %v1051_v0 = vld [vmem:[%s1548_s4] sm:$0xff] (!%p273_p2)   ;;  %p311_p3 = scmp.lt.s32.totalorder (!%p273_p2), %s926_s28, 1  ;;  %v1052_v1 = vld [vmem:[%s1548_s4 + $0x8] sm:$0xff] (!%p273_p2)   ;;  %v1053_v2 = vld [vmem:[%s1548_s4 + $0x10] sm:$0xff] (!%p273_p2)  }
   0x6   : > { %276 = sbr.rel (%p273_p2) target bundleno = 289 (0x121), region = 52  ;;  %979 = vmatprep.subr.bf16.mxu0 (!%p273_p2), %v1051_v0  ;;  %1027 = vmatprep.subr.bf16.mxu1 (!%p273_p2), %v1051_v0  ;;  %v1054_v3 = vld [vmem:[%s1548_s4 + $0x18] sm:$0xff] (!%p273_p2)   ;;  %v1055_v10 = vld [vmem:[%s1548_s4 + $0x20] sm:$0xff] (!%p273_p2)   ;;  %v1056_v11 = vld [vmem:[%s1548_s4 + $0x28] sm:$0xff] (!%p273_p2)  }
   0x7   : > { %980 = vmatpush3.bf16.msra.mxu0 (!%p273_p2), %v1051_v0  ;;  %1035 = vmatpush3.bf16.msra.mxu1 (!%p273_p2), %v1051_v0  ;;  %v1057_v12 = vld [vmem:[%s1548_s4 + $0x30] sm:$0xff] (!%p273_p2)   ;;  %v1058_v13 = vld [vmem:[%s1548_s4 + $0x38] sm:$0xff] (!%p273_p2)   ;;  %v1194_v57 = vld [vmem:[%s1545_s1] ss:$0 sm:$0xff] (!%p273_p2) }
   0x8   : > { %981 = vmatprep.subr.bf16.mxu0 (!%p273_p2), %v1052_v1  ;;  %1028 = vmatprep.subr.bf16.mxu1 (!%p273_p2), %v1052_v1 }
   0xb   : > { %982 = vmatpush3.bf16.msra.mxu0 (!%p273_p2), %v1052_v1  ;;  %1036 = vmatpush3.bf16.msra.mxu1 (!%p273_p2), %v1052_v1 }
   0xc   : > { %983 = vmatprep.subr.bf16.mxu0 (!%p273_p2), %v1053_v2  ;;  %1029 = vmatprep.subr.bf16.mxu1 (!%p273_p2), %v1053_v2 }
   0xd   : > { %s1554_s28 = smov (!%p311_p3, %s926_s28), 1 }
   0xe   : > { %s1129_s13 = sshll.u32 %s1554_s28, 8 }
   0xf   : > { %s1135_s16 = scalar_lea.vmem %s1547_s3, %s1129_s13  ;;  %984 = vmatpush3.bf16.msra.mxu0 %v1053_v2  ;;  %1037 = vmatpush3.bf16.msra.mxu1 %v1053_v2  ;;  %s1188_s30 = scalar_lea.vmem %s1544_s0, %s1129_s13 }
  0x10   : > { %v327_v4 = vld [vmem:[%s1135_s16] sm:$0xff]  ;;  %v328_v5 = vld [vmem:[%s1135_s16 + $0x8] sm:$0xff]  ;;  %985 = vmatprep.subr.bf16.mxu0 %v1054_v3  ;;  %1030 = vmatprep.subr.bf16.mxu1 %v1054_v3  ;;  %v329_v14 = vld [vmem:[%s1135_s16 + $0x10] sm:$0xff]  ;;  %s1395_s22 = scalar_lea.vmem %s1552_s8, %s1129_s13 }
  0x11   : > { %v343_v6 = vld [vmem:[%s1135_s16 + $0x80] sm:$0xff]  ;;  %v359_v7 = vpack.c.bf16 %v328_v5, %v327_v4  ;;  %v344_v8 = vld [vmem:[%s1135_s16 + $0x88] sm:$0xff]  ;;  %v330_v15 = vld [vmem:[%s1135_s16 + $0x18] sm:$0xff] }
  0x12   : > { %v367_v9 = vpack.c.bf16 %v344_v8, %v343_v6  ;;  %v345_v16 = vld [vmem:[%s1135_s16 + $0x90] sm:$0xff]  ;;  %v346_v17 = vld [vmem:[%s1135_s16 + $0x98] sm:$0xff]  ;;  %v331_v18 = vld [vmem:[%s1135_s16 + $0x20] sm:$0xff]  ;;  %v360_v22 = vpack.c.bf16 %v330_v15, %v329_v14 }
  0x13   : > { %995 = vmatprep.mubr.bf16.mxu0 %v359_v7  ;;  %986 = vmatpush3.bf16.msra.mxu0 %v1054_v3  ;;  %v332_v19 = vld [vmem:[%s1135_s16 + $0x28] sm:$0xff]  ;;  %v347_v20 = vld [vmem:[%s1135_s16 + $0xa0] sm:$0xff]  ;;  %v368_v23 = vpack.c.bf16 %v346_v17, %v345_v16  ;;  %v333_v26 = vld [vmem:[%s1135_s16 + $0x30] sm:$0xff] }
  0x14   : > { %1011 = vmatprep.mubr.bf16.mxu1 %v367_v9  ;;  %1038 = vmatpush3.bf16.msra.mxu1 %v1054_v3  ;;  %v348_v21 = vld [vmem:[%s1135_s16 + $0xa8] sm:$0xff]  ;;  %v361_v24 = vpack.c.bf16 %v332_v19, %v331_v18  ;;  %v334_v27 = vld [vmem:[%s1135_s16 + $0x38] sm:$0xff]  ;;  %v349_v28 = vld [vmem:[%s1135_s16 + $0xb0] sm:$0xff] }
  0x15   : > { %987 = vmatprep.subr.bf16.mxu0 %v1055_v10  ;;  %1031 = vmatprep.subr.bf16.mxu1 %v1055_v10  ;;  %v369_v25 = vpack.c.bf16 %v348_v21, %v347_v20  ;;  %v350_v29 = vld [vmem:[%s1135_s16 + $0xb8] sm:$0xff]  ;;  %v335_v30 = vld [vmem:[%s1135_s16 + $0x40] sm:$0xff]  ;;  %v336_v31 = vld [vmem:[%s1135_s16 + $0x48] sm:$0xff]  ;;  %v362_v34 = vpack.c.bf16 %v334_v27, %v333_v26 }
  0x16   : > { %v351_v32 = vld [vmem:[%s1135_s16 + $0xc0] sm:$0xff]  ;;  %v352_v33 = vld [vmem:[%s1135_s16 + $0xc8] sm:$0xff]  ;;  %v370_v35 = vpack.c.bf16 %v350_v29, %v349_v28  ;;  %v363_v36 = vpack.c.bf16 %v336_v31, %v335_v30  ;;  %v337_v38 = vld [vmem:[%s1135_s16 + $0x50] sm:$0xff] }
  0x17   : > { %988 = vmatpush3.bf16.msra.mxu0 %v1055_v10  ;;  %v371_v37 = vpack.c.bf16 %v352_v33, %v351_v32  ;;  %v338_v39 = vld [vmem:[%s1135_s16 + $0x58] sm:$0xff]  ;;  %v353_v40 = vld [vmem:[%s1135_s16 + $0xd0] sm:$0xff]  ;;  %v339_v42 = vld [vmem:[%s1135_s16 + $0x60] sm:$0xff] }
  0x18   : > { %1039 = vmatpush3.bf16.msra.mxu1 %v1055_v10  ;;  %989 = vmatprep.subr.bf16.mxu0 %v1056_v11  ;;  %v354_v41 = vld [vmem:[%s1135_s16 + $0xd8] sm:$0xff]  ;;  %v340_v43 = vld [vmem:[%s1135_s16 + $0x68] sm:$0xff]  ;;  %v355_v44 = vld [vmem:[%s1135_s16 + $0xe0] sm:$0xff]  ;;  %v364_v46 = vpack.c.bf16 %v338_v39, %v337_v38 }
  0x19   : > { %1032 = vmatprep.subr.bf16.mxu1 %v1056_v11  ;;  %v356_v45 = vld [vmem:[%s1135_s16 + $0xe8] sm:$0xff]  ;;  %v372_v47 = vpack.c.bf16 %v354_v41, %v353_v40  ;;  %v365_v48 = vpack.c.bf16 %v340_v43, %v339_v42  ;;  %v341_v50 = vld [vmem:[%s1135_s16 + $0x70] sm:$0xff]  ;;  %v342_v51 = vld [vmem:[%s1135_s16 + $0x78] sm:$0xff] }
  0x1a   : > { %v373_v49 = vpack.c.bf16 %v356_v45, %v355_v44  ;;  %v357_v52 = vld [vmem:[%s1135_s16 + $0xf0] sm:$0xff]  ;;  %v358_v53 = vld [vmem:[%s1135_s16 + $0xf8] sm:$0xff]  ;;  %v366_v54 = vpack.c.bf16 %v342_v51, %v341_v50  ;;  %v607_v59 = vld [vmem:[%s1188_s30] sm:$0xff] }
  0x1b   : > { %990 = vmatpush3.bf16.msra.mxu0 %v1056_v11  ;;  %v374_v55 = vpack.c.bf16 %v358_v53, %v357_v52  ;;  %v609_v56 = vld [vmem:[%s1188_s30 + $0x10] sm:$0xff]  ;;  %v623_v60 = vld [vmem:[%s1188_s30 + $0x80] sm:$0xff]  ;;  %v610_v61 = vld [vmem:[%s1188_s30 + $0x18] sm:$0xff]  ;;  %v646_v8 = vmul.f32 %v1194_v57, %v607_v59 }
  0x1c   : > { %1040 = vmatpush3.bf16.msra.mxu1 %v1056_v11  ;;  %991 = vmatprep.subr.bf16.mxu0 %v1057_v12  ;;  %v625_v58 = vld [vmem:[%s1188_s30 + $0x90] sm:$0xff]  ;;  %v626_v62 = vld [vmem:[%s1188_s30 + $0x98] sm:$0xff]  ;;  %v608_v63 = vld [vmem:[%s1188_s30 + $0x8] sm:$0xff]  ;;  %v648_v2 = vmul.f32 %v1194_v57, %v609_v56  ;;  %v662_v9 = vmul.f32 %v1194_v57, %v623_v60 }
  0x1d   : > { %1033 = vmatprep.subr.bf16.mxu1 %v1057_v12  ;;  %v624_v0 = vld [vmem:[%s1188_s30 + $0x88] sm:$0xff]  ;;  %v613_v1 = vld [vmem:[%s1188_s30 + $0x30] sm:$0xff]  ;;  %v664_v3 = vmul.f32 %v1194_v57, %v625_v58  ;;  %v611_v5 = vld [vmem:[%s1188_s30 + $0x20] sm:$0xff]  ;;  %v647_v14 = vmul.f32 %v1194_v57, %v608_v63 }
  0x1e   : > { %v629_v4 = vld [vmem:[%s1188_s30 + $0xb0] sm:$0xff]  ;;  %v627_v6 = vld [vmem:[%s1188_s30 + $0xa0] sm:$0xff]  ;;  %v614_v10 = vld [vmem:[%s1188_s30 + $0x38] sm:$0xff]  ;;  %v663_v15 = vmul.f32 %v1194_v57, %v624_v0  ;;  %v652_v18 = vmul.f32 %v1194_v57, %v613_v1  ;;  %v650_v20 = vmul.f32 %v1194_v57, %v611_v5 }
  0x1f   : > { %992 = vmatpush3.bf16.msra.mxu0 %v1057_v12  ;;  %v1212_v7 = vld [vmem:[%s1546_s2] ss:$0 sm:$0xff]  ;;  %v630_v11 = vld [vmem:[%s1188_s30 + $0xb8] sm:$0xff]  ;;  %v612_v16 = vld [vmem:[%s1188_s30 + $0x28] sm:$0xff]  ;;  %v668_v19 = vmul.f32 %v1194_v57, %v629_v4  ;;  %v666_v21 = vmul.f32 %v1194_v57, %v627_v6 }
  0x20   : > { %1041 = vmatpush3.bf16.msra.mxu1 %v1057_v12  ;;  %993 = vmatprep.subr.bf16.mxu0 %v1058_v13  ;;  %v649_v12 = vmul.f32 %v1194_v57, %v610_v61  ;;  %v628_v17 = vld [vmem:[%s1188_s30 + $0xa8] sm:$0xff]  ;;  %v1237_v26 = vadd.f32 %v1212_v7, %v646_v8  ;;  %v1240_v27 = vadd.f32 %v1212_v7, %v662_v9  ;;  %v617_v30 = vld [vmem:[%s1188_s30 + $0x50] sm:$0xff]  ;;  %v615_v32 = vld [vmem:[%s1188_s30 + $0x40] sm:$0xff] }
  0x21   : > { %1034 = vmatprep.subr.bf16.mxu1 %v1058_v13  ;;  %v651_v28 = vmul.f32 %v1194_v57, %v612_v16  ;;  %v667_v29 = vmul.f32 %v1194_v57, %v628_v17  ;;  %v633_v31 = vld [vmem:[%s1188_s30 + $0xd0] sm:$0xff]  ;;  %v618_v38 = vld [vmem:[%s1188_s30 + $0x58] sm:$0xff]  ;;  %v1263_v40 = vadd.f32 %v1212_v7, %v652_v18  ;;  %v1266_v41 = vadd.f32 %v1212_v7, %v668_v19  ;;  %v616_v44 = vld [vmem:[%s1188_s30 + $0x48] sm:$0xff] }
  0x22   : > { %v1248_v33 = vadd.f32 %v1212_v7, %v649_v12  ;;  %v634_v39 = vld [vmem:[%s1188_s30 + $0xd8] sm:$0xff]  ;;  %v1269_v42 = vadd.f32 %v1212_v7, %v650_v20  ;;  %v1272_v43 = vadd.f32 %v1212_v7, %v666_v21  ;;  %v632_v45 = vld [vmem:[%s1188_s30 + $0xc8] sm:$0xff]  ;;  %v672_v50 = vmul.f32 %v1194_v57, %v633_v31  ;;  %v637_v51 = vld [vmem:[%s1188_s30 + $0xf0] sm:$0xff] }
  0x23   : > { %994 = vmatpush3.bf16.msra.mxu0 %v1058_v13  ;;  %v619_v52 = vld [vmem:[%s1188_s30 + $0x60] sm:$0xff]  ;;  %v654_v56 = vmul.f32 %v1194_v57, %v615_v32  ;;  %v622_v59 = vld [vmem:[%s1188_s30 + $0x78] sm:$0xff]  ;;  %v657_v61 = vmul.f32 %v1194_v57, %v618_v38  ;;  %v655_v63 = vmul.f32 %v1194_v57, %v616_v44  ;;  %v671_v0 = vmul.f32 %v1194_v57, %v632_v45  ;;  %v620_v1 = vld [vmem:[%s1188_s30 + $0x68] sm:$0xff] }
  0x24   : > { %1042 = vmatpush3.bf16.msra.mxu1 %v1058_v13  ;;  %v665_v13 = vmul.f32 %v1194_v57, %v626_v62  ;;  %v635_v53 = vld [vmem:[%s1188_s30 + $0xe0] sm:$0xff]  ;;  %v638_v60 = vld [vmem:[%s1188_s30 + $0xf8] sm:$0xff]  ;;  %v673_v62 = vmul.f32 %v1194_v57, %v634_v39  ;;  %v676_v4 = vmul.f32 %v1194_v57, %v637_v51  ;;  %v658_v5 = vmul.f32 %v1194_v57, %v619_v52 }
  0x25   : > { %v674_v6 = vmul.f32 %v1194_v57, %v635_v53  ;;  %v1312_v9 = vadd.f32 %v1212_v7, %v672_v50  ;;  %v1319_v12 = vld [vmem:[%s1549_s5] ss:$0 sm:$0xff]  ;;  %v1330_v17 = vadd.f32 %v1212_v7, %v657_v61  ;;  %v1336_v19 = vadd.f32 %v1212_v7, %v655_v63 }
  0x26   : > { %996 = vmatmul.mubr.bf16.vlgmr.msra.gmra.mrb[0].mxu0 %v360_v22  ;;  %v1229_v22 = vadd.f32 %v1212_v7, %v648_v2  ;;  %v636_v2 = vld [vmem:[%s1188_s30 + $0xe8] sm:$0xff]  ;;  %v1333_v18 = vadd.f32 %v1212_v7, %v673_v62  ;;  %v1339_v20 = vadd.f32 %v1212_v7, %v671_v0  ;;  %v1381_v62 = vld [vmem:[%s1551_s7] ss:$0 sm:$0xff] }
  0x27   : > { %1012 = vmatmul.mubr.bf16.vlgmr.msra.gmra.mrb[0].mxu1 %v368_v23  ;;  %999 = vmatprep.mubr.bf16.mxu0 %v361_v24  ;;  %v1232_v23 = vadd.f32 %v1212_v7, %v664_v3  ;;  %v653_v24 = vmul.f32 %v1194_v57, %v614_v10  ;;  %v661_v10 = vmul.f32 %v1194_v57, %v622_v59 }
  0x28   : > { %1015 = vmatprep.mubr.bf16.mxu1 %v369_v25  ;;  %v669_v25 = vmul.f32 %v1194_v57, %v630_v11  ;;  %v677_v11 = vmul.f32 %v1194_v57, %v638_v60  ;;  %v675_v16 = vmul.f32 %v1194_v57, %v636_v2 }
  0x29   : > { %v1361_v39 = vadd.f32 %v1212_v7, %v661_v10 }
  0x2a   : > { %v1364_v44 = vadd.f32 %v1212_v7, %v677_v11  ;;  %v1372_v52 = vadd.f32 %v1212_v7, %v675_v16 }
  0x2e   : > { %1000 = vmatmul.mubr.bf16.gmra.mrb[4].mxu0 %v362_v34  ;;  %v1251_v34 = vadd.f32 %v1212_v7, %v665_v13  ;;  %v1322_v13 = vadd.f32 %v1212_v7, %v654_v56 }
  0x2f   : > { %1016 = vmatmul.mubr.bf16.gmra.mrb[4].mxu1 %v370_v35  ;;  %1003 = vmatprep.mubr.bf16.mxu0 %v363_v36  ;;  %v1254_v35 = vadd.f32 %v1212_v7, %v647_v14  ;;  %v1257_v36 = vadd.f32 %v1212_v7, %v663_v15  ;;  %v659_v15 = vmul.f32 %v1194_v57, %v620_v1 }
  0x30   : > { %1019 = vmatprep.mubr.bf16.mxu1 %v371_v37  ;;  %v631_v37 = vld [vmem:[%s1188_s30 + $0xc0] sm:$0xff] }
  0x31   : > { %v670_v58 = vmul.f32 %v1194_v57, %v631_v37  ;;  %v1369_v51 = vadd.f32 %v1212_v7, %v659_v15 }
  0x33   : > { %v1325_v14 = vadd.f32 %v1212_v7, %v670_v58 }
  0x36   : > { %1004 = vmatmul.mubr.bf16.gmra.mrb[8].mxu0 %v364_v46  ;;  %v621_v46 = vld [vmem:[%s1188_s30 + $0x70] sm:$0xff] }
  0x37   : > { %1020 = vmatmul.mubr.bf16.gmra.mrb[8].mxu1 %v372_v47  ;;  %1007 = vmatprep.mubr.bf16.mxu0 %v365_v48  ;;  %v1278_v47 = vadd.f32 %v1212_v7, %v653_v24  ;;  %v1281_v48 = vadd.f32 %v1212_v7, %v669_v25  ;;  %v660_v3 = vmul.f32 %v1194_v57, %v621_v46  ;;  %v1344_v24 = vld [vmem:[%s1550_s6] ss:$0 sm:$0xff] }
  0x38   : > { %1023 = vmatprep.mubr.bf16.mxu1 %v373_v49  ;;  %v656_v49 = vmul.f32 %v1194_v57, %v617_v30  ;;  %v1356_v30 = vadd.f32 %v1212_v7, %v674_v6 }
  0x39   : > { %v1347_v57 = vadd.f32 %v1212_v7, %v660_v3 }
  0x3a   : > { %v1309_v8 = vadd.f32 %v1212_v7, %v656_v49 }
  0x3e   : > { %1008 = vmatmul.mubr.bf16.gmra.mrb[12].mxu0 %v366_v54  ;;  %v1289_v54 = vadd.f32 %v1212_v7, %v651_v28  ;;  %v1350_v28 = vadd.f32 %v1212_v7, %v676_v4 }
  0x3f   : > { %1024 = vmatmul.mubr.bf16.gmra.mrb[12].mxu1 %v374_v55  ;;  %v1292_v55 = vadd.f32 %v1212_v7, %v667_v29  ;;  %v1353_v29 = vadd.f32 %v1212_v7, %v658_v5 }
  0xf9   : > { %v997_v21 = vpop.f32.mrb[0].mxu0 }
  0xfa   : > { %v1013_v25 = vpop.f32.mrb[0].mxu1  ;;  %v489_v31 = vadd.f32 %v997_v21, %v1319_v12  ;;  %v480_v37 = vpop.f32.mrb[1].mxu0 }
  0xfb   : > { %v553_v32 = vadd.f32 %v1013_v25, %v1319_v12  ;;  %v544_v38 = vpop.f32.mrb[1].mxu1  ;;  %v481_v45 = vadd.f32 %v1319_v12, %v480_v37  ;;  %v998_v49 = vpop.f32.mrb[2].mxu0 }
  0xfc   : > { %v545_v46 = vadd.f32 %v1319_v12, %v544_v38  ;;  %v1014_v50 = vpop.f32.mrb[2].mxu1  ;;  %v726_v53 = vmul.f32 %v1344_v24, %v489_v31  ;;  %v492_v58 = vadd.f32 %v998_v49, %v1319_v12  ;;  %v483_v60 = vpop.f32.mrb[3].mxu0 }
  0xfd   : > { %v742_v56 = vmul.f32 %v1344_v24, %v553_v32  ;;  %v556_v59 = vadd.f32 %v1014_v50, %v1319_v12  ;;  %v547_v61 = vpop.f32.mrb[3].mxu1  ;;  %v724_v63 = vmul.f32 %v1344_v24, %v481_v45  ;;  %v484_v0 = vadd.f32 %v1319_v12, %v483_v60 }
  0xfe   : > { %v740_v7 = vmul.f32 %v1344_v24, %v545_v46  ;;  %v548_v1 = vadd.f32 %v1319_v12, %v547_v61  ;;  %v758_v2 = vadd.f32 %v726_v53, %v1229_v22  ;;  %v727_v4 = vmul.f32 %v1344_v24, %v492_v58 }
  0xff   : > { %v774_v3 = vadd.f32 %v742_v56, %v1232_v23  ;;  %v743_v5 = vmul.f32 %v1344_v24, %v556_v59  ;;  %v756_v6 = vadd.f32 %v724_v63, %v1237_v26  ;;  %v725_v11 = vmul.f32 %v1344_v24, %v484_v0 }
 0x100   : > { %v772_v10 = vadd.f32 %v740_v7, %v1240_v27  ;;  %v741_v22 = vmul.f32 %v1344_v24, %v548_v1  ;;  %v797_v23 = vadd.f32 %v1381_v62, %v758_v2  ;;  %v759_v16 = vadd.f32 %v727_v4, %v1248_v33 }
 0x101   : > { %v813_v15 = vadd.f32 %v1381_v62, %v774_v3  ;;  %v775_v21 = vadd.f32 %v743_v5, %v1251_v34  ;;  %v795_v25 = vadd.f32 %v1381_v62, %v756_v6  ;;  %v757_v27 = vadd.f32 %v725_v11, %v1254_v35  ;;  %v1001_v32 = vpop.f32.mrb[4].mxu0 }
 0x102   : > { %v811_v26 = vadd.f32 %v1381_v62, %v772_v10  ;;  %v773_v31 = vadd.f32 %v741_v22, %v1257_v36  ;;  %v1017_v37 = vpop.f32.mrb[4].mxu1  ;;  %829 = vst [vmem:[%s1395_s22 + $0x10] sm:$0xff] %v797_v23  ;;  %v798_v33 = vadd.f32 %v1381_v62, %v759_v16  ;;  %v505_v34 = vadd.f32 %v1001_v32, %v1319_v12  ;;  %v496_v46 = vpop.f32.mrb[5].mxu0 }
 0x103   : > { %845 = vst [vmem:[%s1395_s22 + $0x90] sm:$0xff] %v813_v15  ;;  %v814_v38 = vadd.f32 %v1381_v62, %v775_v21  ;;  %v569_v45 = vadd.f32 %v1017_v37, %v1319_v12  ;;  %v560_v49 = vpop.f32.mrb[5].mxu1  ;;  %827 = vst [vmem:[%s1395_s22] sm:$0xff] %v795_v25  ;;  %v796_v35 = vadd.f32 %v1381_v62, %v757_v27  ;;  %v1002_v56 = vpop.f32.mrb[6].mxu0 }
 0x104   : > { %843 = vst [vmem:[%s1395_s22 + $0x80] sm:$0xff] %v811_v26  ;;  %v812_v36 = vadd.f32 %v1381_v62, %v773_v31  ;;  %v497_v50 = vadd.f32 %v1319_v12, %v496_v46  ;;  %v561_v53 = vadd.f32 %v1319_v12, %v560_v49  ;;  %v1018_v58 = vpop.f32.mrb[6].mxu1  ;;  %830 = vst [vmem:[%s1395_s22 + $0x18] sm:$0xff] %v798_v33  ;;  %v499_v7 = vpop.f32.mrb[7].mxu0 }
 0x105   : > { %846 = vst [vmem:[%s1395_s22 + $0x98] sm:$0xff] %v814_v38  ;;  %v730_v59 = vmul.f32 %v1344_v24, %v505_v34  ;;  %v746_v60 = vmul.f32 %v1344_v24, %v569_v45  ;;  %v508_v61 = vadd.f32 %v1002_v56, %v1319_v12  ;;  %v572_v63 = vadd.f32 %v1018_v58, %v1319_v12  ;;  %v563_v0 = vpop.f32.mrb[7].mxu1 }
 0x106   : > { %828 = vst [vmem:[%s1395_s22 + $0x8] sm:$0xff] %v796_v35  ;;  %844 = vst [vmem:[%s1395_s22 + $0x88] sm:$0xff] %v812_v36  ;;  %v728_v1 = vmul.f32 %v1344_v24, %v497_v50  ;;  %v744_v2 = vmul.f32 %v1344_v24, %v561_v53  ;;  %v500_v3 = vadd.f32 %v1319_v12, %v499_v7 }
 0x107   : > { %v564_v4 = vadd.f32 %v1319_v12, %v563_v0  ;;  %v762_v5 = vadd.f32 %v730_v59, %v1263_v40  ;;  %v778_v6 = vadd.f32 %v746_v60, %v1266_v41  ;;  %v731_v10 = vmul.f32 %v1344_v24, %v508_v61 }
 0x108   : > { %v747_v11 = vmul.f32 %v1344_v24, %v572_v63  ;;  %v760_v22 = vadd.f32 %v728_v1, %v1269_v42  ;;  %v776_v23 = vadd.f32 %v744_v2, %v1272_v43  ;;  %v729_v15 = vmul.f32 %v1344_v24, %v500_v3 }
 0x109   : > { %v745_v16 = vmul.f32 %v1344_v24, %v564_v4  ;;  %v801_v21 = vadd.f32 %v1381_v62, %v762_v5  ;;  %v817_v40 = vadd.f32 %v1381_v62, %v778_v6  ;;  %v763_v41 = vadd.f32 %v731_v10, %v1278_v47  ;;  %v1005_v31 = vpop.f32.mrb[8].mxu0 }
 0x10a   : > { %v779_v25 = vadd.f32 %v747_v11, %v1281_v48  ;;  %v799_v26 = vadd.f32 %v1381_v62, %v760_v22  ;;  %v815_v42 = vadd.f32 %v1381_v62, %v776_v23  ;;  %v761_v43 = vadd.f32 %v729_v15, %v1289_v54  ;;  %v1021_v32 = vpop.f32.mrb[8].mxu1  ;;  %v512_v38 = vpop.f32.mrb[9].mxu0 }
 0x10b   : > { %v777_v27 = vadd.f32 %v745_v16, %v1292_v55  ;;  %833 = vst [vmem:[%s1395_s22 + $0x30] sm:$0xff] %v801_v21  ;;  %849 = vst [vmem:[%s1395_s22 + $0xb0] sm:$0xff] %v817_v40  ;;  %v802_v47 = vadd.f32 %v1381_v62, %v763_v41  ;;  %v521_v48 = vadd.f32 %v1005_v31, %v1319_v12  ;;  %v576_v34 = vpop.f32.mrb[9].mxu1  ;;  %v1006_v49 = vpop.f32.mrb[10].mxu0 }
 0x10c   : > { %v818_v37 = vadd.f32 %v1381_v62, %v779_v25  ;;  %v585_v33 = vadd.f32 %v1021_v32, %v1319_v12  ;;  %831 = vst [vmem:[%s1395_s22 + $0x20] sm:$0xff] %v799_v26  ;;  %847 = vst [vmem:[%s1395_s22 + $0xa0] sm:$0xff] %v815_v42  ;;  %v800_v54 = vadd.f32 %v1381_v62, %v761_v43  ;;  %v1022_v35 = vpop.f32.mrb[10].mxu1  ;;  %v515_v58 = vpop.f32.mrb[11].mxu0 }
 0x10d   : > { %v816_v55 = vadd.f32 %v1381_v62, %v777_v27  ;;  %v513_v45 = vadd.f32 %v1319_v12, %v512_v38  ;;  %v577_v46 = vadd.f32 %v1319_v12, %v576_v34  ;;  %834 = vst [vmem:[%s1395_s22 + $0x38] sm:$0xff] %v802_v47  ;;  %v734_v36 = vmul.f32 %v1344_v24, %v521_v48  ;;  %v579_v59 = vpop.f32.mrb[11].mxu1 }
 0x10e   : > { %850 = vst [vmem:[%s1395_s22 + $0xb8] sm:$0xff] %v818_v37  ;;  %v750_v50 = vmul.f32 %v1344_v24, %v585_v33  ;;  %v524_v53 = vadd.f32 %v1006_v49, %v1319_v12  ;;  %v588_v56 = vadd.f32 %v1022_v35, %v1319_v12  ;;  %832 = vst [vmem:[%s1395_s22 + $0x28] sm:$0xff] %v800_v54 }
 0x10f   : > { %848 = vst [vmem:[%s1395_s22 + $0xa8] sm:$0xff] %v816_v55  ;;  %v732_v60 = vmul.f32 %v1344_v24, %v513_v45  ;;  %v748_v61 = vmul.f32 %v1344_v24, %v577_v46  ;;  %v516_v63 = vadd.f32 %v1319_v12, %v515_v58  ;;  %v580_v7 = vadd.f32 %v1319_v12, %v579_v59 }
 0x110   : > { %v766_v0 = vadd.f32 %v734_v36, %v1309_v8  ;;  %v782_v1 = vadd.f32 %v750_v50, %v1312_v9  ;;  %v735_v2 = vmul.f32 %v1344_v24, %v524_v53  ;;  %v751_v3 = vmul.f32 %v1344_v24, %v588_v56 }
 0x111   : > { %v764_v4 = vadd.f32 %v732_v60, %v1322_v13  ;;  %v780_v5 = vadd.f32 %v748_v61, %v1325_v14  ;;  %v733_v6 = vmul.f32 %v1344_v24, %v516_v63  ;;  %v749_v10 = vmul.f32 %v1344_v24, %v580_v7  ;;  %v1009_v16 = vpop.f32.mrb[12].mxu0 }
 0x112   : > { %v805_v11 = vadd.f32 %v1381_v62, %v766_v0  ;;  %v821_v8 = vadd.f32 %v1381_v62, %v782_v1  ;;  %v767_v9 = vadd.f32 %v735_v2, %v1330_v17  ;;  %v783_v22 = vadd.f32 %v751_v3, %v1333_v18  ;;  %v1025_v21 = vpop.f32.mrb[12].mxu1  ;;  %v528_v25 = vpop.f32.mrb[13].mxu0 }
 0x113   : > { %v803_v23 = vadd.f32 %v1381_v62, %v764_v4  ;;  %v819_v13 = vadd.f32 %v1381_v62, %v780_v5  ;;  %v765_v14 = vadd.f32 %v733_v6, %v1336_v19  ;;  %v781_v15 = vadd.f32 %v749_v10, %v1339_v20  ;;  %v592_v26 = vpop.f32.mrb[13].mxu1  ;;  %v1010_v27 = vpop.f32.mrb[14].mxu0 }
 0x114   : > { %837 = vst [vmem:[%s1395_s22 + $0x50] sm:$0xff] %v805_v11  ;;  %853 = vst [vmem:[%s1395_s22 + $0xd0] sm:$0xff] %v821_v8  ;;  %v806_v17 = vadd.f32 %v1381_v62, %v767_v9  ;;  %v822_v40 = vadd.f32 %v1381_v62, %v783_v22  ;;  %v537_v18 = vadd.f32 %v1009_v16, %v1319_v12  ;;  %v1026_v31 = vpop.f32.mrb[14].mxu1  ;;  %v531_v33 = vpop.f32.mrb[15].mxu0 }
 0x115   : > { %v601_v41 = vadd.f32 %v1025_v21, %v1319_v12  ;;  %835 = vst [vmem:[%s1395_s22 + $0x40] sm:$0xff] %v803_v23  ;;  %851 = vst [vmem:[%s1395_s22 + $0xc0] sm:$0xff] %v819_v13  ;;  %v804_v19 = vadd.f32 %v1381_v62, %v765_v14  ;;  %v820_v20 = vadd.f32 %v1381_v62, %v781_v15  ;;  %v595_v38 = vpop.f32.mrb[15].mxu1 }
 0x116   : > { %v529_v42 = vadd.f32 %v1319_v12, %v528_v25  ;;  %v593_v43 = vadd.f32 %v1319_v12, %v592_v26  ;;  %838 = vst [vmem:[%s1395_s22 + $0x58] sm:$0xff] %v806_v17  ;;  %854 = vst [vmem:[%s1395_s22 + $0xd8] sm:$0xff] %v822_v40  ;;  %v738_v32 = vmul.f32 %v1344_v24, %v537_v18 }
 0x117   : > { %v754_v47 = vmul.f32 %v1344_v24, %v601_v41  ;;  %v540_v37 = vadd.f32 %v1010_v27, %v1319_v12  ;;  %v604_v48 = vadd.f32 %v1026_v31, %v1319_v12  ;;  %836 = vst [vmem:[%s1395_s22 + $0x48] sm:$0xff] %v804_v19  ;;  %852 = vst [vmem:[%s1395_s22 + $0xc8] sm:$0xff] %v820_v20 }
 0x118   : > { %v736_v34 = vmul.f32 %v1344_v24, %v529_v42  ;;  %v752_v54 = vmul.f32 %v1344_v24, %v593_v43  ;;  %v532_v55 = vadd.f32 %v1319_v12, %v531_v33  ;;  %v596_v45 = vadd.f32 %v1319_v12, %v595_v38 }
 0x119   : > { %v770_v46 = vadd.f32 %v738_v32, %v1347_v57  ;;  %v786_v49 = vadd.f32 %v754_v47, %v1350_v28  ;;  %v739_v35 = vmul.f32 %v1344_v24, %v540_v37  ;;  %v755_v36 = vmul.f32 %v1344_v24, %v604_v48 }
 0x11a   : > { %v768_v50 = vadd.f32 %v736_v34, %v1353_v29  ;;  %v784_v53 = vadd.f32 %v752_v54, %v1356_v30  ;;  %v737_v56 = vmul.f32 %v1344_v24, %v532_v55  ;;  %v753_v12 = vmul.f32 %v1344_v24, %v596_v45 }
 0x11b   : > { %v809_v57 = vadd.f32 %v1381_v62, %v770_v46  ;;  %v825_v28 = vadd.f32 %v1381_v62, %v786_v49  ;;  %v771_v58 = vadd.f32 %v739_v35, %v1361_v39  ;;  %v787_v59 = vadd.f32 %v755_v36, %v1364_v44 }
 0x11c   : > { %v807_v29 = vadd.f32 %v1381_v62, %v768_v50  ;;  %v823_v30 = vadd.f32 %v1381_v62, %v784_v53  ;;  %v769_v60 = vadd.f32 %v737_v56, %v1369_v51  ;;  %v785_v24 = vadd.f32 %v753_v12, %v1372_v52 }
 0x11d   : > { %841 = vst [vmem:[%s1395_s22 + $0x70] sm:$0xff] %v809_v57  ;;  %857 = vst [vmem:[%s1395_s22 + $0xf0] sm:$0xff] %v825_v28  ;;  %v810_v61 = vadd.f32 %v1381_v62, %v771_v58  ;;  %v826_v63 = vadd.f32 %v1381_v62, %v787_v59 }
 0x11e   : > { %839 = vst [vmem:[%s1395_s22 + $0x60] sm:$0xff] %v807_v29  ;;  %855 = vst [vmem:[%s1395_s22 + $0xe0] sm:$0xff] %v823_v30  ;;  %v808_v39 = vadd.f32 %v1381_v62, %v769_v60  ;;  %v824_v44 = vadd.f32 %v1381_v62, %v785_v24 }
 0x11f   : > { %842 = vst [vmem:[%s1395_s22 + $0x78] sm:$0xff] %v810_v61  ;;  %858 = vst [vmem:[%s1395_s22 + $0xf8] sm:$0xff] %v826_v63 }
 0x120   : > { %840 = vst [vmem:[%s1395_s22 + $0x68] sm:$0xff] %v808_v39  ;;  %856 = vst [vmem:[%s1395_s22 + $0xe8] sm:$0xff] %v824_v44 }
 0x121 PF: > { %s18_s27 = sadd.s32 1, %s1065_s27  }
 0x122   : > { %p15_p4 = scmp.ge.s32.totalorder %s18_s27, 4  }
 0x124   :  { %17 = sbr.rel (!%p15_p4) target bundleno = 1 (0x1), region = 85 }

// kernel: resblk_forward.4
= control target key start
LH: loop header
LB: loop body
LE: loop exit
PB: predicated region body
PF: predicated region fallthrough
CT: control target
= control target key end

     0   :  { %s4836_s24 = smov 0   ;;  %s5640_s0 = inlined_call_operand.vmem [shape: bf16[2,256,128], index: 0, kind: input, shape index: {}]   ;;  %s5641_s1 = inlined_call_operand.vmem [shape: f32[1,128], index: 1, kind: input, shape index: {}]   ;;  %s5642_s2 = inlined_call_operand.vmem [shape: f32[1,128], index: 2, kind: input, shape index: {}]   ;;  %s5643_s3 = inlined_call_operand.vmem [shape: bf16[9,128,128], index: 3, kind: input, shape index: {}]   ;;  %s5644_s4 = inlined_call_operand.vmem [shape: f32[1,128], index: 4, kind: input, shape index: {}]   ;;  %s5645_s5 = inlined_call_operand.vmem [shape: f32[2,256,128], index: 5, kind: output, shape index: {0}]   ;;  %s5646_s6 = inlined_call_operand.vmem [shape: f32[1,128], index: 6, kind: output, shape index: {1}]   ;;  %s5647_s7 = inlined_call_operand.vmem [shape: f32[1,128], index: 7, kind: output, shape index: {2}]  }
   0x1 LB: > { %s3482_s25 = sadd.s32 4294967295, %s4793_s24   ;;  %p3486_p0 = scmp.ge.s32.totalorder %s4793_s24, 1  ;;  %s4793_s24 = sphi %s4836_s24, %s18_s24  }
   0x2   : > { %p232_p1 = scmp.lt.s32.totalorder %s4793_s24, 3 }
   0x4   : > { %p233_p2 = pnand %p3486_p0, %p232_p1 }
   0x5   : > { %p264_p3 = scmp.lt.s32.totalorder (!%p233_p2), %s3482_s25, 1  ;;  %p3491_p4 = scmp.ne.s32.totalorder (!%p233_p2), %s3482_s25, 0 }
   0x6   : > { %236 = sbr.rel (%p233_p2) target bundleno = 599 (0x257), region = 40 }
   0xd   : > { %s265_s26 = scalar_select %p264_p3, %s3482_s25, 1 }
   0xe   : > { %278 = sbr.rel (%p3491_p4) target bundleno = 43 (0x2b), region = 44  ;;  %v4795_v0 = vmov (!%p3491_p4), 0.0  }
   0xf   : > { %s3697_s27 = sshll.u32 %s265_s26, 7  ;;  %s3698_s28 = sshll.u32 %s265_s26, 8  ;;  %279 = vst [vmem:[#allocation2] sm:$0xff] (!%p3491_p4), %v4795_v0  ;;  %280 = vst [vmem:[#allocation2 + $0x8] sm:$0xff] (!%p3491_p4), %v4795_v0 }
  0x10   : > { %s4847_s8 = scalar_lea.vmem %s5640_s0, %s3697_s27  ;;  %s4852_s11 = scalar_lea.vmem %s5645_s5, %s3698_s28  ;;  %281 = vst [vmem:[#allocation2 + $0x10] sm:$0x3] (!%p3491_p4), %v4795_v0  ;;  %282 = vst [vmem:[#allocation2 + $0x18] sm:$0xff] (!%p3491_p4), %v4795_v0 }
  0x11   : > { %283 = vst [vmem:[#allocation2 + $0x20] sm:$0xff] (!%p3491_p4), %v4795_v0  ;;  %284 = vst [vmem:[#allocation2 + $0x28] sm:$0x3] (!%p3491_p4), %v4795_v0 }
  0x12   : > { %285 = vst [vmem:[#allocation2 + $0x30] sm:$0xff] (!%p3491_p4), %v4795_v0  ;;  %286 = vst [vmem:[#allocation2 + $0x38] sm:$0xff] (!%p3491_p4), %v4795_v0 }
  0x13   : > { %287 = vst [vmem:[#allocation2 + $0x40] sm:$0x3] (!%p3491_p4), %v4795_v0  ;;  %288 = vst [vmem:[#allocation2 + $0x48] sm:$0xff] (!%p3491_p4), %v4795_v0 }
  0x14   : > { %289 = vst [vmem:[#allocation2 + $0x50] sm:$0xff] (!%p3491_p4), %v4795_v0  ;;  %290 = vst [vmem:[#allocation2 + $0x58] sm:$0x3] (!%p3491_p4), %v4795_v0 }
  0x15   : > { %291 = vst [vmem:[#allocation2 + $0x60] sm:$0xff] %v4795_v0  ;;  %292 = vst [vmem:[#allocation2 + $0x68] sm:$0xff] %v4795_v0 }
  0x16   : > { %293 = vst [vmem:[#allocation2 + $0x70] sm:$0x3] %v4795_v0  ;;  %294 = vst [vmem:[#allocation2 + $0x78] sm:$0xff] %v4795_v0 }
  0x17   : > { %295 = vst [vmem:[#allocation2 + $0x80] sm:$0xff] %v4795_v0  ;;  %296 = vst [vmem:[#allocation2 + $0x88] sm:$0x3] %v4795_v0 }
  0x18   : > { %297 = vst [vmem:[#allocation2 + $0x90] sm:$0xff] %v4795_v0  ;;  %298 = vst [vmem:[#allocation2 + $0x98] sm:$0xff] %v4795_v0 }
  0x19   : > { %299 = vst [vmem:[#allocation2 + $0xa0] sm:$0x3] %v4795_v0  ;;  %300 = vst [vmem:[#allocation2 + $0xa8] sm:$0xff] %v4795_v0 }
  0x1a   : > { %301 = vst [vmem:[#allocation2 + $0xb0] sm:$0xff] %v4795_v0  ;;  %302 = vst [vmem:[#allocation2 + $0xb8] sm:$0x3] %v4795_v0 }
  0x1b   : > { %303 = vst [vmem:[#allocation2 + $0xc0] sm:$0xff] %v4795_v0  ;;  %304 = vst [vmem:[#allocation2 + $0xc8] sm:$0xff] %v4795_v0 }
  0x1c   : > { %305 = vst [vmem:[#allocation2 + $0xd0] sm:$0x3] %v4795_v0  ;;  %306 = vst [vmem:[#allocation2 + $0xd8] sm:$0xff] %v4795_v0 }
  0x1d   : > { %307 = vst [vmem:[#allocation2 + $0xe0] sm:$0xff] %v4795_v0  ;;  %308 = vst [vmem:[#allocation2 + $0xe8] sm:$0x3] %v4795_v0 }
  0x1e   : > { %309 = vst [vmem:[#allocation2 + $0xf0] sm:$0xff] %v4795_v0  ;;  %310 = vst [vmem:[#allocation2 + $0xf8] sm:$0xff] %v4795_v0 }
  0x1f   : > { %311 = vst [vmem:[#allocation2 + $0x100] sm:$0x3] %v4795_v0  ;;  %312 = vst [vmem:[#allocation2 + $0x108] sm:$0xff] %v4795_v0 }
  0x20   : > { %313 = vst [vmem:[#allocation2 + $0x110] sm:$0xff] %v4795_v0  ;;  %314 = vst [vmem:[#allocation2 + $0x118] sm:$0x3] %v4795_v0 }
  0x21   : > { %315 = vst [vmem:[#allocation2 + $0x120] sm:$0xff] %v4795_v0  ;;  %316 = vst [vmem:[#allocation2 + $0x128] sm:$0xff] %v4795_v0 }
  0x22   : > { %317 = vst [vmem:[#allocation2 + $0x130] sm:$0x3] %v4795_v0  ;;  %318 = vst [vmem:[#allocation2 + $0x138] sm:$0xff] %v4795_v0 }
  0x23   : > { %319 = vst [vmem:[#allocation2 + $0x140] sm:$0xff] %v4795_v0  ;;  %320 = vst [vmem:[#allocation2 + $0x148] sm:$0x3] %v4795_v0 }
  0x24   : > { %321 = vst [vmem:[#allocation2 + $0x150] sm:$0xff] %v4795_v0  ;;  %322 = vst [vmem:[#allocation2 + $0x158] sm:$0xff] %v4795_v0 }
  0x25   : > { %323 = vst [vmem:[#allocation2 + $0x160] sm:$0x3] %v4795_v0  ;;  %324 = vst [vmem:[#allocation2 + $0x168] sm:$0xff] %v4795_v0 }
  0x26   : > { %325 = vst [vmem:[#allocation2 + $0x170] sm:$0xff] %v4795_v0  ;;  %326 = vst [vmem:[#allocation2 + $0x178] sm:$0x3] %v4795_v0 }
  0x27   : > { %327 = vst [vmem:[#allocation2 + $0x180] sm:$0xff] %v4795_v0  ;;  %328 = vst [vmem:[#allocation2 + $0x188] sm:$0xff] %v4795_v0 }
  0x28   : > { %329 = vst [vmem:[#allocation2 + $0x190] sm:$0x3] %v4795_v0  ;;  %330 = vst [vmem:[#allocation2 + $0x198] sm:$0xff] %v4795_v0 }
  0x29   : > { %331 = vst [vmem:[#allocation2 + $0x1a0] sm:$0xff] %v4795_v0  ;;  %332 = vst [vmem:[#allocation2 + $0x1a8] sm:$0x3] %v4795_v0 }
  0x2a   : > { %333 = vst [vmem:[%s5646_s6] sm:$0x1] %v4795_v0  ;;  %334 = vst [vmem:[%s5647_s7] sm:$0x1] %v4795_v0 }
  0x2b PF: > { %v4707_v1 = vld [vmem:[%s5643_s3 + $0x40] sm:$0xff]   ;;  %v4709_v3 = vld [vmem:[%s5643_s3 + $0x48] sm:$0xff]   ;;  %v4711_v5 = vld [vmem:[%s5643_s3 + $0x50] sm:$0xff]  }
  0x2c   : > { %v4708_v2 = vld [vmem:[%s5643_s3 + $0x100] sm:$0xff]   ;;  %3994 = vmatprep.subr.bf16.mxu1 %v4707_v1  ;;  %v4710_v4 = vld [vmem:[%s5643_s3 + $0x108] sm:$0xff]   ;;  %v4712_v6 = vld [vmem:[%s5643_s3 + $0x110] sm:$0xff]  }
  0x2d   : > { %4186 = vmatprep.subr.bf16.mxu0 %v4708_v2  ;;  %3995 = vmatpush3.bf16.msra.mxu1 %v4707_v1  ;;  %v4713_v7 = vld [vmem:[%s5643_s3 + $0x58] sm:$0xff]   ;;  %v4715_v9 = vld [vmem:[%s5643_s3 + $0x60] sm:$0xff]   ;;  %v4717_v11 = vld [vmem:[%s5643_s3 + $0x68] sm:$0xff]  }
  0x2e   : > { %4187 = vmatpush3.bf16.msra.mxu0 %v4708_v2  ;;  %3996 = vmatprep.subr.bf16.mxu1 %v4709_v3  ;;  %v4714_v8 = vld [vmem:[%s5643_s3 + $0x118] sm:$0xff]   ;;  %v4716_v10 = vld [vmem:[%s5643_s3 + $0x120] sm:$0xff]   ;;  %v607_v13 = vld [vmem:[#allocation2 + $0x9] sm:$0xff] }
  0x2f   : > { %4188 = vmatprep.subr.bf16.mxu0 %v4710_v4  ;;  %v606_v12 = vld [vmem:[#allocation2 + $0x1] sm:$0xff]  ;;  %v4900_v19 = vld [vmem:[%s5641_s1] ss:$0 sm:$0xff]  ;;  %v4719_v22 = vld [vmem:[%s5643_s3 + $0x70] sm:$0xff]  }
  0x30   : > { %v3700_v14 = vld [vmem:[%s4847_s8] sm:$0xff]   ;;  %v4718_v15 = vld [vmem:[%s5643_s3 + $0x128] sm:$0xff]   ;;  %v638_v16 = vpack.c.bf16 %v607_v13, %v606_v12  ;;  %v4720_v27 = vld [vmem:[%s5643_s3 + $0x130] sm:$0xff]  }
  0x31   : > { %3997 = vmatpush3.bf16.msra.mxu1 %v4709_v3  ;;  %v3701_v17 = vunpack.c.l.bf16 %v3700_v14  ;;  %v3702_v18 = vunpack.c.h.bf16 %v3700_v14  ;;  %v4905_v20 = vld [vmem:[%s5642_s2] ss:$0 sm:$0xff]  ;;  %v3763_v21 = vld [vmem:[%s4847_s8 + $0x8] sm:$0xff]   ;;  %v3764_v32 = vld [vmem:[%s4847_s8 + $0x10] sm:$0xff]  }
  0x32   : > { %4189 = vmatpush3.bf16.msra.mxu0 %v4710_v4  ;;  %3998 = vmatprep.subr.bf16.mxu1 %v4711_v5  ;;  %v3705_v25 = vunpack.c.l.bf16 %v3763_v21  ;;  %v3706_v26 = vunpack.c.h.bf16 %v3763_v21  ;;  %v3709_v33 = vunpack.c.l.bf16 %v3764_v32  ;;  %v3710_v34 = vunpack.c.h.bf16 %v3764_v32  ;;  %v3765_v35 = vld [vmem:[%s4847_s8 + $0x18] sm:$0xff]   ;;  %v3766_v46 = vld [vmem:[%s4847_s8 + $0x20] sm:$0xff]   ;;  %v3767_v55 = vld [vmem:[%s4847_s8 + $0x28] sm:$0xff]  }
  0x33   : > { %4190 = vmatprep.subr.bf16.mxu0 %v4712_v6  ;;  %4010 = vmatprep.mubr.bf16.mxu1 %v638_v16  ;;  %v406_v23 = vmul.f32 %v3701_v17, %v4900_v19  ;;  %v407_v24 = vmul.f32 %v3702_v18, %v4900_v19  ;;  %v4721_v36 = vld [vmem:[%s5643_s3 + $0x78] sm:$0xff]   ;;  %v3713_v44 = vunpack.c.l.bf16 %v3765_v35  ;;  %v3714_v45 = vunpack.c.h.bf16 %v3765_v35  ;;  %v4723_v59 = vld [vmem:[%s5643_s3] sm:$0xff]   ;;  %v3768_v0 = vld [vmem:[%s4847_s8 + $0x30] sm:$0xff]  }
  0x34   : > { %v408_v30 = vmul.f32 %v3705_v25, %v4900_v19  ;;  %v409_v31 = vmul.f32 %v3706_v26, %v4900_v19  ;;  %v4722_v37 = vld [vmem:[%s5643_s3 + $0x138] sm:$0xff]   ;;  %v410_v42 = vmul.f32 %v3709_v33, %v4900_v19  ;;  %v411_v43 = vmul.f32 %v3710_v34, %v4900_v19  ;;  %v4724_v1 = vld [vmem:[%s5643_s3 + $0x140] sm:$0xff]   ;;  %v4725_v21 = vld [vmem:[%s5643_s3 + $0x148] sm:$0xff]  }
  0x35   : > { %3999 = vmatpush3.bf16.msra.mxu1 %v4711_v5  ;;  %v445_v28 = vadd.f32 %v4905_v20, %v406_v23  ;;  %v446_v29 = vadd.f32 %v4905_v20, %v407_v24  ;;  %v3717_v50 = vunpack.c.l.bf16 %v3766_v46  ;;  %v412_v53 = vmul.f32 %v3713_v44, %v4900_v19  ;;  %v3770_v26 = vld [vmem:[%s4847_s8 + $0x40] sm:$0xff]   ;;  %v4729_v34 = vld [vmem:[%s5643_s3 + $0x10] sm:$0xff]  }
  0x36   : > { %4191 = vmatpush3.bf16.msra.mxu0 %v4712_v6  ;;  %4000 = vmatprep.subr.bf16.mxu1 %v4713_v7  ;;  %v447_v40 = vadd.f32 %v4905_v20, %v408_v30  ;;  %v448_v41 = vadd.f32 %v4905_v20, %v409_v31  ;;  %v449_v51 = vadd.f32 %v4905_v20, %v410_v42  ;;  %v3718_v56 = vunpack.c.h.bf16 %v3766_v46  ;;  %v3772_v44 = vld [vmem:[%s4847_s8 + $0x50] sm:$0xff]  }
  0x37   : > { %4192 = vmatprep.subr.bf16.mxu0 %v4714_v8  ;;  %v477_v38 = vmax.f32 %v445_v28, 0.0  ;;  %v478_v39 = vmax.f32 %v446_v29, 0.0  ;;  %v450_v52 = vadd.f32 %v4905_v20, %v411_v43  ;;  %v413_v54 = vmul.f32 %v3714_v45, %v4900_v19 }
  0x38   : > { %v479_v48 = vmax.f32 %v447_v40, 0.0  ;;  %v480_v49 = vmax.f32 %v448_v41, 0.0  ;;  %v414_v57 = vmul.f32 %v3717_v50, %v4900_v19  ;;  %v3721_v58 = vunpack.c.l.bf16 %v3767_v55  ;;  %v4727_v40 = vld [vmem:[%s5643_s3 + $0x150] sm:$0xff]  }
  0x39   : > { %4001 = vmatpush3.bf16.msra.mxu1 %v4713_v7  ;;  %510 = vst [vmem:[#allocation2 + $0x19] sm:$0xff] %v477_v38  ;;  %511 = vst [vmem:[#allocation2 + $0x21] sm:$0xff] %v478_v39  ;;  %v1733_v47 = vpack.c.bf16 %v478_v39, %v477_v38  ;;  %v481_v60 = vmax.f32 %v449_v51, 0.0  ;;  %v482_v61 = vmax.f32 %v450_v52, 0.0  ;;  %v4943_v62 = vadd.f32 %v4905_v20, %v412_v53  ;;  %v3771_v39 = vld [vmem:[%s4847_s8 + $0x48] sm:$0xff]   ;;  %v4728_v53 = vld [vmem:[%s5643_s3 + $0x158] sm:$0xff]  }
  0x3a   : > { %4193 = vmatpush3.bf16.msra.mxu0 %v4714_v8  ;;  %4002 = vmatprep.subr.bf16.mxu1 %v4715_v9  ;;  %512 = vst [vmem:[#allocation2 + $0x31] sm:$0xff] %v479_v48  ;;  %513 = vst [vmem:[#allocation2 + $0x39] sm:$0xff] %v480_v49  ;;  %v4946_v63 = vadd.f32 %v4905_v20, %v413_v54  ;;  %v415_v2 = vmul.f32 %v3718_v56, %v4900_v19  ;;  %v3722_v4 = vunpack.c.h.bf16 %v3767_v55 }
  0x3b   : > { %4194 = vmatprep.subr.bf16.mxu0 %v4716_v10  ;;  %4202 = vmatprep.mubr.bf16.mxu0 %v1733_v47  ;;  %v4954_v3 = vadd.f32 %v4905_v20, %v414_v57  ;;  %v416_v5 = vmul.f32 %v3721_v58, %v4900_v19  ;;  %v1734_v6 = vpack.c.bf16 %v480_v49, %v479_v48  ;;  %v483_v7 = vmax.f32 %v4943_v62, 0.0  ;;  %v3773_v57 = vld [vmem:[%s4847_s8 + $0x58] sm:$0xff]  }
  0x3c   : > { %514 = vst [vmem:[#allocation2 + $0x49] sm:$0xff] %v481_v60  ;;  %515 = vst [vmem:[#allocation2 + $0x51] sm:$0xff] %v482_v61  ;;  %v484_v8 = vmax.f32 %v4946_v63, 0.0  ;;  %v417_v13 = vmul.f32 %v3722_v4, %v4900_v19  ;;  %v3726_v16 = vunpack.c.h.bf16 %v3768_v0  ;;  %v3733_v33 = vunpack.c.l.bf16 %v3770_v26  ;;  %v4732_v62 = vld [vmem:[%s5643_s3 + $0x18] sm:$0xff]  }
  0x3d   : > { %4003 = vmatpush3.bf16.msra.mxu1 %v4715_v9  ;;  %v3725_v9 = vunpack.c.l.bf16 %v3768_v0  ;;  %v485_v12 = vmax.f32 %v4954_v3, 0.0  ;;  %v4964_v14 = vadd.f32 %v4905_v20, %v416_v5  ;;  %516 = vst [vmem:[#allocation2 + $0x61] sm:$0xff] %v483_v7  ;;  %v3734_v38 = vunpack.c.h.bf16 %v3770_v26 }
  0x3e   : > { %4195 = vmatpush3.bf16.msra.mxu0 %v4716_v10  ;;  %4004 = vmatprep.subr.bf16.mxu1 %v4717_v11  ;;  %v3769_v10 = vld [vmem:[%s4847_s8 + $0x38] sm:$0xff]   ;;  %517 = vst [vmem:[#allocation2 + $0x69] sm:$0xff] %v484_v8  ;;  %v4973_v23 = vadd.f32 %v4905_v20, %v417_v13  ;;  %v419_v28 = vmul.f32 %v3726_v16, %v4900_v19  ;;  %v3737_v43 = vunpack.c.l.bf16 %v3771_v39  ;;  %v3738_v51 = vunpack.c.h.bf16 %v3771_v39  ;;  %v3775_v13 = vld [vmem:[%s4847_s8 + $0x68] sm:$0xff]  }
  0x3f   : > { %4196 = vmatprep.subr.bf16.mxu0 %v4718_v15  ;;  %v418_v17 = vmul.f32 %v3725_v9, %v4900_v19  ;;  %v3729_v18 = vunpack.c.l.bf16 %v3769_v10  ;;  %518 = vst [vmem:[#allocation2 + $0x79] sm:$0xff] %v485_v12  ;;  %v487_v24 = vmax.f32 %v4964_v14, 0.0  ;;  %v3730_v25 = vunpack.c.h.bf16 %v3769_v10 }
  0x40   : > { %v488_v31 = vmax.f32 %v4973_v23, 0.0  ;;  %v4993_v35 = vadd.f32 %v4905_v20, %v419_v28  ;;  %v422_v42 = vmul.f32 %v3733_v33, %v4900_v19  ;;  %v1736_v45 = vpack.c.bf16 %v484_v8, %v483_v7 }
  0x41   : > { %4005 = vmatpush3.bf16.msra.mxu1 %v4717_v11  ;;  %v454_v11 = vadd.f32 %v4905_v20, %v415_v2  ;;  %v4982_v29 = vadd.f32 %v4905_v20, %v418_v17  ;;  %v420_v30 = vmul.f32 %v3729_v18, %v4900_v19  ;;  %520 = vst [vmem:[#allocation2 + $0x91] sm:$0xff] %v487_v24  ;;  %v3741_v56 = vunpack.c.l.bf16 %v3772_v44 }
  0x42   : > { %4197 = vmatpush3.bf16.msra.mxu0 %v4718_v15  ;;  %4006 = vmatprep.subr.bf16.mxu1 %v4719_v22  ;;  %v4966_v15 = vpack.c.bf16 %v482_v61, %v481_v60  ;;  %v421_v32 = vmul.f32 %v3730_v25, %v4900_v19  ;;  %521 = vst [vmem:[#allocation2 + $0x99] sm:$0xff] %v488_v31  ;;  %v490_v46 = vmax.f32 %v4993_v35, 0.0  ;;  %v3774_v61 = vld [vmem:[%s4847_s8 + $0x60] sm:$0xff]   ;;  %v3742_v0 = vunpack.c.h.bf16 %v3772_v44 }
  0x43   : > { %4198 = vmatprep.subr.bf16.mxu0 %v4720_v27  ;;  %v423_v48 = vmul.f32 %v3734_v38, %v4900_v19  ;;  %v5018_v50 = vadd.f32 %v4905_v20, %v422_v42  ;;  %v424_v52 = vmul.f32 %v3737_v43, %v4900_v19  ;;  %v3745_v4 = vunpack.c.l.bf16 %v3773_v57  ;;  %v4733_v43 = vld [vmem:[%s5643_s3 + $0x170] sm:$0xff]   ;;  %v2007_v44 = vld [vmem:[#allocation2 + $0x1a] sm:$0xff] }
  0x44   : > { %v5007_v41 = vadd.f32 %v4905_v20, %v421_v32  ;;  %523 = vst [vmem:[#allocation2 + $0xb1] sm:$0xff] %v490_v46  ;;  %v3746_v5 = vunpack.c.h.bf16 %v3773_v57  ;;  %v427_v7 = vmul.f32 %v3742_v0, %v4900_v19  ;;  %v3749_v9 = vunpack.c.l.bf16 %v3774_v61 }
  0x45   : > { %4007 = vmatpush3.bf16.msra.mxu1 %v4719_v22  ;;  %v486_v22 = vmax.f32 %v454_v11, 0.0  ;;  %v5027_v55 = vadd.f32 %v4905_v20, %v423_v48  ;;  %v493_v58 = vmax.f32 %v5018_v50, 0.0  ;;  %v5035_v60 = vadd.f32 %v4905_v20, %v424_v52  ;;  %v2008_v48 = vld [vmem:[#allocation2 + $0x22] sm:$0xff] }
  0x46   : > { %4199 = vmatpush3.bf16.msra.mxu0 %v4720_v27  ;;  %4008 = vmatprep.subr.bf16.mxu1 %v4721_v36  ;;  %v4726_v27 = vld [vmem:[%s5643_s3 + $0x8] sm:$0xff]   ;;  %v492_v49 = vmax.f32 %v5007_v41, 0.0  ;;  %v428_v11 = vmul.f32 %v3745_v4, %v4900_v19  ;;  %v5069_v16 = vadd.f32 %v4905_v20, %v427_v7  ;;  %v3750_v18 = vunpack.c.h.bf16 %v3774_v61  ;;  %v2010_v4 = vld [vmem:[#allocation2 + $0x3a] sm:$0xff]  ;;  %v2012_v7 = vld [vmem:[#allocation2 + $0x52] sm:$0xff] }
  0x47   : > { %4200 = vmatprep.subr.bf16.mxu0 %v4722_v37  ;;  %519 = vst [vmem:[#allocation2 + $0x81] sm:$0xff] %v486_v22  ;;  %v1737_v54 = vpack.c.bf16 %v486_v22, %v485_v12  ;;  %v494_v63 = vmax.f32 %v5027_v55, 0.0  ;;  %526 = vst [vmem:[#allocation2 + $0xd9] sm:$0xff] %v493_v58  ;;  %v495_v3 = vmax.f32 %v5035_v60, 0.0  ;;  %v429_v12 = vmul.f32 %v3746_v5, %v4900_v19  ;;  %v4736_v5 = vld [vmem:[%s5643_s3 + $0x180] sm:$0xff]  }
  0x48   : > { %525 = vst [vmem:[#allocation2 + $0xc9] sm:$0xff] %v492_v49  ;;  %v1738_v22 = vpack.c.bf16 %v488_v31, %v487_v24  ;;  %v5082_v26 = vadd.f32 %v4905_v20, %v428_v11  ;;  %v498_v28 = vmax.f32 %v5069_v16, 0.0  ;;  %v431_v14 = vmul.f32 %v3750_v18, %v4900_v19  ;;  %v5175_v11 = vld [vmem:[%s5643_s3 + $0x80] sm:$0xff]  }
  0x49   : > { %4009 = vmatpush3.bf16.msra.mxu1 %v4721_v36  ;;  %v489_v36 = vmax.f32 %v4982_v29, 0.0  ;;  %527 = vst [vmem:[#allocation2 + $0xe1] sm:$0xff] %v494_v63  ;;  %528 = vst [vmem:[#allocation2 + $0xf1] sm:$0xff] %v495_v3  ;;  %v3753_v24 = vunpack.c.l.bf16 %v3775_v13  ;;  %v3776_v29 = vld [vmem:[%s4847_s8 + $0x70] sm:$0xff]   ;;  %v3754_v33 = vunpack.c.h.bf16 %v3775_v13  ;;  %v5146_v0 = vpack.c.bf16 %v2008_v48, %v2007_v44 }
  0x4a   : > { %4201 = vmatpush3.bf16.msra.mxu0 %v4722_v37  ;;  %4042 = vmatprep.subr.bf16.mxu1 %v4723_v59  ;;  %v4997_v37 = vadd.f32 %v4905_v20, %v420_v30  ;;  %v4731_v30 = vld [vmem:[%s5643_s3 + $0x168] sm:$0xff]   ;;  %v499_v31 = vmax.f32 %v5082_v26, 0.0  ;;  %531 = vst [vmem:[#allocation2 + $0x111] sm:$0xff] %v498_v28  ;;  %v5106_v35 = vadd.f32 %v4905_v20, %v431_v14  ;;  %v3758_v42 = vunpack.c.h.bf16 %v3776_v29  ;;  %v2017_v16 = vld [vmem:[#allocation2 + $0x92] sm:$0xff] }
  0x4b   : > { %4234 = vmatprep.subr.bf16.mxu0 %v4724_v1  ;;  %522 = vst [vmem:[#allocation2 + $0xa9] sm:$0xff] %v489_v36  ;;  %v1739_v25 = vpack.c.bf16 %v490_v46, %v489_v36  ;;  %v432_v38 = vmul.f32 %v3753_v24, %v4900_v19  ;;  %v433_v39 = vmul.f32 %v3754_v33, %v4900_v19  ;;  %v4748_v44 = vld [vmem:[%s5643_s3 + $0x1b0] sm:$0xff]  }
  0x4c   : > { %4011 = vmatmul.mubr.bf16.vlgmr.msra.gmra.mrb[0].mxu1 %v1733_v47  ;;  %v491_v47 = vmax.f32 %v4997_v37, 0.0  ;;  %532 = vst [vmem:[#allocation2 + $0x121] sm:$0xff] %v499_v31  ;;  %v4734_v37 = vld [vmem:[%s5643_s3 + $0x178] sm:$0xff]  }
  0x4d   : > { %4203 = vmatmul.mubr.bf16.vlgmr.msra.gmra.mrb[0].mxu0 %v1734_v6  ;;  %4043 = vmatpush3.bf16.msra.mxu1 %v4723_v59  ;;  %v425_v59 = vmul.f32 %v3738_v51, %v4900_v19  ;;  %v5122_v46 = vadd.f32 %v4905_v20, %v432_v38  ;;  %v5125_v51 = vadd.f32 %v4905_v20, %v433_v39  ;;  %v4746_v39 = vld [vmem:[%s5643_s3 + $0x1a8] sm:$0xff]  }
  0x4e   : > { %4235 = vmatpush3.bf16.msra.mxu0 %v4724_v1  ;;  %4014 = vmatprep.mubr.bf16.mxu1 %v1734_v6  ;;  %524 = vst [vmem:[#allocation2 + $0xc1] sm:$0xff] %v491_v47  ;;  %v426_v1 = vmul.f32 %v3741_v56, %v4900_v19  ;;  %v4730_v6 = vld [vmem:[%s5643_s3 + $0x160] sm:$0xff]   ;;  %v1740_v57 = vpack.c.bf16 %v492_v49, %v491_v47  ;;  %v4741_v49 = vld [vmem:[%s5643_s3 + $0x38] sm:$0xff]  }
  0x4f   : > { %4236 = vmatprep.subr.bf16.mxu0 %v4725_v21  ;;  %4206 = vmatprep.mubr.bf16.mxu0 %v4966_v15  ;;  %v5047_v2 = vadd.f32 %v4905_v20, %v425_v59  ;;  %v503_v56 = vmax.f32 %v5122_v46, 0.0  ;;  %v504_v59 = vmax.f32 %v5125_v51, 0.0 }
  0x50   : > { %4044 = vmatprep.subr.bf16.mxu1 %v4726_v27  ;;  %v5057_v8 = vadd.f32 %v4905_v20, %v426_v1  ;;  %v2009_v1 = vld [vmem:[#allocation2 + $0x32] sm:$0xff] }
  0x51   : > { %4045 = vmatpush3.bf16.msra.mxu1 %v4726_v27  ;;  %v496_v10 = vmax.f32 %v5047_v2, 0.0  ;;  %v5085_v27 = vadd.f32 %v4905_v20, %v429_v12  ;;  %536 = vst [vmem:[#allocation2 + $0x151] sm:$0xff] %v503_v56  ;;  %537 = vst [vmem:[#allocation2 + $0x159] sm:$0xff] %v504_v59  ;;  %v5177_v12 = vpack.c.bf16 %v2010_v4, %v2009_v1  ;;  %v2013_v2 = vld [vmem:[#allocation2 + $0x62] sm:$0xff] }
  0x52   : > { %4237 = vmatpush3.bf16.msra.mxu0 %v4725_v21  ;;  %4046 = vmatprep.subr.bf16.mxu1 %v4729_v34  ;;  %v497_v17 = vmax.f32 %v5057_v8, 0.0  ;;  %v430_v21 = vmul.f32 %v3749_v9, %v4900_v19  ;;  %v647_v9 = vpack.c.bf16 %v494_v63, %v493_v58  ;;  %v4738_v58 = vld [vmem:[%s5643_s3 + $0x188] sm:$0xff]   ;;  %v4742_v8 = vld [vmem:[%s5643_s3 + $0x198] sm:$0xff]  }
  0x53   : > { %4238 = vmatprep.subr.bf16.mxu0 %v4727_v40  ;;  %529 = vst [vmem:[#allocation2 + $0xf9] sm:$0xff] %v496_v10  ;;  %v500_v32 = vmax.f32 %v5085_v27, 0.0  ;;  %v648_v13 = vpack.c.bf16 %v496_v10, %v495_v3  ;;  %v2014_v3 = vld [vmem:[#allocation2 + $0x6a] sm:$0xff]  ;;  %v2015_v10 = vld [vmem:[#allocation2 + $0x7a] sm:$0xff]  ;;  %v2020_v27 = vld [vmem:[#allocation2 + $0xb2] sm:$0xff] }
  0x54   : > { %4015 = vmatmul.mubr.bf16.gmra.mrb[4].mxu1 %v4966_v15  ;;  %v4735_v15 = vld [vmem:[%s5643_s3 + $0x20] sm:$0xff]   ;;  %530 = vst [vmem:[#allocation2 + $0x109] sm:$0xff] %v497_v17  ;;  %v5092_v23 = vadd.f32 %v4905_v20, %v430_v21  ;;  %v649_v14 = vpack.c.bf16 %v498_v28, %v497_v17  ;;  %v2019_v26 = vld [vmem:[#allocation2 + $0xaa] sm:$0xff] }
  0x55   : > { %4207 = vmatmul.mubr.bf16.gmra.mrb[4].mxu0 %v1736_v45  ;;  %4018 = vmatprep.mubr.bf16.mxu1 %v1736_v45  ;;  %533 = vst [vmem:[#allocation2 + $0x129] sm:$0xff] %v500_v32  ;;  %v502_v45 = vmax.f32 %v5106_v35, 0.0  ;;  %v2018_v17 = vld [vmem:[#allocation2 + $0x9a] sm:$0xff]  ;;  %v5239_v38 = vpack.c.bf16 %v2020_v27, %v2019_v26 }
  0x56   : > { %4239 = vmatpush3.bf16.msra.mxu0 %v4727_v40  ;;  %4210 = vmatprep.mubr.bf16.mxu0 %v1737_v54  ;;  %v501_v36 = vmax.f32 %v5092_v23, 0.0  ;;  %v3757_v40 = vunpack.c.l.bf16 %v3776_v29  ;;  %v4744_v28 = vld [vmem:[%s5643_s3 + $0x1a0] sm:$0xff]  }
  0x57   : > { %4240 = vmatprep.subr.bf16.mxu0 %v4728_v53  ;;  %4047 = vmatpush3.bf16.msra.mxu1 %v4729_v34  ;;  %v4737_v34 = vld [vmem:[%s5643_s3 + $0x28] sm:$0xff]   ;;  %535 = vst [vmem:[#allocation2 + $0x141] sm:$0xff] %v502_v45  ;;  %v542_v35 = vld [vmem:[#allocation2] sm:$0xff] }
  0x58   : > { %4048 = vmatprep.subr.bf16.mxu1 %v4732_v62  ;;  %534 = vst [vmem:[#allocation2 + $0x139] sm:$0xff] %v501_v36  ;;  %v434_v52 = vmul.f32 %v3757_v40, %v4900_v19  ;;  %v2021_v23 = vld [vmem:[#allocation2 + $0xc2] sm:$0xff]  ;;  %v2022_v40 = vld [vmem:[#allocation2 + $0xca] sm:$0xff] }
  0x59   : > { %v5255_v46 = vpack.c.bf16 %v2022_v40, %v2021_v23  ;;  %v4751_v27 = vld [vmem:[%s5643_s3 + $0xa0] sm:$0xff]   ;;  %v4753_v23 = vld [vmem:[%s5643_s3 + $0xa8] sm:$0xff]  }
  0x5a   : > { %4241 = vmatpush3.bf16.msra.mxu0 %v4728_v53  ;;  %v435_v53 = vmul.f32 %v3758_v42, %v4900_v19  ;;  %v5141_v61 = vadd.f32 %v4905_v20, %v434_v52  ;;  %v2023_v42 = vld [vmem:[#allocation2 + $0xda] sm:$0xff]  ;;  %v556_v40 = vld [vmem:[#allocation2 + $0xa8] sm:$0xff] }
  0x5b   : > { %4242 = vmatprep.subr.bf16.mxu0 %v4730_v6  ;;  %4049 = vmatpush3.bf16.msra.mxu1 %v4732_v62  ;;  %v4750_v52 = vld [vmem:[%s5643_s3 + $0x1b8] sm:$0xff]  }
  0x5c   : > { %4019 = vmatmul.mubr.bf16.gmra.mrb[8].mxu1 %v1737_v54  ;;  %4050 = vmatprep.subr.bf16.mxu1 %v4735_v15  ;;  %v4739_v54 = vld [vmem:[%s5643_s3 + $0x30] sm:$0xff]   ;;  %v5144_v62 = vadd.f32 %v4905_v20, %v435_v53  ;;  %v505_v41 = vmax.f32 %v5141_v61, 0.0  ;;  %v544_v53 = vld [vmem:[#allocation2 + $0x18] sm:$0xff] }
  0x5d   : > { %4211 = vmatmul.mubr.bf16.gmra.mrb[8].mxu0 %v1738_v22  ;;  %4022 = vmatprep.mubr.bf16.mxu1 %v1738_v22  ;;  %v2026_v61 = vld [vmem:[#allocation2 + $0xfa] sm:$0xff] }
  0x5e   : > { %4243 = vmatpush3.bf16.msra.mxu0 %v4730_v6  ;;  %4214 = vmatprep.mubr.bf16.mxu0 %v1739_v25  ;;  %v506_v47 = vmax.f32 %v5144_v62, 0.0  ;;  %538 = vst [vmem:[#allocation2 + $0x169] sm:$0xff] %v505_v41  ;;  %v2011_v6 = vld [vmem:[#allocation2 + $0x4a] sm:$0xff] }
  0x5f   : > { %4244 = vmatprep.subr.bf16.mxu0 %v4731_v30  ;;  %4051 = vmatpush3.bf16.msra.mxu1 %v4735_v15  ;;  %v3777_v15 = vld [vmem:[%s4847_s8 + $0x78] sm:$0xff]   ;;  %v5184_v18 = vpack.c.bf16 %v2012_v7, %v2011_v6  ;;  %v2027_v62 = vld [vmem:[#allocation2 + $0x10a] sm:$0xff] }
  0x60   : > { %4052 = vmatprep.subr.bf16.mxu1 %v4737_v34  ;;  %539 = vst [vmem:[#allocation2 + $0x171] sm:$0xff] %v506_v47  ;;  %v3761_v50 = vunpack.c.l.bf16 %v3777_v15  ;;  %v3762_v55 = vunpack.c.h.bf16 %v3777_v15  ;;  %v549_v6 = vld [vmem:[#allocation2 + $0x50] sm:$0xff]  ;;  %v4745_v7 = vld [vmem:[%s5643_s3 + $0x88] sm:$0xff]  }
  0x61   : > { %v2029_v15 = vld [vmem:[#allocation2 + $0x122] sm:$0xff] }
  0x62   : > { %4245 = vmatpush3.bf16.msra.mxu0 %v4731_v30  ;;  %v436_v60 = vmul.f32 %v3761_v50, %v4900_v19  ;;  %v437_v63 = vmul.f32 %v3762_v55, %v4900_v19  ;;  %v4740_v19 = vld [vmem:[%s5643_s3 + $0x190] sm:$0xff]   ;;  %v5209_v30 = vpack.c.bf16 %v2014_v3, %v2013_v2  ;;  %v2031_v55 = vld [vmem:[#allocation2 + $0x13a] sm:$0xff] }
  0x63   : > { %4246 = vmatprep.subr.bf16.mxu0 %v4733_v43  ;;  %4053 = vmatpush3.bf16.msra.mxu1 %v4737_v34  ;;  %v652_v34 = vpack.c.bf16 %v504_v59, %v503_v56  ;;  %v2025_v56 = vld [vmem:[#allocation2 + $0xf2] sm:$0xff]  ;;  %v2030_v50 = vld [vmem:[#allocation2 + $0x12a] sm:$0xff] }
  0x64   : > { %4023 = vmatmul.mubr.bf16.gmra.mrb[12].mxu1 %v1739_v25  ;;  %4054 = vmatprep.subr.bf16.mxu1 %v4739_v54  ;;  %v5195_v21 = vadd.f32 %v4905_v20, %v436_v60  ;;  %v5198_v22 = vadd.f32 %v4905_v20, %v437_v63  ;;  %v2016_v25 = vld [vmem:[#allocation2 + $0x82] sm:$0xff]  ;;  %v650_v20 = vpack.c.bf16 %v500_v32, %v499_v31  ;;  %v547_v59 = vld [vmem:[#allocation2 + $0x38] sm:$0xff] }
  0x65   : > { %4215 = vmatmul.mubr.bf16.gmra.mrb[12].mxu0 %v1740_v57  ;;  %4026 = vmatprep.mubr.bf16.mxu1 %v1740_v57  ;;  %v5215_v33 = vpack.c.bf16 %v2016_v25, %v2015_v10  ;;  %v651_v31 = vpack.c.bf16 %v502_v45, %v501_v36  ;;  %v5233_v32 = vpack.c.bf16 %v2018_v17, %v2017_v16  ;;  %v543_v36 = vld [vmem:[#allocation2 + $0x8] sm:$0xff]  ;;  %v546_v57 = vld [vmem:[#allocation2 + $0x30] sm:$0xff]  ;;  %v552_v10 = vld [vmem:[#allocation2 + $0x78] sm:$0xff] }
  0x66   : > { %4247 = vmatpush3.bf16.msra.mxu0 %v4733_v43  ;;  %4250 = vmatprep.mubr.bf16.mxu0 %v5146_v0  ;;  %v507_v24 = vmax.f32 %v5195_v21, 0.0  ;;  %v508_v29 = vmax.f32 %v5198_v22, 0.0  ;;  %v2024_v43 = vld [vmem:[#allocation2 + $0xe2] sm:$0xff]  ;;  %v5253_v45 = vpack.c.bf16 %v506_v47, %v505_v41  ;;  %v574_v48 = vpack.c.bf16 %v543_v36, %v542_v35  ;;  %v2034_v16 = vld [vmem:[#allocation2 + $0x15a] sm:$0xff]  ;;  %v557_v35 = vld [vmem:[#allocation2 + $0xb0] sm:$0xff] }
  0x67   : > { %4248 = vmatprep.subr.bf16.mxu0 %v4734_v37  ;;  %4055 = vmatpush3.bf16.msra.mxu1 %v4739_v54  ;;  %v5257_v51 = vpack.c.bf16 %v2024_v43, %v2023_v42  ;;  %v545_v54 = vld [vmem:[#allocation2 + $0x20] sm:$0xff]  ;;  %v5274_v1 = vpack.c.bf16 %v547_v59, %v546_v57  ;;  %v5292_v2 = vpack.c.bf16 %v2030_v50, %v2029_v15  ;;  %v2035_v17 = vld [vmem:[#allocation2 + $0x16a] sm:$0xff]  ;;  %v2036_v26 = vld [vmem:[#allocation2 + $0x172] sm:$0xff] }
  0x68   : > { %4056 = vmatprep.subr.bf16.mxu1 %v4741_v49  ;;  %540 = vst [vmem:[#allocation2 + $0x181] sm:$0xff] %v507_v24  ;;  %541 = vst [vmem:[#allocation2 + $0x189] sm:$0xff] %v508_v29  ;;  %v5268_v41 = vld [vmem:[%s5643_s3 + $0x1c0] sm:$0xff]   ;;  %v5270_v47 = vpack.c.bf16 %v545_v54, %v544_v53  ;;  %v5326_v42 = vpack.c.bf16 %v508_v29, %v507_v24  ;;  %v5332_v53 = vpack.c.bf16 %v557_v35, %v556_v40  ;;  %v4757_v21 = vld [vmem:[%s5643_s3 + $0xb8] sm:$0xff]  }
  0x69   : > { %v2032_v60 = vld [vmem:[#allocation2 + $0x142] sm:$0xff]  ;;  %v560_v22 = vld [vmem:[#allocation2 + $0xd8] sm:$0xff]  ;;  %v562_v29 = vld [vmem:[#allocation2 + $0xf0] sm:$0xff] }
  0x6a   : > { %4249 = vmatpush3.bf16.msra.mxu0 %v4734_v37  ;;  %v2028_v37 = vld [vmem:[#allocation2 + $0x112] sm:$0xff]  ;;  %v553_v25 = vld [vmem:[#allocation2 + $0x80] sm:$0xff] }
  0x6b   : > { %4282 = vmatprep.subr.bf16.mxu0 %v4736_v5  ;;  %4057 = vmatpush3.bf16.msra.mxu1 %v4741_v49  ;;  %v5272_v49 = vpack.c.bf16 %v2026_v61, %v2025_v56  ;;  %v5276_v4 = vpack.c.bf16 %v2028_v37, %v2027_v62  ;;  %v558_v36 = vld [vmem:[#allocation2 + $0xc0] sm:$0xff]  ;;  %v563_v57 = vld [vmem:[#allocation2 + $0xf8] sm:$0xff]  ;;  %v4754_v37 = vld [vmem:[%s5643_s3 + $0x1c8] sm:$0xff]  }
  0x6c   : > { %4027 = vmatmul.mubr.bf16.gmra.mrb[16].mxu1 %v647_v9  ;;  %4090 = vmatprep.subr.bf16.mxu1 %v5175_v11  ;;  %v550_v9 = vld [vmem:[#allocation2 + $0x60] sm:$0xff]  ;;  %v5349_v62 = vpack.c.bf16 %v563_v57, %v562_v29  ;;  %v4766_v35 = vld [vmem:[%s5643_s3 + $0x1f8] sm:$0xff]   ;;  %v4771_v29 = vld [vmem:[%s5643_s3 + $0xf0] sm:$0xff]  }
  0x6d   : > { %4251 = vmatmul.mubr.bf16.vlgmr.msra.gmra.mrb[0].mxu0 %v5177_v12  ;;  %4030 = vmatprep.mubr.bf16.mxu1 %v648_v13  ;;  %v551_v13 = vld [vmem:[#allocation2 + $0x68] sm:$0xff]  ;;  %v561_v24 = vld [vmem:[#allocation2 + $0xe0] sm:$0xff] }
  0x6e   : > { %4283 = vmatpush3.bf16.msra.mxu0 %v4736_v5  ;;  %4254 = vmatprep.mubr.bf16.mxu0 %v5184_v18  ;;  %v548_v5 = vld [vmem:[#allocation2 + $0x48] sm:$0xff]  ;;  %v5294_v3 = vpack.c.bf16 %v551_v13, %v550_v9  ;;  %v5345_v59 = vld [vmem:[%s5643_s3 + $0xc0] sm:$0xff]   ;;  %v5347_v61 = vpack.c.bf16 %v561_v24, %v560_v22  ;;  %v4756_v13 = vld [vmem:[%s5643_s3 + $0x1d0] sm:$0xff]  }
  0x6f   : > { %4284 = vmatprep.subr.bf16.mxu0 %v4738_v58  ;;  %v5290_v63 = vpack.c.bf16 %v549_v6, %v548_v5  ;;  %v2037_v43 = vld [vmem:[#allocation2 + $0x182] sm:$0xff]  ;;  %v565_v6 = vld [vmem:[#allocation2 + $0x110] sm:$0xff]  ;;  %v2621_v24 = vld [vmem:[#allocation2 + $0x39] sm:$0xff] }
  0x70   : > { %v564_v5 = vld [vmem:[#allocation2 + $0x108] sm:$0xff]  ;;  %v2620_v22 = vld [vmem:[#allocation2 + $0x31] sm:$0xff] }
  0x71   : > { %v567_v9 = vld [vmem:[#allocation2 + $0x128] sm:$0xff]  ;;  %v5363_v15 = vpack.c.bf16 %v565_v6, %v564_v5 }
  0x72   : > { %4285 = vmatpush3.bf16.msra.mxu0 %v4738_v58  ;;  %v4747_v58 = vld [vmem:[%s5643_s3 + $0x90] sm:$0xff]   ;;  %v2624_v5 = vld [vmem:[#allocation2 + $0x61] sm:$0xff] }
  0x73   : > { %4286 = vmatprep.subr.bf16.mxu0 %v4740_v19  ;;  %v2625_v6 = vld [vmem:[#allocation2 + $0x69] sm:$0xff] }
  0x74   : > { %4031 = vmatmul.mubr.bf16.gmra.mrb[20].mxu1 %v649_v14  ;;  %v2033_v14 = vld [vmem:[#allocation2 + $0x152] sm:$0xff] }
  0x75   : > { %4255 = vmatmul.mubr.bf16.gmra.mrb[4].mxu0 %v5209_v30  ;;  %4034 = vmatprep.mubr.bf16.mxu1 %v650_v20  ;;  %v554_v20 = vld [vmem:[#allocation2 + $0x90] sm:$0xff] }
  0x76   : > { %4258 = vmatprep.mubr.bf16.mxu0 %v5215_v33  ;;  %4287 = vmatpush3.bf16.msra.mxu0 %v4740_v19  ;;  %v4749_v19 = vld [vmem:[%s5643_s3 + $0x98] sm:$0xff]  }
  0x77   : > { %4288 = vmatprep.subr.bf16.mxu0 %v4742_v8 }
  0x7a   : > { %4289 = vmatpush3.bf16.msra.mxu0 %v4742_v8  ;;  %v555_v8 = vld [vmem:[#allocation2 + $0x98] sm:$0xff] }
  0x7b   : > { %4290 = vmatprep.subr.bf16.mxu0 %v4744_v28 }
  0x7c   : > { %4035 = vmatmul.mubr.bf16.gmra.mrb[24].mxu1 %v651_v31  ;;  %v5310_v31 = vpack.c.bf16 %v2034_v16, %v2033_v14  ;;  %v573_v16 = vld [vmem:[#allocation2 + $0x170] sm:$0xff] }
  0x7d   : > { %4259 = vmatmul.mubr.bf16.gmra.mrb[8].mxu0 %v5233_v32  ;;  %4038 = vmatprep.mubr.bf16.mxu1 %v652_v34  ;;  %v5312_v34 = vpack.c.bf16 %v555_v8, %v554_v20  ;;  %v4762_v20 = vld [vmem:[%s5643_s3 + $0x1e8] sm:$0xff]  }
  0x7e   : > { %4262 = vmatprep.mubr.bf16.mxu0 %v5239_v38  ;;  %4291 = vmatpush3.bf16.msra.mxu0 %v4744_v28  ;;  %v5308_v28 = vpack.c.bf16 %v553_v25, %v552_v10  ;;  %v571_v10 = vld [vmem:[#allocation2 + $0x158] sm:$0xff]  ;;  %v4760_v25 = vld [vmem:[%s5643_s3 + $0x1e0] sm:$0xff]   ;;  %v572_v8 = vld [vmem:[#allocation2 + $0x168] sm:$0xff] }
  0x7f   : > { %4292 = vmatprep.subr.bf16.mxu0 %v4746_v39 }
  0x82   : > { %4293 = vmatpush3.bf16.msra.mxu0 %v4746_v39  ;;  %v5314_v39 = vpack.c.bf16 %v2036_v26, %v2035_v17  ;;  %v1089_v17 = vld [vmem:[#allocation2 + $0x2] sm:$0xff]  ;;  %v1090_v26 = vld [vmem:[#allocation2 + $0xa] sm:$0xff] }
  0x83   : > { %4294 = vmatprep.subr.bf16.mxu0 %v4748_v44  ;;  %v1121_v40 = vpack.c.bf16 %v1090_v26, %v1089_v17  ;;  %v4775_v17 = vld [vmem:[%s5643_s3 + $0x220] sm:$0xff]  }
  0x84   : > { %4039 = vmatmul.mubr.bf16.gmra.mrb[28].mxu1 %v5253_v45 }
  0x85   : > { %4263 = vmatmul.mubr.bf16.gmra.mrb[12].mxu0 %v5255_v46  ;;  %4058 = vmatprep.mubr.bf16.mxu1 %v574_v48  ;;  %v559_v48 = vld [vmem:[#allocation2 + $0xc8] sm:$0xff] }
  0x86   : > { %4266 = vmatprep.mubr.bf16.mxu0 %v5257_v51  ;;  %4295 = vmatpush3.bf16.msra.mxu0 %v4748_v44  ;;  %v2038_v44 = vld [vmem:[#allocation2 + $0x18a] sm:$0xff]  ;;  %v5334_v56 = vpack.c.bf16 %v559_v48, %v558_v36  ;;  %v4768_v36 = vld [vmem:[%s5643_s3 + $0x200] sm:$0xff]   ;;  %v4765_v48 = vld [vmem:[%s5643_s3 + $0xd8] sm:$0xff]  }
  0x87   : > { %4296 = vmatprep.subr.bf16.mxu0 %v4750_v52  ;;  %v2054_v54 = vpack.c.bf16 %v2038_v44, %v2037_v43  ;;  %v4761_v43 = vld [vmem:[%s5643_s3 + $0xc8] sm:$0xff]   ;;  %v4763_v44 = vld [vmem:[%s5643_s3 + $0xd0] sm:$0xff]  }
  0x8a   : > { %4297 = vmatpush3.bf16.msra.mxu0 %v4750_v52  ;;  %v4755_v52 = vld [vmem:[%s5643_s3 + $0xb0] sm:$0xff]  }
  0x8b   : > { %4330 = vmatprep.subr.bf16.mxu0 %v5268_v41 }
  0x8c   : > { %4059 = vmatmul.mubr.bf16.vlgmr.msra.gmra.mrb[0].mxu1 %v5270_v47 }
  0x8d   : > { %4267 = vmatmul.mubr.bf16.gmra.mrb[16].mxu0 %v5272_v49  ;;  %4091 = vmatpush3.bf16.msra.mxu1 %v5175_v11  ;;  %v5296_v11 = vpack.c.bf16 %v2032_v60, %v2031_v55  ;;  %v4758_v55 = vld [vmem:[%s5643_s3 + $0x1d8] sm:$0xff]   ;;  %v570_v60 = vld [vmem:[#allocation2 + $0x150] sm:$0xff] }
  0x8e   : > { %4062 = vmatprep.mubr.bf16.mxu1 %v5274_v1  ;;  %4270 = vmatprep.mubr.bf16.mxu0 %v5276_v4  ;;  %v5379_v14 = vpack.c.bf16 %v571_v10, %v570_v60  ;;  %v4772_v60 = vld [vmem:[%s5643_s3 + $0x210] sm:$0xff]  }
  0x8f   : > { %4092 = vmatprep.subr.bf16.mxu1 %v4745_v7 }
  0x91   : > { %4093 = vmatpush3.bf16.msra.mxu1 %v4745_v7  ;;  %v566_v7 = vld [vmem:[#allocation2 + $0x120] sm:$0xff] }
  0x92   : > { %4094 = vmatprep.subr.bf16.mxu1 %v4747_v58  ;;  %v5365_v50 = vpack.c.bf16 %v567_v9, %v566_v7  ;;  %v2654_v9 = vpack.c.bf16 %v2625_v6, %v2624_v5 }
  0x94   : > { %4063 = vmatmul.mubr.bf16.gmra.mrb[4].mxu1 %v5290_v63 }
  0x95   : > { %4271 = vmatmul.mubr.bf16.gmra.mrb[20].mxu0 %v5292_v2  ;;  %4066 = vmatprep.mubr.bf16.mxu1 %v5294_v3 }
  0x96   : > { %4274 = vmatprep.mubr.bf16.mxu0 %v5296_v11  ;;  %4095 = vmatpush3.bf16.msra.mxu1 %v4747_v58  ;;  %v569_v58 = vld [vmem:[#allocation2 + $0x140] sm:$0xff] }
  0x97   : > { %4096 = vmatprep.subr.bf16.mxu1 %v4749_v19 }
  0x9a   : > { %4097 = vmatpush3.bf16.msra.mxu1 %v4749_v19 }
  0x9b   : > { %4098 = vmatprep.subr.bf16.mxu1 %v4751_v27 }
  0x9c   : > { %4067 = vmatmul.mubr.bf16.gmra.mrb[8].mxu1 %v5308_v28 }
  0x9d   : > { %4275 = vmatmul.mubr.bf16.gmra.mrb[24].mxu0 %v5310_v31  ;;  %4070 = vmatprep.mubr.bf16.mxu1 %v5312_v34 }
  0x9e   : > { %4278 = vmatprep.mubr.bf16.mxu0 %v5314_v39  ;;  %4099 = vmatpush3.bf16.msra.mxu1 %v4751_v27  ;;  %v4764_v27 = vld [vmem:[%s5643_s3 + $0x1f0] sm:$0xff]  }
  0x9f   : > { %4100 = vmatprep.subr.bf16.mxu1 %v4753_v23 }
  0xa2   : > { %4101 = vmatpush3.bf16.msra.mxu1 %v4753_v23  ;;  %v5391_v23 = vpack.c.bf16 %v573_v16, %v572_v8  ;;  %v2632_v8 = vld [vmem:[#allocation2 + $0xc1] sm:$0xff]  ;;  %v2633_v16 = vld [vmem:[#allocation2 + $0xc9] sm:$0xff] }
  0xa3   : > { %4102 = vmatprep.subr.bf16.mxu1 %v4755_v52 }
  0xa4   : > { %4071 = vmatmul.mubr.bf16.gmra.mrb[12].mxu1 %v5332_v53 }
  0xa5   : > { %4279 = vmatmul.mubr.bf16.gmra.mrb[28].mxu0 %v2054_v54  ;;  %4074 = vmatprep.mubr.bf16.mxu1 %v5334_v56 }
  0xa6   : > { %4298 = vmatprep.mubr.bf16.mxu0 %v5274_v1  ;;  %4103 = vmatpush3.bf16.msra.mxu1 %v4755_v52  ;;  %v4767_v52 = vld [vmem:[%s5643_s3 + $0xe0] sm:$0xff]  }
  0xa7   : > { %4104 = vmatprep.subr.bf16.mxu1 %v4757_v21 }
  0xaa   : > { %4105 = vmatpush3.bf16.msra.mxu1 %v4757_v21  ;;  %v2345_v21 = vld [vmem:[#allocation2 + $0x1a0] sm:$0xff] }
  0xab   : > { %4138 = vmatprep.subr.bf16.mxu1 %v5345_v59 }
  0xac   : > { %4075 = vmatmul.mubr.bf16.gmra.mrb[16].mxu1 %v5347_v61 }
  0xad   : > { %4299 = vmatmul.mubr.bf16.vlgmr.msra.gmra.mrb[0].mxu0 %v5290_v63  ;;  %4078 = vmatprep.mubr.bf16.mxu1 %v5349_v62 }
  0xae   : > { %4331 = vmatpush3.bf16.msra.mxu0 %v5268_v41  ;;  %4302 = vmatprep.mubr.bf16.mxu0 %v5294_v3  ;;  %v568_v41 = vld [vmem:[#allocation2 + $0x138] sm:$0xff] }
  0xaf   : > { %4332 = vmatprep.subr.bf16.mxu0 %v4754_v37  ;;  %v5377_v19 = vpack.c.bf16 %v569_v58, %v568_v41  ;;  %v2628_v41 = vld [vmem:[#allocation2 + $0x91] sm:$0xff]  ;;  %v2629_v58 = vld [vmem:[#allocation2 + $0x99] sm:$0xff] }
  0xb2   : > { %4333 = vmatpush3.bf16.msra.mxu0 %v4754_v37  ;;  %v2623_v37 = vld [vmem:[#allocation2 + $0x51] sm:$0xff] }
  0xb3   : > { %4334 = vmatprep.subr.bf16.mxu0 %v4756_v13 }
  0xb4   : > { %4079 = vmatmul.mubr.bf16.gmra.mrb[20].mxu1 %v5363_v15 }
  0xb5   : > { %4303 = vmatmul.mubr.bf16.gmra.mrb[4].mxu0 %v5308_v28  ;;  %4082 = vmatprep.mubr.bf16.mxu1 %v5365_v50 }
  0xb6   : > { %4306 = vmatprep.mubr.bf16.mxu0 %v5312_v34  ;;  %4335 = vmatpush3.bf16.msra.mxu0 %v4756_v13  ;;  %v4770_v13 = vld [vmem:[%s5643_s3 + $0x208] sm:$0xff]  }
  0xb7   : > { %4336 = vmatprep.subr.bf16.mxu0 %v4758_v55 }
  0xba   : > { %4337 = vmatpush3.bf16.msra.mxu0 %v4758_v55  ;;  %v2627_v55 = vld [vmem:[#allocation2 + $0x81] sm:$0xff] }
  0xbb   : > { %4338 = vmatprep.subr.bf16.mxu0 %v4760_v25 }
  0xbc   : > { %4083 = vmatmul.mubr.bf16.gmra.mrb[24].mxu1 %v5377_v19 }
  0xbd   : > { %4307 = vmatmul.mubr.bf16.gmra.mrb[8].mxu0 %v5332_v53  ;;  %4086 = vmatprep.mubr.bf16.mxu1 %v5379_v14 }
  0xbe   : > { %4310 = vmatprep.mubr.bf16.mxu0 %v5334_v56  ;;  %4339 = vmatpush3.bf16.msra.mxu0 %v4760_v25  ;;  %v2656_v25 = vpack.c.bf16 %v2629_v58, %v2628_v41 }
  0xbf   : > { %4340 = vmatprep.subr.bf16.mxu0 %v4762_v20 }
  0xc2   : > { %4341 = vmatpush3.bf16.msra.mxu0 %v4762_v20  ;;  %v2631_v20 = vld [vmem:[#allocation2 + $0xb1] sm:$0xff] }
  0xc3   : > { %4342 = vmatprep.subr.bf16.mxu0 %v4764_v27 }
  0xc4   : > { %4087 = vmatmul.mubr.bf16.gmra.mrb[28].mxu1 %v5391_v23 }
  0xc5   : > { %4311 = vmatmul.mubr.bf16.gmra.mrb[12].mxu0 %v5347_v61  ;;  %4106 = vmatprep.mubr.bf16.mxu1 %v1121_v40  ;;  %v2635_v40 = vld [vmem:[#allocation2 + $0xe1] sm:$0xff] }
  0xc6   : > { %4314 = vmatprep.mubr.bf16.mxu0 %v5349_v62  ;;  %4343 = vmatpush3.bf16.msra.mxu0 %v4764_v27  ;;  %v2658_v27 = vpack.c.bf16 %v2633_v16, %v2632_v8  ;;  %v2942_v8 = vld [vmem:[#allocation2 + $0xf2] sm:$0xff] }
  0xc7   : > { %4344 = vmatprep.subr.bf16.mxu0 %v4766_v35 }
  0xca   : > { %4345 = vmatpush3.bf16.msra.mxu0 %v4766_v35  ;;  %v2636_v35 = vld [vmem:[#allocation2 + $0xf1] sm:$0xff] }
  0xcb   : > { %4378 = vmatprep.subr.bf16.mxu0 %v4768_v36 }
  0xcc   : > { %4107 = vmatmul.mubr.bf16.vlgmr.msra.gmra.mrb[0].mxu1 %v5146_v0  ;;  %v2342_v0 = vld [vmem:[#allocation2 + $0x180] sm:$0xff] }
  0xcd   : > { %4315 = vmatmul.mubr.bf16.gmra.mrb[16].mxu0 %v5363_v15  ;;  %4139 = vmatpush3.bf16.msra.mxu1 %v5345_v59  ;;  %v2652_v59 = vpack.c.bf16 %v2621_v24, %v2620_v22  ;;  %v2644_v22 = vld [vmem:[#allocation2 + $0x151] sm:$0xff]  ;;  %v2645_v24 = vld [vmem:[#allocation2 + $0x159] sm:$0xff] }
  0xce   : > { %4110 = vmatprep.mubr.bf16.mxu1 %v5177_v12  ;;  %4318 = vmatprep.mubr.bf16.mxu0 %v5365_v50  ;;  %v2343_v12 = vld [vmem:[#allocation2 + $0x188] sm:$0xff] }
  0xcf   : > { %4140 = vmatprep.subr.bf16.mxu1 %v4761_v43  ;;  %v5423_v54 = vpack.c.bf16 %v2343_v12, %v2342_v0  ;;  %v2639_v0 = vld [vmem:[#allocation2 + $0x111] sm:$0xff]  ;;  %v2640_v12 = vld [vmem:[#allocation2 + $0x121] sm:$0xff] }
  0xd1   : > { %4141 = vmatpush3.bf16.msra.mxu1 %v4761_v43  ;;  %v4777_v43 = vld [vmem:[%s5643_s3 + $0x230] sm:$0xff]  }
  0xd2   : > { %4142 = vmatprep.subr.bf16.mxu1 %v4763_v44 }
  0xd4   : > { %4111 = vmatmul.mubr.bf16.gmra.mrb[4].mxu1 %v5184_v18  ;;  %v4769_v18 = vld [vmem:[%s5643_s3 + $0xe8] sm:$0xff]  }
  0xd5   : > { %4319 = vmatmul.mubr.bf16.gmra.mrb[20].mxu0 %v5377_v19  ;;  %4114 = vmatprep.mubr.bf16.mxu1 %v5209_v30  ;;  %v2344_v30 = vld [vmem:[#allocation2 + $0x198] sm:$0xff] }
  0xd6   : > { %4322 = vmatprep.mubr.bf16.mxu0 %v5379_v14  ;;  %4143 = vmatpush3.bf16.msra.mxu1 %v4763_v44  ;;  %v2361_v57 = vpack.c.bf16 %v2345_v21, %v2344_v30  ;;  %v4780_v21 = vld [vmem:[%s5643_s3 + $0x108] sm:$0xff]  }
  0xd7   : > { %4144 = vmatprep.subr.bf16.mxu1 %v4765_v48 }
  0xda   : > { %4145 = vmatpush3.bf16.msra.mxu1 %v4765_v48 }
  0xdb   : > { %4146 = vmatprep.subr.bf16.mxu1 %v4767_v52 }
  0xdc   : > { %4115 = vmatmul.mubr.bf16.gmra.mrb[8].mxu1 %v5215_v33  ;;  %v4773_v33 = vld [vmem:[%s5643_s3 + $0xf8] sm:$0xff]  }
  0xdd   : > { %4323 = vmatmul.mubr.bf16.gmra.mrb[24].mxu0 %v5391_v23  ;;  %4118 = vmatprep.mubr.bf16.mxu1 %v5233_v32  ;;  %v2622_v32 = vld [vmem:[#allocation2 + $0x49] sm:$0xff] }
  0xde   : > { %4326 = vmatprep.mubr.bf16.mxu0 %v5423_v54  ;;  %4147 = vmatpush3.bf16.msra.mxu1 %v4767_v52  ;;  %v2653_v7 = vpack.c.bf16 %v2623_v37, %v2622_v32  ;;  %v2641_v52 = vld [vmem:[#allocation2 + $0x129] sm:$0xff]  ;;  %v2927_v32 = vld [vmem:[#allocation2 + $0x3a] sm:$0xff] }
  0xdf   : > { %4148 = vmatprep.subr.bf16.mxu1 %v4769_v18  ;;  %v5483_v30 = vpack.c.bf16 %v2641_v52, %v2640_v12  ;;  %v4784_v37 = vld [vmem:[%s5643_s3 + $0x128] sm:$0xff]  }
  0xe0   : > { %v2955_v12 = vld [vmem:[#allocation2 + $0x18a] sm:$0xff] }
  0xe2   : > { %4149 = vmatpush3.bf16.msra.mxu1 %v4769_v18 }
  0xe3   : > { %4150 = vmatprep.subr.bf16.mxu1 %v4771_v29 }
  0xe4   : > { %4119 = vmatmul.mubr.bf16.gmra.mrb[12].mxu1 %v5239_v38  ;;  %v5446_v38 = vld [vmem:[%s5643_s3 + $0x100] sm:$0xff]  }
  0xe5   : > { %4327 = vmatmul.mubr.bf16.gmra.mrb[28].mxu0 %v2361_v57  ;;  %4122 = vmatprep.mubr.bf16.mxu1 %v5255_v46  ;;  %v2626_v46 = vld [vmem:[#allocation2 + $0x79] sm:$0xff] }
  0xe6   : > { %4346 = vmatprep.mubr.bf16.mxu0 %v2652_v59  ;;  %4151 = vmatpush3.bf16.msra.mxu1 %v4771_v29  ;;  %v2655_v10 = vpack.c.bf16 %v2627_v55, %v2626_v46  ;;  %v4782_v57 = vld [vmem:[%s5643_s3 + $0x118] sm:$0xff]   ;;  %v4783_v59 = vld [vmem:[%s5643_s3 + $0x120] sm:$0xff]  }
  0xe7   : > { %4152 = vmatprep.subr.bf16.mxu1 %v4773_v33  ;;  %v2934_v46 = vld [vmem:[#allocation2 + $0x92] sm:$0xff]  ;;  %v2935_v55 = vld [vmem:[#allocation2 + $0x9a] sm:$0xff] }
  0xe8   : > { %v2962_v58 = vpack.c.bf16 %v2935_v55, %v2934_v46 }
  0xea   : > { %4153 = vmatpush3.bf16.msra.mxu1 %v4773_v33  ;;  %v2926_v33 = vld [vmem:[#allocation2 + $0x32] sm:$0xff] }
  0xeb   : > { %4426 = vmatprep.subr.bf16.mxu1 %v5446_v38  ;;  %v2958_v6 = vpack.c.bf16 %v2927_v32, %v2926_v33 }
  0xec   : > { %4123 = vmatmul.mubr.bf16.gmra.mrb[16].mxu1 %v5257_v51  ;;  %v4774_v51 = vld [vmem:[%s5643_s3 + $0x218] sm:$0xff]  }
  0xed   : > { %4347 = vmatmul.mubr.bf16.vlgmr.msra.gmra.mrb[0].mxu0 %v2653_v7  ;;  %4126 = vmatprep.mubr.bf16.mxu1 %v5272_v49  ;;  %v2630_v49 = vld [vmem:[#allocation2 + $0xa9] sm:$0xff] }
  0xee   : > { %4379 = vmatpush3.bf16.msra.mxu0 %v4768_v36  ;;  %4350 = vmatprep.mubr.bf16.mxu0 %v2654_v9  ;;  %v2657_v26 = vpack.c.bf16 %v2631_v20, %v2630_v49  ;;  %v2637_v36 = vld [vmem:[#allocation2 + $0xf9] sm:$0xff]  ;;  %v2931_v7 = vld [vmem:[#allocation2 + $0x6a] sm:$0xff]  ;;  %v2941_v20 = vld [vmem:[#allocation2 + $0xe2] sm:$0xff] }
  0xef   : > { %4380 = vmatprep.subr.bf16.mxu0 %v4770_v13  ;;  %v5472_v48 = vpack.c.bf16 %v2637_v36, %v2636_v35  ;;  %v4786_v9 = vld [vmem:[%s5643_s3 + $0x138] sm:$0xff]  }
  0xf0   : > { %v2950_v35 = vld [vmem:[#allocation2 + $0x152] sm:$0xff] }
  0xf2   : > { %4381 = vmatpush3.bf16.msra.mxu0 %v4770_v13 }
  0xf3   : > { %4382 = vmatprep.subr.bf16.mxu0 %v4772_v60 }
  0xf4   : > { %4127 = vmatmul.mubr.bf16.gmra.mrb[20].mxu1 %v5276_v4  ;;  %v4776_v4 = vld [vmem:[%s5643_s3 + $0x228] sm:$0xff]  }
  0xf5   : > { %4351 = vmatmul.mubr.bf16.gmra.mrb[4].mxu0 %v2655_v10  ;;  %4130 = vmatprep.mubr.bf16.mxu1 %v5292_v2  ;;  %v2634_v2 = vld [vmem:[#allocation2 + $0xd9] sm:$0xff] }
  0xf6   : > { %4354 = vmatprep.mubr.bf16.mxu0 %v2656_v25  ;;  %4383 = vmatpush3.bf16.msra.mxu0 %v4772_v60  ;;  %v5470_v44 = vpack.c.bf16 %v2635_v40, %v2634_v2  ;;  %v2936_v60 = vld [vmem:[#allocation2 + $0xaa] sm:$0xff]  ;;  %v2937_v10 = vld [vmem:[#allocation2 + $0xb2] sm:$0xff]  ;;  %v2938_v25 = vld [vmem:[#allocation2 + $0xc2] sm:$0xff] }
  0xf7   : > { %4384 = vmatprep.subr.bf16.mxu0 %v4774_v51  ;;  %v2949_v40 = vld [vmem:[#allocation2 + $0x142] sm:$0xff] }
  0xfa   : > { %4385 = vmatpush3.bf16.msra.mxu0 %v4774_v51  ;;  %v2963_v51 = vpack.c.bf16 %v2937_v10, %v2936_v60 }
  0xfb   : > { %4386 = vmatprep.subr.bf16.mxu0 %v4775_v17 }
  0xfc   : > { %4131 = vmatmul.mubr.bf16.gmra.mrb[24].mxu1 %v5296_v11  ;;  %v4778_v11 = vld [vmem:[%s5643_s3 + $0x238] sm:$0xff]  }
  0xfd   : > { %4355 = vmatmul.mubr.bf16.gmra.mrb[8].mxu0 %v2657_v26  ;;  %4134 = vmatprep.mubr.bf16.mxu1 %v5310_v31  ;;  %v2638_v31 = vld [vmem:[#allocation2 + $0x109] sm:$0xff]  ;;  %v2945_v26 = vld [vmem:[#allocation2 + $0x112] sm:$0xff] }
  0xfe   : > { %4358 = vmatprep.mubr.bf16.mxu0 %v2658_v27  ;;  %4387 = vmatpush3.bf16.msra.mxu0 %v4775_v17  ;;  %v5481_v18 = vpack.c.bf16 %v2639_v0, %v2638_v31  ;;  %v2946_v27 = vld [vmem:[#allocation2 + $0x122] sm:$0xff] }
  0xff   : > { %4388 = vmatprep.subr.bf16.mxu0 %v4776_v4  ;;  %v1729_v31 = vld [vmem:[#allocation2 + $0x169] sm:$0xff] }
 0x100   : > { %v2954_v0 = vld [vmem:[#allocation2 + $0x182] sm:$0xff] }
 0x102   : > { %4389 = vmatpush3.bf16.msra.mxu0 %v4776_v4 }
 0x103   : > { %4390 = vmatprep.subr.bf16.mxu0 %v4777_v43 }
 0x104   : > { %4135 = vmatmul.mubr.bf16.gmra.mrb[28].mxu1 %v5314_v39  ;;  %v2643_v39 = vld [vmem:[#allocation2 + $0x141] sm:$0xff] }
 0x105   : > { %4359 = vmatmul.mubr.bf16.gmra.mrb[12].mxu0 %v5470_v44  ;;  %4154 = vmatprep.mubr.bf16.mxu1 %v5270_v47  ;;  %v2642_v47 = vld [vmem:[#allocation2 + $0x139] sm:$0xff] }
 0x106   : > { %4362 = vmatprep.mubr.bf16.mxu0 %v5472_v48  ;;  %4391 = vmatpush3.bf16.msra.mxu0 %v4777_v43  ;;  %v5493_v29 = vpack.c.bf16 %v2643_v39, %v2642_v47  ;;  %v2972_v47 = vpack.c.bf16 %v2955_v12, %v2954_v0  ;;  %v1731_v39 = vld [vmem:[#allocation2 + $0x181] sm:$0xff] }
 0x107   : > { %4392 = vmatprep.subr.bf16.mxu0 %v4778_v11 }
 0x10a   : > { %4393 = vmatpush3.bf16.msra.mxu0 %v4778_v11  ;;  %v2953_v11 = vld [vmem:[#allocation2 + $0x172] sm:$0xff] }
 0x10c   : > { %4155 = vmatmul.mubr.bf16.vlgmr.msra.gmra.mrb[0].mxu1 %v5274_v1  ;;  %v5495_v1 = vpack.c.bf16 %v2645_v24, %v2644_v22  ;;  %v2957_v22 = vld [vmem:[#allocation2 + $0x1a2] sm:$0xff] }
 0x10d   : > { %4363 = vmatmul.mubr.bf16.gmra.mrb[16].mxu0 %v5481_v18  ;;  %4434 = vmatpush3.bf16.msra.mxu1 %v5446_v38 }
 0x10e   : > { %4158 = vmatprep.mubr.bf16.mxu1 %v5290_v63  ;;  %4366 = vmatprep.mubr.bf16.mxu0 %v5483_v30  ;;  %v4781_v63 = vld [vmem:[%s5643_s3 + $0x110] sm:$0xff]  }
 0x10f   : > { %4427 = vmatprep.subr.bf16.mxu1 %v4780_v21 }
 0x111   : > { %4435 = vmatpush3.bf16.msra.mxu1 %v4780_v21  ;;  %v1732_v21 = vld [vmem:[#allocation2 + $0x189] sm:$0xff] }
 0x112   : > { %4428 = vmatprep.subr.bf16.mxu1 %v4781_v63  ;;  %v1748_v24 = vpack.c.bf16 %v1732_v21, %v1731_v39 }
 0x114   : > { %4159 = vmatmul.mubr.bf16.gmra.mrb[4].mxu1 %v5294_v3  ;;  %v2650_v3 = vld [vmem:[#allocation2 + $0x199] sm:$0xff] }
 0x115   : > { %4367 = vmatmul.mubr.bf16.gmra.mrb[20].mxu0 %v5493_v29  ;;  %4162 = vmatprep.mubr.bf16.mxu1 %v5308_v28  ;;  %v2651_v28 = vld [vmem:[#allocation2 + $0x1a1] sm:$0xff] }
 0x116   : > { %4370 = vmatprep.mubr.bf16.mxu0 %v5495_v1  ;;  %4436 = vmatpush3.bf16.msra.mxu1 %v4781_v63  ;;  %v2667_v5 = vpack.c.bf16 %v2651_v28, %v2650_v3 }
 0x117   : > { %4429 = vmatprep.subr.bf16.mxu1 %v4782_v57 }
 0x11a   : > { %4437 = vmatpush3.bf16.msra.mxu1 %v4782_v57 }
 0x11b   : > { %4430 = vmatprep.subr.bf16.mxu1 %v4783_v59 }
 0x11c   : > { %4163 = vmatmul.mubr.bf16.gmra.mrb[8].mxu1 %v5312_v34  ;;  %v2928_v34 = vld [vmem:[#allocation2 + $0x4a] sm:$0xff] }
 0x11d   : > { %4371 = vmatmul.mubr.bf16.gmra.mrb[24].mxu0 %v5253_v45  ;;  %4166 = vmatprep.mubr.bf16.mxu1 %v5332_v53  ;;  %v4785_v45 = vld [vmem:[%s5643_s3 + $0x130] sm:$0xff]   ;;  %v2930_v53 = vld [vmem:[#allocation2 + $0x62] sm:$0xff] }
 0x11e   : > { %4374 = vmatprep.mubr.bf16.mxu0 %v5326_v42  ;;  %4438 = vmatpush3.bf16.msra.mxu1 %v4783_v59  ;;  %v2929_v42 = vld [vmem:[#allocation2 + $0x52] sm:$0xff]  ;;  %v2960_v38 = vpack.c.bf16 %v2931_v7, %v2930_v53 }
 0x11f   : > { %4431 = vmatprep.subr.bf16.mxu1 %v4784_v37  ;;  %v2959_v13 = vpack.c.bf16 %v2929_v42, %v2928_v34 }
 0x122   : > { %4439 = vmatpush3.bf16.msra.mxu1 %v4784_v37 }
 0x123   : > { %4432 = vmatprep.subr.bf16.mxu1 %v4785_v45 }
 0x124   : > { %4167 = vmatmul.mubr.bf16.gmra.mrb[12].mxu1 %v5334_v56  ;;  %v2932_v56 = vld [vmem:[#allocation2 + $0x7a] sm:$0xff] }
 0x125   : > { %4375 = vmatmul.mubr.bf16.gmra.mrb[28].mxu0 %v2667_v5  ;;  %4170 = vmatprep.mubr.bf16.mxu1 %v5347_v61  ;;  %v2933_v61 = vld [vmem:[#allocation2 + $0x82] sm:$0xff] }
 0x126   : > { %4394 = vmatprep.mubr.bf16.mxu0 %v2958_v6  ;;  %4440 = vmatpush3.bf16.msra.mxu1 %v4785_v45  ;;  %v2961_v41 = vpack.c.bf16 %v2933_v61, %v2932_v56 }
 0x127   : > { %4433 = vmatprep.subr.bf16.mxu1 %v4786_v9 }
 0x12a   : > { %4441 = vmatpush3.bf16.msra.mxu1 %v4786_v9 }
 0x12c   : > { %4171 = vmatmul.mubr.bf16.gmra.mrb[16].mxu1 %v5349_v62  ;;  %v2939_v62 = vld [vmem:[#allocation2 + $0xca] sm:$0xff] }
 0x12d   : > { %4395 = vmatmul.mubr.bf16.vlgmr.msra.gmra.mrb[0].mxu0 %v2959_v13  ;;  %4174 = vmatprep.mubr.bf16.mxu1 %v5363_v15  ;;  %v2964_v49 = vpack.c.bf16 %v2939_v62, %v2938_v25  ;;  %v2940_v15 = vld [vmem:[#allocation2 + $0xda] sm:$0xff] }
 0x12e   : > { %4398 = vmatprep.mubr.bf16.mxu0 %v2960_v38  ;;  %v2965_v16 = vpack.c.bf16 %v2941_v20, %v2940_v15  ;;  %v5553_v13 = vld [vmem:[%s5644_s4] ss:$0 sm:$0xff] }
 0x134   : > { %4175 = vmatmul.mubr.bf16.gmra.mrb[20].mxu1 %v5365_v50  ;;  %v2943_v50 = vld [vmem:[#allocation2 + $0xfa] sm:$0xff] }
 0x135   : > { %4399 = vmatmul.mubr.bf16.gmra.mrb[4].mxu0 %v2961_v41  ;;  %4178 = vmatprep.mubr.bf16.mxu1 %v5377_v19  ;;  %v2966_v17 = vpack.c.bf16 %v2943_v50, %v2942_v8  ;;  %v2944_v19 = vld [vmem:[#allocation2 + $0x10a] sm:$0xff] }
 0x136   : > { %4402 = vmatprep.mubr.bf16.mxu0 %v2962_v58  ;;  %v2967_v4 = vpack.c.bf16 %v2945_v26, %v2944_v19 }
 0x13c   : > { %4179 = vmatmul.mubr.bf16.gmra.mrb[24].mxu1 %v5379_v14  ;;  %v2947_v14 = vld [vmem:[#allocation2 + $0x12a] sm:$0xff] }
 0x13d   : > { %4403 = vmatmul.mubr.bf16.gmra.mrb[8].mxu0 %v2963_v51  ;;  %4182 = vmatprep.mubr.bf16.mxu1 %v5391_v23  ;;  %v2968_v2 = vpack.c.bf16 %v2947_v14, %v2946_v27  ;;  %v2948_v23 = vld [vmem:[#allocation2 + $0x13a] sm:$0xff] }
 0x13e   : > { %4406 = vmatprep.mubr.bf16.mxu0 %v2964_v49  ;;  %v2969_v36 = vpack.c.bf16 %v2949_v40, %v2948_v23 }
 0x144   : > { %4183 = vmatmul.mubr.bf16.gmra.mrb[28].mxu1 %v5423_v54  ;;  %v2951_v54 = vld [vmem:[#allocation2 + $0x15a] sm:$0xff] }
 0x145   : > { %4407 = vmatmul.mubr.bf16.gmra.mrb[12].mxu0 %v2965_v16  ;;  %4218 = vmatprep.mubr.bf16.mxu1 %v5470_v44  ;;  %v2970_v43 = vpack.c.bf16 %v2951_v54, %v2950_v35  ;;  %v2952_v44 = vld [vmem:[#allocation2 + $0x16a] sm:$0xff] }
 0x146   : > { %4410 = vmatprep.mubr.bf16.mxu0 %v2966_v17  ;;  %v2971_v52 = vpack.c.bf16 %v2953_v11, %v2952_v44 }
 0x14c   : > { %4219 = vmatmul.mubr.bf16.vlgmr.msra.gmra.mrb[16].mxu1 %v5472_v48  ;;  %v1730_v48 = vld [vmem:[#allocation2 + $0x171] sm:$0xff] }
 0x14d   : > { %4411 = vmatmul.mubr.bf16.gmra.mrb[16].mxu0 %v2967_v4  ;;  %4222 = vmatprep.mubr.bf16.mxu1 %v5481_v18  ;;  %v1747_v18 = vpack.c.bf16 %v1730_v48, %v1729_v31 }
 0x14e   : > { %4414 = vmatprep.mubr.bf16.mxu0 %v2968_v2 }
 0x154   : > { %4223 = vmatmul.mubr.bf16.gmra.mrb[20].mxu1 %v5483_v30  ;;  %v2956_v30 = vld [vmem:[#allocation2 + $0x19a] sm:$0xff] }
 0x155   : > { %4415 = vmatmul.mubr.bf16.gmra.mrb[20].mxu0 %v2969_v36  ;;  %4226 = vmatprep.mubr.bf16.mxu1 %v5493_v29  ;;  %v2973_v29 = vpack.c.bf16 %v2957_v22, %v2956_v30 }
 0x156   : > { %4418 = vmatprep.mubr.bf16.mxu0 %v2970_v43 }
 0x15c   : > { %4227 = vmatmul.mubr.bf16.gmra.mrb[24].mxu1 %v5495_v1 }
 0x15d   : > { %4419 = vmatmul.mubr.bf16.gmra.mrb[24].mxu0 %v2971_v52  ;;  %4230 = vmatprep.mubr.bf16.mxu1 %v1747_v18 }
 0x15e   : > { %4422 = vmatprep.mubr.bf16.mxu0 %v2972_v47 }
 0x164   : > { %4231 = vmatmul.mubr.bf16.gmra.mrb[28].mxu1 %v1748_v24 }
 0x165   : > { %4423 = vmatmul.mubr.bf16.gmra.mrb[28].mxu0 %v2973_v29 }
 0x1df   : > { %v4156_v63 = vpop.f32.mrb[0].mxu1 }
 0x1e0   : > { %v1542_v57 = vpop.f32.mrb[1].mxu1 }
 0x1e1   : > { %v4157_v59 = vpop.f32.mrb[2].mxu1 }
 0x1e2   : > { %v1545_v3 = vpop.f32.mrb[3].mxu1 }
 0x1e7   : > { %v4160_v28 = vpop.f32.mrb[4].mxu1 }
 0x1e8   : > { %v1558_v33 = vpop.f32.mrb[5].mxu1 }
 0x1e9   : > { %v4161_v32 = vpop.f32.mrb[6].mxu1 }
 0x1ea   : > { %v1561_v37 = vpop.f32.mrb[7].mxu1 }
 0x1ef   : > { %v4164_v1 = vpop.f32.mrb[8].mxu1 }
 0x1f0   : > { %v1574_v5 = vpop.f32.mrb[9].mxu1 }
 0x1f1   : > { %v5538_v6 = vpop.f32.mrb[10].mxu1 }
 0x1f2   : > { %v5540_v45 = vpop.f32.mrb[11].mxu1 }
 0x1f7   : > { %v5542_v34 = vpop.f32.mrb[12].mxu1 }
 0x1f8   : > { %v5544_v42 = vpop.f32.mrb[13].mxu1 }
 0x1f9   : > { %v5546_v53 = vpop.f32.mrb[14].mxu1 }
 0x1fa   : > { %v5548_v7 = vpop.f32.mrb[15].mxu1 }
 0x200   : > { %v4396_v9 = vpop.f32.mrb[0].mxu0 }
 0x201   : > { %v4442_v38 = vadd.f32 %v4396_v9, %v4156_v63  ;;  %v3073_v56 = vpop.f32.mrb[1].mxu0 }
 0x202   : > { %v4443_v61 = vadd.f32 %v3073_v56, %v1542_v57  ;;  %v4397_v46 = vpop.f32.mrb[2].mxu0 }
 0x203   : > { %v3241_v55 = vadd.f32 %v4442_v38, %v5553_v13  ;;  %v4444_v41 = vadd.f32 %v4397_v46, %v4157_v59  ;;  %v3076_v58 = vpop.f32.mrb[3].mxu0 }
 0x204   : > { %v3239_v60 = vadd.f32 %v4443_v61, %v5553_v13  ;;  %v4445_v10 = vadd.f32 %v3076_v58, %v1545_v3 }
 0x205   : > { %3273 = vst [vmem:[%s4852_s11 + $0x10] sm:$0xff] %v3241_v55  ;;  %v3242_v25 = vadd.f32 %v4444_v41, %v5553_v13  ;;  %v3346_v16 = vmul.f32 %v3241_v55, %v3241_v55 }
 0x206   : > { %3271 = vst [vmem:[%s4852_s11] sm:$0xff] %v3239_v60  ;;  %v3240_v62 = vadd.f32 %v4445_v10, %v5553_v13  ;;  %v3344_v51 = vmul.f32 %v3239_v60, %v3239_v60 }
 0x207   : > { %3274 = vst [vmem:[%s4852_s11 + $0x18] sm:$0xff] %v3242_v25  ;;  %v3347_v14 = vmul.f32 %v3242_v25, %v3242_v25 }
 0x208   : > { %3272 = vst [vmem:[%s4852_s11 + $0x8] sm:$0xff] %v3240_v62  ;;  %v3304_v49 = vadd.f32 %v3240_v62, %v3239_v60  ;;  %v3345_v15 = vmul.f32 %v3240_v62, %v3240_v62  ;;  %v4400_v20 = vpop.f32.mrb[4].mxu0 }
 0x209   : > { %v4446_v8 = vadd.f32 %v4400_v20, %v4160_v28  ;;  %v3089_v50 = vpop.f32.mrb[5].mxu0 }
 0x20a   : > { %v3305_v17 = vadd.f32 %v3304_v49, %v3241_v55  ;;  %v3376_v19 = vadd.f32 %v3345_v15, %v3344_v51  ;;  %v4447_v26 = vadd.f32 %v3089_v50, %v1558_v33  ;;  %v4401_v27 = vpop.f32.mrb[6].mxu0 }
 0x20b   : > { %v3245_v4 = vadd.f32 %v4446_v8, %v5553_v13  ;;  %v4448_v2 = vadd.f32 %v4401_v27, %v4161_v32  ;;  %v3092_v23 = vpop.f32.mrb[7].mxu0 }
 0x20c   : > { %v3377_v40 = vadd.f32 %v3376_v19, %v3346_v16  ;;  %v3243_v35 = vadd.f32 %v4447_v26, %v5553_v13  ;;  %v3306_v54 = vadd.f32 %v3305_v17, %v3242_v25  ;;  %v4449_v36 = vadd.f32 %v3092_v23, %v1561_v37 }
 0x20d   : > { %3277 = vst [vmem:[%s4852_s11 + $0x30] sm:$0xff] %v3245_v4  ;;  %v3246_v43 = vadd.f32 %v4448_v2, %v5553_v13  ;;  %v3350_v21 = vmul.f32 %v3245_v4, %v3245_v4 }
 0x20e   : > { %3275 = vst [vmem:[%s4852_s11 + $0x20] sm:$0xff] %v3243_v35  ;;  %v3307_v44 = vadd.f32 %v3306_v54, %v3243_v35  ;;  %v3348_v11 = vmul.f32 %v3243_v35, %v3243_v35  ;;  %v3378_v31 = vadd.f32 %v3377_v40, %v3347_v14  ;;  %v3244_v48 = vadd.f32 %v4449_v36, %v5553_v13 }
 0x20f   : > { %3278 = vst [vmem:[%s4852_s11 + $0x38] sm:$0xff] %v3246_v43  ;;  %v3351_v63 = vmul.f32 %v3246_v43, %v3246_v43 }
 0x210   : > { %v3379_v0 = vadd.f32 %v3378_v31, %v3348_v11  ;;  %3276 = vst [vmem:[%s4852_s11 + $0x28] sm:$0xff] %v3244_v48  ;;  %v3308_v12 = vadd.f32 %v3307_v44, %v3244_v48  ;;  %v3349_v52 = vmul.f32 %v3244_v48, %v3244_v48  ;;  %v4404_v18 = vpop.f32.mrb[8].mxu0 }
 0x211   : > { %v4450_v47 = vadd.f32 %v4404_v18, %v4164_v1  ;;  %v3105_v39 = vpop.f32.mrb[9].mxu0 }
 0x212   : > { %v3309_v30 = vadd.f32 %v3308_v12, %v3245_v4  ;;  %v3380_v22 = vadd.f32 %v3379_v0, %v3349_v52  ;;  %v4451_v24 = vadd.f32 %v3105_v39, %v1574_v5  ;;  %v4405_v29 = vpop.f32.mrb[10].mxu0 }
 0x213   : > { %v3249_v57 = vadd.f32 %v4450_v47, %v5553_v13  ;;  %v4452_v59 = vadd.f32 %v4405_v29, %v5538_v6  ;;  %v3108_v3 = vpop.f32.mrb[11].mxu0 }
 0x214   : > { %v3381_v28 = vadd.f32 %v3380_v22, %v3350_v21  ;;  %v3247_v33 = vadd.f32 %v4451_v24, %v5553_v13  ;;  %v3310_v32 = vadd.f32 %v3309_v30, %v3246_v43  ;;  %v4453_v37 = vadd.f32 %v3108_v3, %v5540_v45 }
 0x215   : > { %3281 = vst [vmem:[%s4852_s11 + $0x50] sm:$0xff] %v3249_v57  ;;  %v3250_v1 = vadd.f32 %v4452_v59, %v5553_v13  ;;  %v3354_v45 = vmul.f32 %v3249_v57, %v3249_v57 }
 0x216   : > { %3279 = vst [vmem:[%s4852_s11 + $0x40] sm:$0xff] %v3247_v33  ;;  %v3311_v5 = vadd.f32 %v3310_v32, %v3247_v33  ;;  %v3352_v9 = vmul.f32 %v3247_v33, %v3247_v33  ;;  %v3382_v38 = vadd.f32 %v3381_v28, %v3351_v63  ;;  %v3248_v56 = vadd.f32 %v4453_v37, %v5553_v13 }
 0x217   : > { %3282 = vst [vmem:[%s4852_s11 + $0x58] sm:$0xff] %v3250_v1  ;;  %v3355_v51 = vmul.f32 %v3250_v1, %v3250_v1 }
 0x218   : > { %v3383_v61 = vadd.f32 %v3382_v38, %v3352_v9  ;;  %3280 = vst [vmem:[%s4852_s11 + $0x48] sm:$0xff] %v3248_v56  ;;  %v3312_v6 = vadd.f32 %v3311_v5, %v3248_v56  ;;  %v3353_v46 = vmul.f32 %v3248_v56, %v3248_v56  ;;  %v4408_v55 = vpop.f32.mrb[12].mxu0 }
 0x219   : > { %v4454_v41 = vadd.f32 %v4408_v55, %v5542_v34  ;;  %v3121_v58 = vpop.f32.mrb[13].mxu0 }
 0x21a   : > { %v3313_v60 = vadd.f32 %v3312_v6, %v3249_v57  ;;  %v3384_v10 = vadd.f32 %v3383_v61, %v3353_v46  ;;  %v4455_v25 = vadd.f32 %v3121_v58, %v5544_v42  ;;  %v4409_v62 = vpop.f32.mrb[14].mxu0 }
 0x21b   : > { %v3253_v49 = vadd.f32 %v4454_v41, %v5553_v13  ;;  %v4456_v15 = vadd.f32 %v4409_v62, %v5546_v53  ;;  %v3124_v20 = vpop.f32.mrb[15].mxu0 }
 0x21c   : > { %v3385_v8 = vadd.f32 %v3384_v10, %v3354_v45  ;;  %v3251_v50 = vadd.f32 %v4455_v25, %v5553_v13  ;;  %v3314_v34 = vadd.f32 %v3313_v60, %v3250_v1  ;;  %v4457_v16 = vadd.f32 %v3124_v20, %v5548_v7 }
 0x21d   : > { %3285 = vst [vmem:[%s4852_s11 + $0x70] sm:$0xff] %v3253_v49  ;;  %v3254_v17 = vadd.f32 %v4456_v15, %v5553_v13  ;;  %v3358_v36 = vmul.f32 %v3253_v49, %v3253_v49 }
 0x21e   : > { %3283 = vst [vmem:[%s4852_s11 + $0x60] sm:$0xff] %v3251_v50  ;;  %v3315_v42 = vadd.f32 %v3314_v34, %v3251_v50  ;;  %v3356_v19 = vmul.f32 %v3251_v50, %v3251_v50  ;;  %v3386_v26 = vadd.f32 %v3385_v8, %v3355_v51  ;;  %v3252_v27 = vadd.f32 %v4457_v16, %v5553_v13 }
 0x21f   : > { %3286 = vst [vmem:[%s4852_s11 + $0x78] sm:$0xff] %v3254_v17  ;;  %v4220_v14 = vpop.f32.mrb[16].mxu1  ;;  %v3359_v0 = vmul.f32 %v3254_v17, %v3254_v17 }
 0x220   : > { %v3387_v53 = vadd.f32 %v3386_v26, %v3356_v19  ;;  %3284 = vst [vmem:[%s4852_s11 + $0x68] sm:$0xff] %v3252_v27  ;;  %v3316_v4 = vadd.f32 %v3315_v42, %v3252_v27  ;;  %v3357_v2 = vmul.f32 %v3252_v27, %v3252_v27  ;;  %v4412_v23 = vpop.f32.mrb[16].mxu0  ;;  %v1912_v40 = vpop.f32.mrb[17].mxu1 }
 0x221   : > { %v4458_v35 = vadd.f32 %v4412_v23, %v4220_v14  ;;  %v3137_v54 = vpop.f32.mrb[17].mxu0  ;;  %v4221_v7 = vpop.f32.mrb[18].mxu1 }
 0x222   : > { %v3317_v43 = vadd.f32 %v3316_v4, %v3253_v49  ;;  %v3388_v44 = vadd.f32 %v3387_v53, %v3357_v2  ;;  %v4459_v11 = vadd.f32 %v3137_v54, %v1912_v40  ;;  %v4413_v31 = vpop.f32.mrb[18].mxu0  ;;  %v1915_v48 = vpop.f32.mrb[19].mxu1 }
 0x223   : > { %v3257_v12 = vadd.f32 %v4458_v35, %v5553_v13  ;;  %v4460_v52 = vadd.f32 %v4413_v31, %v4221_v7  ;;  %v3140_v18 = vpop.f32.mrb[19].mxu0 }
 0x224   : > { %v3389_v47 = vadd.f32 %v3388_v44, %v3358_v36  ;;  %v3255_v39 = vadd.f32 %v4459_v11, %v5553_v13  ;;  %v3318_v21 = vadd.f32 %v3317_v43, %v3254_v17  ;;  %v4461_v30 = vadd.f32 %v3140_v18, %v1915_v48 }
 0x225   : > { %3289 = vst [vmem:[%s4852_s11 + $0x90] sm:$0xff] %v3257_v12  ;;  %v3258_v22 = vadd.f32 %v4460_v52, %v5553_v13  ;;  %v3362_v38 = vmul.f32 %v3257_v12, %v3257_v12 }
 0x226   : > { %3287 = vst [vmem:[%s4852_s11 + $0x80] sm:$0xff] %v3255_v39  ;;  %v3319_v24 = vadd.f32 %v3318_v21, %v3255_v39  ;;  %v3360_v29 = vmul.f32 %v3255_v39, %v3255_v39  ;;  %v3390_v63 = vadd.f32 %v3389_v47, %v3359_v0  ;;  %v3256_v57 = vadd.f32 %v4461_v30, %v5553_v13 }
 0x227   : > { %3290 = vst [vmem:[%s4852_s11 + $0x98] sm:$0xff] %v3258_v22  ;;  %v4224_v59 = vpop.f32.mrb[20].mxu1  ;;  %v3363_v41 = vmul.f32 %v3258_v22, %v3258_v22 }
 0x228   : > { %v3391_v3 = vadd.f32 %v3390_v63, %v3360_v29  ;;  %3288 = vst [vmem:[%s4852_s11 + $0x88] sm:$0xff] %v3256_v57  ;;  %v3320_v28 = vadd.f32 %v3319_v24, %v3256_v57  ;;  %v3361_v33 = vmul.f32 %v3256_v57, %v3256_v57  ;;  %v4416_v32 = vpop.f32.mrb[20].mxu0  ;;  %v1928_v37 = vpop.f32.mrb[21].mxu1 }
 0x229   : > { %v4462_v1 = vadd.f32 %v4416_v32, %v4224_v59  ;;  %v3153_v5 = vpop.f32.mrb[21].mxu0  ;;  %v4225_v9 = vpop.f32.mrb[22].mxu1 }
 0x22a   : > { %v3321_v56 = vadd.f32 %v3320_v28, %v3257_v12  ;;  %v3392_v61 = vadd.f32 %v3391_v3, %v3361_v33  ;;  %v4463_v6 = vadd.f32 %v3153_v5, %v1928_v37  ;;  %v4417_v46 = vpop.f32.mrb[22].mxu0  ;;  %v1931_v55 = vpop.f32.mrb[23].mxu1 }
 0x22b   : > { %v3261_v58 = vadd.f32 %v4462_v1, %v5553_v13  ;;  %v4464_v45 = vadd.f32 %v4417_v46, %v4225_v9  ;;  %v3156_v60 = vpop.f32.mrb[23].mxu0 }
 0x22c   : > { %v3393_v10 = vadd.f32 %v3392_v61, %v3362_v38  ;;  %v3259_v25 = vadd.f32 %v4463_v6, %v5553_v13  ;;  %v3322_v62 = vadd.f32 %v3321_v56, %v3258_v22  ;;  %v4465_v51 = vadd.f32 %v3156_v60, %v1931_v55 }
 0x22d   : > { %3293 = vst [vmem:[%s4852_s11 + $0xb0] sm:$0xff] %v3261_v58  ;;  %v3262_v49 = vadd.f32 %v4464_v45, %v5553_v13  ;;  %v3366_v4 = vmul.f32 %v3261_v58, %v3261_v58 }
 0x22e   : > { %3291 = vst [vmem:[%s4852_s11 + $0xa0] sm:$0xff] %v3259_v25  ;;  %v3323_v15 = vadd.f32 %v3322_v62, %v3259_v25  ;;  %v3364_v20 = vmul.f32 %v3259_v25, %v3259_v25  ;;  %v3394_v8 = vadd.f32 %v3393_v10, %v3363_v41  ;;  %v3260_v50 = vadd.f32 %v4465_v51, %v5553_v13 }
 0x22f   : > { %3294 = vst [vmem:[%s4852_s11 + $0xb8] sm:$0xff] %v3262_v49  ;;  %v4228_v34 = vpop.f32.mrb[24].mxu1  ;;  %v3367_v7 = vmul.f32 %v3262_v49, %v3262_v49 }
 0x230   : > { %v3395_v16 = vadd.f32 %v3394_v8, %v3364_v20  ;;  %3292 = vst [vmem:[%s4852_s11 + $0xa8] sm:$0xff] %v3260_v50  ;;  %v3324_v17 = vadd.f32 %v3323_v15, %v3260_v50  ;;  %v3365_v42 = vmul.f32 %v3260_v50, %v3260_v50  ;;  %v4420_v19 = vpop.f32.mrb[24].mxu0  ;;  %v1944_v26 = vpop.f32.mrb[25].mxu1 }
 0x231   : > { %v4466_v27 = vadd.f32 %v4420_v19, %v4228_v34  ;;  %v3169_v14 = vpop.f32.mrb[25].mxu0  ;;  %v4229_v53 = vpop.f32.mrb[26].mxu1 }
 0x232   : > { %v3325_v2 = vadd.f32 %v3324_v17, %v3261_v58  ;;  %v3396_v23 = vadd.f32 %v3395_v16, %v3365_v42  ;;  %v4467_v40 = vadd.f32 %v3169_v14, %v1944_v26  ;;  %v4421_v35 = vpop.f32.mrb[26].mxu0  ;;  %v1947_v54 = vpop.f32.mrb[27].mxu1 }
 0x233   : > { %v3265_v36 = vadd.f32 %v4466_v27, %v5553_v13  ;;  %v4468_v43 = vadd.f32 %v4421_v35, %v4229_v53  ;;  %v3172_v44 = vpop.f32.mrb[27].mxu0 }
 0x234   : > { %v3397_v11 = vadd.f32 %v3396_v23, %v3366_v4  ;;  %v3263_v31 = vadd.f32 %v4467_v40, %v5553_v13  ;;  %v3326_v48 = vadd.f32 %v3325_v2, %v3262_v49  ;;  %v4469_v0 = vadd.f32 %v3172_v44, %v1947_v54  ;;  %v3303_v23 = vld [vmem:[%s5646_s6] sm:$0x1] }
 0x235   : > { %3297 = vst [vmem:[%s4852_s11 + $0xd0] sm:$0xff] %v3265_v36  ;;  %v3266_v12 = vadd.f32 %v4468_v43, %v5553_v13  ;;  %v3370_v28 = vmul.f32 %v3265_v36, %v3265_v36  ;;  %v3343_v54 = vld [vmem:[%s5647_s7] sm:$0x1] }
 0x236   : > { %3295 = vst [vmem:[%s4852_s11 + $0xc0] sm:$0xff] %v3263_v31  ;;  %v3327_v52 = vadd.f32 %v3326_v48, %v3263_v31  ;;  %v3368_v18 = vmul.f32 %v3263_v31, %v3263_v31  ;;  %v3398_v47 = vadd.f32 %v3397_v11, %v3367_v7  ;;  %v3264_v39 = vadd.f32 %v4469_v0, %v5553_v13 }
 0x237   : > { %3298 = vst [vmem:[%s4852_s11 + $0xd8] sm:$0xff] %v3266_v12  ;;  %v4232_v21 = vpop.f32.mrb[28].mxu1  ;;  %v3371_v9 = vmul.f32 %v3266_v12, %v3266_v12 }
 0x238   : > { %v3399_v30 = vadd.f32 %v3398_v47, %v3368_v18  ;;  %3296 = vst [vmem:[%s4852_s11 + $0xc8] sm:$0xff] %v3264_v39  ;;  %v3328_v22 = vadd.f32 %v3327_v52, %v3264_v39  ;;  %v3369_v24 = vmul.f32 %v3264_v39, %v3264_v39  ;;  %v4424_v29 = vpop.f32.mrb[28].mxu0  ;;  %v1960_v63 = vpop.f32.mrb[29].mxu1 }
 0x239   : > { %v4470_v57 = vadd.f32 %v4424_v29, %v4232_v21  ;;  %v3185_v59 = vpop.f32.mrb[29].mxu0  ;;  %v4233_v3 = vpop.f32.mrb[30].mxu1 }
 0x23a   : > { %v3329_v33 = vadd.f32 %v3328_v22, %v3265_v36  ;;  %v3400_v32 = vadd.f32 %v3399_v30, %v3369_v24  ;;  %v4471_v37 = vadd.f32 %v3185_v59, %v1960_v63  ;;  %v4425_v1 = vpop.f32.mrb[30].mxu0  ;;  %v1963_v5 = vpop.f32.mrb[31].mxu1 }
 0x23b   : > { %v3269_v38 = vadd.f32 %v4470_v57, %v5553_v13  ;;  %v4472_v56 = vadd.f32 %v4425_v1, %v4233_v3  ;;  %v3188_v61 = vpop.f32.mrb[31].mxu0 }
 0x23c   : > { %v3401_v6 = vadd.f32 %v3400_v32, %v3370_v28  ;;  %v3267_v46 = vadd.f32 %v4471_v37, %v5553_v13  ;;  %v3330_v55 = vadd.f32 %v3329_v33, %v3266_v12  ;;  %v4473_v41 = vadd.f32 %v3188_v61, %v1963_v5 }
 0x23d   : > { %3301 = vst [vmem:[%s4852_s11 + $0xf0] sm:$0xff] %v3269_v38  ;;  %v3270_v58 = vadd.f32 %v4472_v56, %v5553_v13  ;;  %v3374_v15 = vmul.f32 %v3269_v38, %v3269_v38 }
 0x23e   : > { %3299 = vst [vmem:[%s4852_s11 + $0xe0] sm:$0xff] %v3267_v46  ;;  %v3331_v45 = vadd.f32 %v3330_v55, %v3267_v46  ;;  %v3372_v60 = vmul.f32 %v3267_v46, %v3267_v46  ;;  %v3402_v10 = vadd.f32 %v3401_v6, %v3371_v9  ;;  %v3268_v25 = vadd.f32 %v4473_v41, %v5553_v13 }
 0x23f   : > { %3302 = vst [vmem:[%s4852_s11 + $0xf8] sm:$0xff] %v3270_v58  ;;  %v3375_v50 = vmul.f32 %v3270_v58, %v3270_v58 }
 0x240   : > { %v3403_v62 = vadd.f32 %v3402_v10, %v3372_v60  ;;  %3300 = vst [vmem:[%s4852_s11 + $0xe8] sm:$0xff] %v3268_v25  ;;  %v3332_v51 = vadd.f32 %v3331_v45, %v3268_v25  ;;  %v3373_v49 = vmul.f32 %v3268_v25, %v3268_v25 }
 0x242   : > { %v3333_v20 = vadd.f32 %v3332_v51, %v3269_v38  ;;  %v3404_v8 = vadd.f32 %v3403_v62, %v3373_v49 }
 0x244   : > { %v3334_v34 = vadd.f32 %v3333_v20, %v3270_v58  ;;  %v3405_v16 = vadd.f32 %v3404_v8, %v3374_v15 }
 0x246   : > { %v3335_v17 = vrot.slane %v3334_v34, 4  ;;  %v3406_v42 = vadd.f32 %v3405_v16, %v3375_v50 }
 0x248   : > { %v3336_v19 = vadd.f32 %v3335_v17, %v3334_v34  ;;  %v3407_v26 = vrot.slane %v3406_v42, 4 }
 0x24a   : > { %v3337_v27 = vrot.slane %v3336_v19, 2  ;;  %v3408_v14 = vadd.f32 %v3407_v26, %v3406_v42 }
 0x24c   : > { %v3338_v53 = vadd.f32 %v3337_v27, %v3336_v19  ;;  %v3409_v4 = vrot.slane %v3408_v14, 2 }
 0x24e   : > { %v3339_v13 = vrot.slane %v3338_v53, 1  ;;  %v3410_v2 = vadd.f32 %v3409_v4, %v3408_v14 }
 0x250   : > { %v3340_v40 = vadd.f32 %v3339_v13, %v3338_v53  ;;  %v3411_v35 = vrot.slane %v3410_v2, 1 }
 0x252   : > { %v3341_v7 = vadd.f32 %v3340_v40, %v3303_v23  ;;  %v3412_v36 = vadd.f32 %v3411_v35, %v3410_v2 }
 0x254   : > { %3342 = vst [vmem:[%s5646_s6] sm:$0x1] %v3341_v7  ;;  %v3413_v43 = vadd.f32 %v3412_v36, %v3343_v54 }
 0x256   : > { %3414 = vst [vmem:[%s5647_s7] sm:$0x1] %v3413_v43 }
 0x257 PF: > { %s18_s24 = sadd.s32 1, %s4793_s24  }
 0x258   : > { %p15_p5 = scmp.ge.s32.totalorder %s18_s24, 4  }
 0x25a   :  { %17 = sbr.rel (!%p15_p5) target bundleno = 1 (0x1), region = 100 }

// kernel: resblk_forward.3
= control target key start
LH: loop header
LB: loop body
LE: loop exit
PB: predicated region body
PF: predicated region fallthrough
CT: control target
= control target key end

     0   :  { %s5429_s30 = smov 0   ;;  %s6194_s0 = inlined_call_operand.vmem [shape: f32[2,16,16,128], index: 0, kind: input, shape index: {}]   ;;  %s6195_s1 = inlined_call_operand.vmem [shape: bf16[9,128,128], index: 1, kind: input, shape index: {}]   ;;  %s6196_s2 = inlined_call_operand.vmem [shape: f32[1,128], index: 2, kind: input, shape index: {}]   ;;  %s6197_s3 = inlined_call_operand.vmem [shape: bf16[128,128], index: 3, kind: input, shape index: {}]   ;;  %s6198_s4 = inlined_call_operand.vmem [shape: f32[1,128], index: 4, kind: input, shape index: {}]   ;;  %s6199_s5 = inlined_call_operand.vmem [shape: bf16[2,256,128], index: 5, kind: output, shape index: {0}]   ;;  %s6200_s6 = inlined_call_operand.vmem [shape: f32[1,128], index: 6, kind: output, shape index: {1}]   ;;  %s6201_s7 = inlined_call_operand.vmem [shape: f32[1,128], index: 7, kind: output, shape index: {2}]   ;;  %s6202_s8 = inlined_call_operand.vmem [shape: f32[1,128], index: 8, kind: output, shape index: {3}]   ;;  %s6203_s9 = inlined_call_operand.vmem [shape: f32[1,128], index: 9, kind: output, shape index: {4}]  }
   0x1 LB: > { %s3890_s10 = sadd.s32 4294967295, %s5376_s30   ;;  %p3894_p0 = scmp.ge.s32.totalorder %s5376_s30, 1  ;;  %s5376_s30 = sphi %s5429_s30, %s20_s30  }
   0x2   : > { %p276_p1 = scmp.lt.s32.totalorder %s5376_s30, 3 }
   0x4   : > { %p277_p2 = pnand %p3894_p0, %p276_p1 }
   0x5   : > { %p312_p3 = scmp.lt.s32.totalorder (!%p277_p2), %s3890_s10, 1  ;;  %p3899_p4 = scmp.ne.s32.totalorder (!%p277_p2), %s3890_s10, 0 }
   0x6   : > { %280 = sbr.rel (%p277_p2) target bundleno = 642 (0x282), region = 40 }
   0xd   : > { %s313_s11 = scalar_select %p312_p3, %s3890_s10, 1 }
   0xe   : > { %326 = sbr.rel (%p3899_p4) target bundleno = 44 (0x2c), region = 44  ;;  %v5378_v0 = vmov (!%p3899_p4), 0.0  }
   0xf   : > { %s4144_s12 = sshll.u32 %s313_s11, 8  ;;  %s4145_s13 = sshll.u32 %s313_s11, 7  ;;  %327 = vst [vmem:[#allocation2] sm:$0xff] (!%p3899_p4), %v5378_v0  ;;  %328 = vst [vmem:[#allocation2 + $0x8] sm:$0xff] (!%p3899_p4), %v5378_v0 }
  0x10   : > { %s5440_s16 = scalar_lea.vmem %s6194_s0, %s4144_s12  ;;  %s5445_s19 = scalar_lea.vmem %s6199_s5, %s4145_s13  ;;  %329 = vst [vmem:[#allocation2 + $0x10] sm:$0x3] (!%p3899_p4), %v5378_v0  ;;  %330 = vst [vmem:[#allocation2 + $0x18] sm:$0xff] (!%p3899_p4), %v5378_v0 }
  0x11   : > { %331 = vst [vmem:[#allocation2 + $0x20] sm:$0xff] (!%p3899_p4), %v5378_v0  ;;  %332 = vst [vmem:[#allocation2 + $0x28] sm:$0x3] (!%p3899_p4), %v5378_v0 }
  0x12   : > { %333 = vst [vmem:[#allocation2 + $0x30] sm:$0xff] (!%p3899_p4), %v5378_v0  ;;  %334 = vst [vmem:[#allocation2 + $0x38] sm:$0xff] (!%p3899_p4), %v5378_v0 }
  0x13   : > { %335 = vst [vmem:[#allocation2 + $0x40] sm:$0x3] (!%p3899_p4), %v5378_v0  ;;  %336 = vst [vmem:[#allocation2 + $0x48] sm:$0xff] (!%p3899_p4), %v5378_v0 }
  0x14   : > { %337 = vst [vmem:[#allocation2 + $0x50] sm:$0xff] (!%p3899_p4), %v5378_v0  ;;  %338 = vst [vmem:[#allocation2 + $0x58] sm:$0x3] (!%p3899_p4), %v5378_v0 }
  0x15   : > { %339 = vst [vmem:[#allocation2 + $0x60] sm:$0xff] %v5378_v0  ;;  %340 = vst [vmem:[#allocation2 + $0x68] sm:$0xff] %v5378_v0 }
  0x16   : > { %341 = vst [vmem:[#allocation2 + $0x70] sm:$0x3] %v5378_v0  ;;  %342 = vst [vmem:[#allocation2 + $0x78] sm:$0xff] %v5378_v0 }
  0x17   : > { %343 = vst [vmem:[#allocation2 + $0x80] sm:$0xff] %v5378_v0  ;;  %344 = vst [vmem:[#allocation2 + $0x88] sm:$0x3] %v5378_v0 }
  0x18   : > { %345 = vst [vmem:[#allocation2 + $0x90] sm:$0xff] %v5378_v0  ;;  %346 = vst [vmem:[#allocation2 + $0x98] sm:$0xff] %v5378_v0 }
  0x19   : > { %347 = vst [vmem:[#allocation2 + $0xa0] sm:$0x3] %v5378_v0  ;;  %348 = vst [vmem:[#allocation2 + $0xa8] sm:$0xff] %v5378_v0 }
  0x1a   : > { %349 = vst [vmem:[#allocation2 + $0xb0] sm:$0xff] %v5378_v0  ;;  %350 = vst [vmem:[#allocation2 + $0xb8] sm:$0x3] %v5378_v0 }
  0x1b   : > { %351 = vst [vmem:[#allocation2 + $0xc0] sm:$0xff] %v5378_v0  ;;  %352 = vst [vmem:[#allocation2 + $0xc8] sm:$0xff] %v5378_v0 }
  0x1c   : > { %353 = vst [vmem:[#allocation2 + $0xd0] sm:$0x3] %v5378_v0  ;;  %354 = vst [vmem:[#allocation2 + $0xd8] sm:$0xff] %v5378_v0 }
  0x1d   : > { %355 = vst [vmem:[#allocation2 + $0xe0] sm:$0xff] %v5378_v0  ;;  %356 = vst [vmem:[#allocation2 + $0xe8] sm:$0x3] %v5378_v0 }
  0x1e   : > { %357 = vst [vmem:[#allocation2 + $0xf0] sm:$0xff] %v5378_v0  ;;  %358 = vst [vmem:[#allocation2 + $0xf8] sm:$0xff] %v5378_v0 }
  0x1f   : > { %359 = vst [vmem:[#allocation2 + $0x100] sm:$0x3] %v5378_v0  ;;  %360 = vst [vmem:[#allocation2 + $0x108] sm:$0xff] %v5378_v0 }
  0x20   : > { %361 = vst [vmem:[#allocation2 + $0x110] sm:$0xff] %v5378_v0  ;;  %362 = vst [vmem:[#allocation2 + $0x118] sm:$0x3] %v5378_v0 }
  0x21   : > { %363 = vst [vmem:[#allocation2 + $0x120] sm:$0xff] %v5378_v0  ;;  %364 = vst [vmem:[#allocation2 + $0x128] sm:$0xff] %v5378_v0 }
  0x22   : > { %365 = vst [vmem:[#allocation2 + $0x130] sm:$0x3] %v5378_v0  ;;  %366 = vst [vmem:[#allocation2 + $0x138] sm:$0xff] %v5378_v0 }
  0x23   : > { %367 = vst [vmem:[#allocation2 + $0x140] sm:$0xff] %v5378_v0  ;;  %368 = vst [vmem:[#allocation2 + $0x148] sm:$0x3] %v5378_v0 }
  0x24   : > { %369 = vst [vmem:[#allocation2 + $0x150] sm:$0xff] %v5378_v0  ;;  %370 = vst [vmem:[#allocation2 + $0x158] sm:$0xff] %v5378_v0 }
  0x25   : > { %371 = vst [vmem:[#allocation2 + $0x160] sm:$0x3] %v5378_v0  ;;  %372 = vst [vmem:[#allocation2 + $0x168] sm:$0xff] %v5378_v0 }
  0x26   : > { %373 = vst [vmem:[#allocation2 + $0x170] sm:$0xff] %v5378_v0  ;;  %374 = vst [vmem:[#allocation2 + $0x178] sm:$0x3] %v5378_v0 }
  0x27   : > { %375 = vst [vmem:[#allocation2 + $0x180] sm:$0xff] %v5378_v0  ;;  %376 = vst [vmem:[#allocation2 + $0x188] sm:$0xff] %v5378_v0 }
  0x28   : > { %377 = vst [vmem:[#allocation2 + $0x190] sm:$0x3] %v5378_v0  ;;  %378 = vst [vmem:[#allocation2 + $0x198] sm:$0xff] %v5378_v0 }
  0x29   : > { %379 = vst [vmem:[#allocation2 + $0x1a0] sm:$0xff] %v5378_v0  ;;  %380 = vst [vmem:[#allocation2 + $0x1a8] sm:$0x3] %v5378_v0 }
  0x2a   : > { %381 = vst [vmem:[%s6200_s6] sm:$0x1] %v5378_v0  ;;  %382 = vst [vmem:[%s6201_s7] sm:$0x1] %v5378_v0 }
  0x2b   : > { %383 = vst [vmem:[%s6202_s8] sm:$0x1] %v5378_v0  ;;  %384 = vst [vmem:[%s6203_s9] sm:$0x1] %v5378_v0 }
  0x2c PF: > { %v5258_v1 = vld [vmem:[%s6195_s1 + $0x40] sm:$0xff]   ;;  %v5260_v3 = vld [vmem:[%s6195_s1 + $0x48] sm:$0xff]   ;;  %v5262_v5 = vld [vmem:[%s6195_s1 + $0x50] sm:$0xff]  }
  0x2d   : > { %v5259_v2 = vld [vmem:[%s6195_s1 + $0x100] sm:$0xff]   ;;  %4513 = vmatprep.subr.bf16.mxu1 %v5258_v1  ;;  %v5261_v4 = vld [vmem:[%s6195_s1 + $0x108] sm:$0xff]   ;;  %v5263_v6 = vld [vmem:[%s6195_s1 + $0x110] sm:$0xff]  }
  0x2e   : > { %4705 = vmatprep.subr.bf16.mxu0 %v5259_v2  ;;  %4514 = vmatpush3.bf16.msra.mxu1 %v5258_v1  ;;  %v5264_v7 = vld [vmem:[%s6195_s1 + $0x58] sm:$0xff]   ;;  %v5266_v9 = vld [vmem:[%s6195_s1 + $0x60] sm:$0xff]   ;;  %v5268_v11 = vld [vmem:[%s6195_s1 + $0x68] sm:$0xff]  }
  0x2f   : > { %4706 = vmatpush3.bf16.msra.mxu0 %v5259_v2  ;;  %4515 = vmatprep.subr.bf16.mxu1 %v5260_v3  ;;  %v5265_v8 = vld [vmem:[%s6195_s1 + $0x118] sm:$0xff]   ;;  %v5267_v10 = vld [vmem:[%s6195_s1 + $0x120] sm:$0xff]   ;;  %v5269_v12 = vld [vmem:[%s6195_s1 + $0x128] sm:$0xff]  }
  0x30   : > { %4707 = vmatprep.subr.bf16.mxu0 %v5261_v4  ;;  %v514_v13 = vld [vmem:[#allocation2 + $0x1] sm:$0xff]  ;;  %v515_v14 = vld [vmem:[#allocation2 + $0x9] sm:$0xff]  ;;  %v388_v19 = vld [vmem:[%s5440_s16 + $0x18] sm:$0xff] }
  0x31   : > { %v385_v15 = vld [vmem:[%s5440_s16] sm:$0xff]  ;;  %v546_v16 = vpack.c.bf16 %v515_v14, %v514_v13  ;;  %v386_v17 = vld [vmem:[%s5440_s16 + $0x8] sm:$0xff]  ;;  %v387_v18 = vld [vmem:[%s5440_s16 + $0x10] sm:$0xff]  ;;  %421 = vst [vmem:[#allocation2 + $0x39] sm:$0xff] %v388_v19 }
  0x32   : > { %4516 = vmatpush3.bf16.msra.mxu1 %v5260_v3  ;;  %418 = vst [vmem:[#allocation2 + $0x19] sm:$0xff] %v385_v15  ;;  %v5270_v20 = vld [vmem:[%s6195_s1 + $0x70] sm:$0xff]   ;;  %419 = vst [vmem:[#allocation2 + $0x21] sm:$0xff] %v386_v17  ;;  %v5502_v21 = vpack.c.bf16 %v386_v17, %v385_v15  ;;  %v389_v23 = vld [vmem:[%s5440_s16 + $0x20] sm:$0xff]  ;;  %v1642_v42 = vpack.c.bf16 %v388_v19, %v387_v18 }
  0x33   : > { %4708 = vmatpush3.bf16.msra.mxu0 %v5261_v4  ;;  %4517 = vmatprep.subr.bf16.mxu1 %v5262_v5  ;;  %420 = vst [vmem:[#allocation2 + $0x31] sm:$0xff] %v387_v18  ;;  %v5271_v22 = vld [vmem:[%s6195_s1 + $0x130] sm:$0xff]   ;;  %v390_v24 = vld [vmem:[%s5440_s16 + $0x28] sm:$0xff]  ;;  %422 = vst [vmem:[#allocation2 + $0x49] sm:$0xff] %v389_v23 }
  0x34   : > { %4709 = vmatprep.subr.bf16.mxu0 %v5263_v6  ;;  %4529 = vmatprep.mubr.bf16.mxu1 %v546_v16  ;;  %v5510_v25 = vld [vmem:[%s5440_s16 + $0x30] sm:$0xff]  ;;  %423 = vst [vmem:[#allocation2 + $0x51] sm:$0xff] %v390_v24  ;;  %v5514_v26 = vld [vmem:[%s5440_s16 + $0x38] sm:$0xff]  ;;  %v5522_v28 = vld [vmem:[%s5440_s16 + $0x40] sm:$0xff]  ;;  %v1643_v45 = vpack.c.bf16 %v390_v24, %v389_v23 }
  0x35   : > { %4721 = vmatprep.mubr.bf16.mxu0 %v5502_v21  ;;  %424 = vst [vmem:[#allocation2 + $0x61] sm:$0xff] %v5510_v25  ;;  %425 = vst [vmem:[#allocation2 + $0x69] sm:$0xff] %v5514_v26  ;;  %v5272_v27 = vld [vmem:[%s6195_s1 + $0x78] sm:$0xff]   ;;  %v5525_v29 = vld [vmem:[%s5440_s16 + $0x48] sm:$0xff]  ;;  %v1644_v57 = vpack.c.bf16 %v5514_v26, %v5510_v25 }
  0x36   : > { %4518 = vmatpush3.bf16.msra.mxu1 %v5262_v5  ;;  %426 = vst [vmem:[#allocation2 + $0x79] sm:$0xff] %v5522_v28  ;;  %427 = vst [vmem:[#allocation2 + $0x81] sm:$0xff] %v5525_v29  ;;  %v5530_v30 = vld [vmem:[%s5440_s16 + $0x50] sm:$0xff]  ;;  %v5533_v31 = vld [vmem:[%s5440_s16 + $0x58] sm:$0xff]  ;;  %v1645_v59 = vpack.c.bf16 %v5525_v29, %v5522_v28 }
  0x37   : > { %4710 = vmatpush3.bf16.msra.mxu0 %v5263_v6  ;;  %4519 = vmatprep.subr.bf16.mxu1 %v5264_v7  ;;  %v5273_v32 = vld [vmem:[%s6195_s1 + $0x138] sm:$0xff]   ;;  %428 = vst [vmem:[#allocation2 + $0x91] sm:$0xff] %v5530_v30  ;;  %429 = vst [vmem:[#allocation2 + $0x99] sm:$0xff] %v5533_v31  ;;  %v5541_v33 = vld [vmem:[%s5440_s16 + $0x60] sm:$0xff]  ;;  %v1646_v3 = vpack.c.bf16 %v5533_v31, %v5530_v30 }
  0x38   : > { %4711 = vmatprep.subr.bf16.mxu0 %v5265_v8  ;;  %v5544_v34 = vld [vmem:[%s5440_s16 + $0x68] sm:$0xff]  ;;  %430 = vst [vmem:[#allocation2 + $0xa9] sm:$0xff] %v5541_v33  ;;  %v5548_v35 = vld [vmem:[%s5440_s16 + $0x70] sm:$0xff]  ;;  %v5551_v36 = vld [vmem:[%s5440_s16 + $0x78] sm:$0xff] }
  0x39   : > { %v5275_v37 = vld [vmem:[%s6195_s1] sm:$0xff]   ;;  %431 = vst [vmem:[#allocation2 + $0xb1] sm:$0xff] %v5544_v34  ;;  %432 = vst [vmem:[#allocation2 + $0xc1] sm:$0xff] %v5548_v35  ;;  %v5566_v40 = vld [vmem:[%s5440_s16 + $0x88] sm:$0xff]  ;;  %v1647_v4 = vpack.c.bf16 %v5544_v34, %v5541_v33 }
  0x3a   : > { %4520 = vmatpush3.bf16.msra.mxu1 %v5264_v7  ;;  %433 = vst [vmem:[#allocation2 + $0xc9] sm:$0xff] %v5551_v36  ;;  %v5274_v38 = vld [vmem:[%s6195_s1 + $0x140] sm:$0xff]   ;;  %v5569_v41 = vld [vmem:[%s5440_s16 + $0x90] sm:$0xff]  ;;  %435 = vst [vmem:[#allocation2 + $0xe1] sm:$0xff] %v5566_v40 }
  0x3b   : > { %4712 = vmatpush3.bf16.msra.mxu0 %v5265_v8  ;;  %4521 = vmatprep.subr.bf16.mxu1 %v5266_v9  ;;  %v5563_v39 = vld [vmem:[%s5440_s16 + $0x80] sm:$0xff]  ;;  %v5574_v43 = vld [vmem:[%s5440_s16 + $0x98] sm:$0xff]  ;;  %436 = vst [vmem:[#allocation2 + $0xf1] sm:$0xff] %v5569_v41  ;;  %v5276_v44 = vld [vmem:[%s6195_s1 + $0x148] sm:$0xff]  }
  0x3c   : > { %4713 = vmatprep.subr.bf16.mxu0 %v5267_v10  ;;  %434 = vst [vmem:[#allocation2 + $0xd9] sm:$0xff] %v5563_v39  ;;  %437 = vst [vmem:[#allocation2 + $0xf9] sm:$0xff] %v5574_v43  ;;  %v5277_v46 = vld [vmem:[%s6195_s1 + $0x8] sm:$0xff]   ;;  %v5585_v47 = vld [vmem:[%s5440_s16 + $0xa0] sm:$0xff]  ;;  %v1650_v15 = vpack.c.bf16 %v5574_v43, %v5569_v41 }
  0x3d   : > { %v5588_v48 = vld [vmem:[%s5440_s16 + $0xa8] sm:$0xff]  ;;  %438 = vst [vmem:[#allocation2 + $0x109] sm:$0xff] %v5585_v47  ;;  %v5594_v49 = vld [vmem:[%s5440_s16 + $0xb0] sm:$0xff]  ;;  %v5597_v50 = vld [vmem:[%s5440_s16 + $0xb8] sm:$0xff] }
  0x3e   : > { %4522 = vmatpush3.bf16.msra.mxu1 %v5266_v9  ;;  %439 = vst [vmem:[#allocation2 + $0x111] sm:$0xff] %v5588_v48  ;;  %v5278_v51 = vld [vmem:[%s6195_s1 + $0x150] sm:$0xff]   ;;  %440 = vst [vmem:[#allocation2 + $0x121] sm:$0xff] %v5594_v49  ;;  %v5608_v53 = vld [vmem:[%s5440_s16 + $0xc0] sm:$0xff]  ;;  %v1648_v9 = vpack.c.bf16 %v5551_v36, %v5548_v35  ;;  %v1651_v16 = vpack.c.bf16 %v5588_v48, %v5585_v47  ;;  %v1652_v17 = vpack.c.bf16 %v5597_v50, %v5594_v49 }
  0x3f   : > { %4714 = vmatpush3.bf16.msra.mxu0 %v5267_v10  ;;  %4523 = vmatprep.subr.bf16.mxu1 %v5268_v11  ;;  %441 = vst [vmem:[#allocation2 + $0x129] sm:$0xff] %v5597_v50  ;;  %v5279_v52 = vld [vmem:[%s6195_s1 + $0x10] sm:$0xff]   ;;  %v5611_v54 = vld [vmem:[%s5440_s16 + $0xc8] sm:$0xff]  ;;  %442 = vst [vmem:[#allocation2 + $0x139] sm:$0xff] %v5608_v53  ;;  %v1649_v10 = vpack.c.bf16 %v5566_v40, %v5563_v39 }
  0x40   : > { %4715 = vmatprep.subr.bf16.mxu0 %v5269_v12  ;;  %v5615_v55 = vld [vmem:[%s5440_s16 + $0xd0] sm:$0xff]  ;;  %v5618_v56 = vld [vmem:[%s5440_s16 + $0xd8] sm:$0xff]  ;;  %443 = vst [vmem:[#allocation2 + $0x141] sm:$0xff] %v5611_v54  ;;  %v5631_v60 = vld [vmem:[%s5440_s16 + $0xe0] sm:$0xff]  ;;  %v1653_v18 = vpack.c.bf16 %v5611_v54, %v5608_v53 }
  0x41   : > { %444 = vst [vmem:[#allocation2 + $0x151] sm:$0xff] %v5615_v55  ;;  %445 = vst [vmem:[#allocation2 + $0x159] sm:$0xff] %v5618_v56  ;;  %v5280_v58 = vld [vmem:[%s6195_s1 + $0x158] sm:$0xff]   ;;  %v5634_v61 = vld [vmem:[%s5440_s16 + $0xe8] sm:$0xff]  ;;  %v1654_v19 = vpack.c.bf16 %v5618_v56, %v5615_v55 }
  0x42   : > { %4524 = vmatpush3.bf16.msra.mxu1 %v5268_v11  ;;  %v5637_v62 = vld [vmem:[%s5440_s16 + $0xf0] sm:$0xff]  ;;  %446 = vst [vmem:[#allocation2 + $0x169] sm:$0xff] %v5631_v60  ;;  %447 = vst [vmem:[#allocation2 + $0x171] sm:$0xff] %v5634_v61  ;;  %v5642_v63 = vld [vmem:[%s5440_s16 + $0xf8] sm:$0xff] }
  0x43   : > { %4716 = vmatpush3.bf16.msra.mxu0 %v5269_v12  ;;  %4525 = vmatprep.subr.bf16.mxu1 %v5270_v20  ;;  %448 = vst [vmem:[#allocation2 + $0x181] sm:$0xff] %v5637_v62  ;;  %v5281_v0 = vld [vmem:[%s6195_s1 + $0x18] sm:$0xff]   ;;  %449 = vst [vmem:[#allocation2 + $0x189] sm:$0xff] %v5642_v63  ;;  %v5282_v1 = vld [vmem:[%s6195_s1 + $0x160] sm:$0xff]   ;;  %v1656_v25 = vpack.c.bf16 %v5642_v63, %v5637_v62 }
  0x44   : > { %4717 = vmatprep.subr.bf16.mxu0 %v5271_v22  ;;  %v5283_v2 = vld [vmem:[%s6195_s1 + $0x20] sm:$0xff]   ;;  %v5284_v5 = vld [vmem:[%s6195_s1 + $0x168] sm:$0xff]   ;;  %v5286_v7 = vld [vmem:[%s6195_s1 + $0x170] sm:$0xff]  }
  0x45   : > { %v5285_v6 = vld [vmem:[%s6195_s1 + $0x28] sm:$0xff]   ;;  %v5287_v8 = vld [vmem:[%s6195_s1 + $0x30] sm:$0xff]   ;;  %v5288_v11 = vld [vmem:[%s6195_s1 + $0x178] sm:$0xff]  }
  0x46   : > { %4526 = vmatpush3.bf16.msra.mxu1 %v5270_v20  ;;  %v5289_v12 = vld [vmem:[%s6195_s1 + $0x38] sm:$0xff]   ;;  %v5290_v13 = vld [vmem:[%s6195_s1 + $0x180] sm:$0xff]   ;;  %v1655_v20 = vpack.c.bf16 %v5634_v61, %v5631_v60  ;;  %v1919_v34 = vld [vmem:[#allocation2 + $0x4a] sm:$0xff] }
  0x47   : > { %4718 = vmatpush3.bf16.msra.mxu0 %v5271_v22  ;;  %4527 = vmatprep.subr.bf16.mxu1 %v5272_v27  ;;  %v5291_v14 = vld [vmem:[%s6195_s1 + $0x80] sm:$0xff]   ;;  %v451_v22 = vld [vmem:[#allocation2 + $0x8] sm:$0xff]  ;;  %v452_v28 = vld [vmem:[#allocation2 + $0x18] sm:$0xff] }
  0x48   : > { %4719 = vmatprep.subr.bf16.mxu0 %v5273_v32  ;;  %v1915_v23 = vld [vmem:[#allocation2 + $0x1a] sm:$0xff]  ;;  %v1916_v24 = vld [vmem:[#allocation2 + $0x22] sm:$0xff]  ;;  %v1917_v30 = vld [vmem:[#allocation2 + $0x32] sm:$0xff] }
  0x49   : > { %v453_v29 = vld [vmem:[#allocation2 + $0x20] sm:$0xff]  ;;  %v455_v33 = vld [vmem:[#allocation2 + $0x38] sm:$0xff]  ;;  %v456_v40 = vld [vmem:[#allocation2 + $0x48] sm:$0xff] }
  0x4a   : > { %4528 = vmatpush3.bf16.msra.mxu1 %v5272_v27  ;;  %v5701_v27 = vpack.c.bf16 %v1916_v24, %v1915_v23  ;;  %v1918_v31 = vld [vmem:[#allocation2 + $0x3a] sm:$0xff]  ;;  %v5704_v35 = vpack.c.bf16 %v453_v29, %v452_v28  ;;  %v1920_v36 = vld [vmem:[#allocation2 + $0x52] sm:$0xff]  ;;  %v1921_v43 = vld [vmem:[#allocation2 + $0x62] sm:$0xff] }
  0x4b   : > { %4720 = vmatpush3.bf16.msra.mxu0 %v5273_v32  ;;  %4561 = vmatprep.subr.bf16.mxu1 %v5275_v37  ;;  %v454_v32 = vld [vmem:[#allocation2 + $0x30] sm:$0xff]  ;;  %v5710_v39 = vpack.c.bf16 %v1920_v36, %v1919_v34  ;;  %v459_v47 = vld [vmem:[#allocation2 + $0x68] sm:$0xff]  ;;  %v1923_v48 = vld [vmem:[#allocation2 + $0x7a] sm:$0xff] }
  0x4c   : > { %4753 = vmatprep.subr.bf16.mxu0 %v5274_v38  ;;  %v457_v41 = vld [vmem:[#allocation2 + $0x50] sm:$0xff]  ;;  %v1924_v49 = vld [vmem:[#allocation2 + $0x82] sm:$0xff]  ;;  %v5296_v56 = vld [vmem:[%s6195_s1 + $0x198] sm:$0xff]  }
  0x4d   : > { %4530 = vmatmul.mubr.bf16.vlgmr.msra.gmra.mrb[0].mxu1 %v5502_v21  ;;  %v450_v21 = vld [vmem:[#allocation2] sm:$0xff]  ;;  %v5295_v50 = vld [vmem:[%s6195_s1 + $0x90] sm:$0xff]   ;;  %v5734_v55 = vpack.c.bf16 %v1924_v49, %v1923_v48  ;;  %v463_v63 = vld [vmem:[#allocation2 + $0x98] sm:$0xff] }
  0x4e   : > { %4722 = vmatmul.mubr.bf16.vlgmr.msra.gmra.mrb[0].mxu0 %v1642_v42  ;;  %4562 = vmatpush3.bf16.msra.mxu1 %v5275_v37  ;;  %v482_v26 = vpack.c.bf16 %v451_v22, %v450_v21  ;;  %v5706_v37 = vpack.c.bf16 %v1918_v31, %v1917_v30  ;;  %v1925_v60 = vld [vmem:[#allocation2 + $0x92] sm:$0xff]  ;;  %v1926_v61 = vld [vmem:[#allocation2 + $0x9a] sm:$0xff]  ;;  %v1938_v48 = vld [vmem:[#allocation2 + $0x12a] sm:$0xff] }
  0x4f   : > { %4754 = vmatpush3.bf16.msra.mxu0 %v5274_v38  ;;  %4533 = vmatprep.mubr.bf16.mxu1 %v1642_v42  ;;  %v5708_v38 = vpack.c.bf16 %v455_v33, %v454_v32  ;;  %v5292_v42 = vld [vmem:[%s6195_s1 + $0x188] sm:$0xff]   ;;  %v462_v62 = vld [vmem:[#allocation2 + $0x90] sm:$0xff]  ;;  %v5304_v24 = vld [vmem:[%s6195_s1 + $0x1b8] sm:$0xff]  }
  0x50   : > { %4725 = vmatprep.mubr.bf16.mxu0 %v1643_v45  ;;  %4755 = vmatprep.subr.bf16.mxu0 %v5276_v44  ;;  %v469_v28 = vld [vmem:[#allocation2 + $0xe0] sm:$0xff]  ;;  %v1933_v29 = vld [vmem:[#allocation2 + $0xf2] sm:$0xff]  ;;  %v1935_v33 = vld [vmem:[#allocation2 + $0x10a] sm:$0xff] }
  0x51   : > { %4563 = vmatprep.subr.bf16.mxu1 %v5277_v46  ;;  %v1934_v30 = vld [vmem:[#allocation2 + $0xfa] sm:$0xff]  ;;  %v470_v31 = vld [vmem:[#allocation2 + $0xf0] sm:$0xff] }
  0x52   : > { %4564 = vmatpush3.bf16.msra.mxu1 %v5277_v46  ;;  %v458_v46 = vld [vmem:[#allocation2 + $0x60] sm:$0xff]  ;;  %v471_v32 = vld [vmem:[#allocation2 + $0xf8] sm:$0xff] }
  0x53   : > { %4756 = vmatpush3.bf16.msra.mxu0 %v5276_v44  ;;  %4565 = vmatprep.subr.bf16.mxu1 %v5279_v52  ;;  %v1922_v44 = vld [vmem:[#allocation2 + $0x6a] sm:$0xff]  ;;  %v5732_v54 = vpack.c.bf16 %v459_v47, %v458_v46  ;;  %v1936_v34 = vld [vmem:[#allocation2 + $0x112] sm:$0xff]  ;;  %v5797_v36 = vld [vmem:[%s6195_s1 + $0x1c0] sm:$0xff]  }
  0x54   : > { %4757 = vmatprep.subr.bf16.mxu0 %v5278_v51  ;;  %v5730_v53 = vpack.c.bf16 %v1922_v44, %v1921_v43  ;;  %v5806_v43 = vpack.c.bf16 %v471_v32, %v470_v31  ;;  %v5808_v44 = vpack.c.bf16 %v1936_v34, %v1935_v33  ;;  %v473_v46 = vld [vmem:[#allocation2 + $0x110] sm:$0xff]  ;;  %v1937_v47 = vld [vmem:[#allocation2 + $0x122] sm:$0xff]  ;;  %v5321_v34 = vld [vmem:[%s6195_s1 + $0xf8] sm:$0xff]  }
  0x55   : > { %4534 = vmatmul.mubr.bf16.gmra.mrb[4].mxu1 %v1643_v45  ;;  %v5293_v45 = vld [vmem:[%s6195_s1 + $0x88] sm:$0xff]   ;;  %v474_v49 = vld [vmem:[#allocation2 + $0x120] sm:$0xff]  ;;  %v5318_v33 = vld [vmem:[%s6195_s1 + $0x1f0] sm:$0xff]  }
  0x56   : > { %4726 = vmatmul.mubr.bf16.gmra.mrb[4].mxu0 %v1644_v57  ;;  %4537 = vmatprep.mubr.bf16.mxu1 %v1644_v57  ;;  %v5297_v57 = vld [vmem:[%s6195_s1 + $0x98] sm:$0xff]   ;;  %v5314_v31 = vld [vmem:[%s6195_s1 + $0x1e0] sm:$0xff]   ;;  %v5317_v32 = vld [vmem:[%s6195_s1 + $0xe8] sm:$0xff]  }
  0x57   : > { %4729 = vmatprep.mubr.bf16.mxu0 %v1645_v59  ;;  %4758 = vmatpush3.bf16.msra.mxu0 %v5278_v51  ;;  %v5294_v51 = vld [vmem:[%s6195_s1 + $0x190] sm:$0xff]  }
  0x58   : > { %4566 = vmatpush3.bf16.msra.mxu1 %v5279_v52  ;;  %4759 = vmatprep.subr.bf16.mxu0 %v5280_v58  ;;  %v5728_v52 = vpack.c.bf16 %v457_v41, %v456_v40  ;;  %v5307_v41 = vld [vmem:[%s6195_s1 + $0xc0] sm:$0xff]  }
  0x59   : > { %4567 = vmatprep.subr.bf16.mxu1 %v5281_v0 }
  0x5b   : > { %4760 = vmatpush3.bf16.msra.mxu0 %v5280_v58  ;;  %v460_v58 = vld [vmem:[#allocation2 + $0x78] sm:$0xff] }
  0x5c   : > { %4568 = vmatpush3.bf16.msra.mxu1 %v5281_v0  ;;  %4761 = vmatprep.subr.bf16.mxu0 %v5282_v1  ;;  %v1927_v0 = vld [vmem:[#allocation2 + $0xaa] sm:$0xff] }
  0x5d   : > { %4538 = vmatmul.mubr.bf16.gmra.mrb[8].mxu1 %v1645_v59  ;;  %4569 = vmatprep.subr.bf16.mxu1 %v5283_v2  ;;  %v461_v59 = vld [vmem:[#allocation2 + $0x80] sm:$0xff] }
  0x5e   : > { %4730 = vmatmul.mubr.bf16.gmra.mrb[8].mxu0 %v1646_v3  ;;  %4541 = vmatprep.mubr.bf16.mxu1 %v1646_v3  ;;  %v5299_v3 = vld [vmem:[%s6195_s1 + $0xa0] sm:$0xff]  }
  0x5f   : > { %4733 = vmatprep.mubr.bf16.mxu0 %v1647_v4  ;;  %4762 = vmatpush3.bf16.msra.mxu0 %v5282_v1  ;;  %v1928_v1 = vld [vmem:[#allocation2 + $0xb2] sm:$0xff] }
  0x60   : > { %4570 = vmatpush3.bf16.msra.mxu1 %v5283_v2  ;;  %4763 = vmatprep.subr.bf16.mxu0 %v5284_v5  ;;  %v5298_v2 = vld [vmem:[%s6195_s1 + $0x1a0] sm:$0xff]  }
  0x61   : > { %4571 = vmatprep.subr.bf16.mxu1 %v5285_v6 }
  0x63   : > { %4764 = vmatpush3.bf16.msra.mxu0 %v5284_v5  ;;  %v5754_v5 = vpack.c.bf16 %v1926_v61, %v1925_v60  ;;  %v476_v61 = vld [vmem:[#allocation2 + $0x138] sm:$0xff] }
  0x64   : > { %4572 = vmatpush3.bf16.msra.mxu1 %v5285_v6  ;;  %4765 = vmatprep.subr.bf16.mxu0 %v5286_v7  ;;  %v5756_v6 = vpack.c.bf16 %v463_v63, %v462_v62  ;;  %v477_v62 = vld [vmem:[#allocation2 + $0x140] sm:$0xff]  ;;  %v1941_v63 = vld [vmem:[#allocation2 + $0x152] sm:$0xff] }
  0x65   : > { %4542 = vmatmul.mubr.bf16.gmra.mrb[12].mxu1 %v1647_v4  ;;  %4573 = vmatprep.subr.bf16.mxu1 %v5287_v8  ;;  %v5752_v4 = vpack.c.bf16 %v461_v59, %v460_v58  ;;  %v5817_v58 = vpack.c.bf16 %v1938_v48, %v1937_v47 }
  0x66   : > { %4734 = vmatmul.mubr.bf16.gmra.mrb[12].mxu0 %v1648_v9  ;;  %4545 = vmatprep.mubr.bf16.mxu1 %v1648_v9  ;;  %v5301_v9 = vld [vmem:[%s6195_s1 + $0xa8] sm:$0xff]  }
  0x67   : > { %4737 = vmatprep.mubr.bf16.mxu0 %v1649_v10  ;;  %4766 = vmatpush3.bf16.msra.mxu0 %v5286_v7  ;;  %v5758_v7 = vpack.c.bf16 %v1928_v1, %v1927_v0  ;;  %v1942_v0 = vld [vmem:[#allocation2 + $0x15a] sm:$0xff]  ;;  %v478_v1 = vld [vmem:[#allocation2 + $0x150] sm:$0xff] }
  0x68   : > { %4574 = vmatpush3.bf16.msra.mxu1 %v5287_v8  ;;  %4767 = vmatprep.subr.bf16.mxu0 %v5288_v11  ;;  %v5300_v8 = vld [vmem:[%s6195_s1 + $0x1a8] sm:$0xff]  }
  0x69   : > { %4575 = vmatprep.subr.bf16.mxu1 %v5289_v12 }
  0x6b   : > { %4768 = vmatpush3.bf16.msra.mxu0 %v5288_v11  ;;  %v465_v11 = vld [vmem:[#allocation2 + $0xb0] sm:$0xff] }
  0x6c   : > { %4576 = vmatpush3.bf16.msra.mxu1 %v5289_v12  ;;  %4801 = vmatprep.subr.bf16.mxu0 %v5290_v13  ;;  %v1929_v12 = vld [vmem:[#allocation2 + $0xc2] sm:$0xff] }
  0x6d   : > { %4546 = vmatmul.mubr.bf16.gmra.mrb[16].mxu1 %v1649_v10  ;;  %4609 = vmatprep.subr.bf16.mxu1 %v5291_v14  ;;  %v464_v10 = vld [vmem:[#allocation2 + $0xa8] sm:$0xff] }
  0x6e   : > { %4738 = vmatmul.mubr.bf16.gmra.mrb[16].mxu0 %v1650_v15  ;;  %4549 = vmatprep.mubr.bf16.mxu1 %v1650_v15  ;;  %v467_v15 = vld [vmem:[#allocation2 + $0xc8] sm:$0xff] }
  0x6f   : > { %4741 = vmatprep.mubr.bf16.mxu0 %v1651_v16 }
  0x75   : > { %4550 = vmatmul.mubr.bf16.gmra.mrb[20].mxu1 %v1651_v16  ;;  %v1931_v16 = vld [vmem:[#allocation2 + $0xda] sm:$0xff] }
  0x76   : > { %4742 = vmatmul.mubr.bf16.gmra.mrb[20].mxu0 %v1652_v17  ;;  %4553 = vmatprep.mubr.bf16.mxu1 %v1652_v17  ;;  %v1932_v17 = vld [vmem:[#allocation2 + $0xe2] sm:$0xff] }
  0x77   : > { %4745 = vmatprep.mubr.bf16.mxu0 %v1653_v18  ;;  %v5782_v23 = vpack.c.bf16 %v1932_v17, %v1931_v16  ;;  %v1946_v16 = vld [vmem:[#allocation2 + $0x18a] sm:$0xff]  ;;  %v997_v17 = vld [vmem:[#allocation2 + $0x2] sm:$0xff] }
  0x7d   : > { %4554 = vmatmul.mubr.bf16.gmra.mrb[24].mxu1 %v1653_v18  ;;  %v5302_v18 = vld [vmem:[%s6195_s1 + $0x1b0] sm:$0xff]  }
  0x7e   : > { %4746 = vmatmul.mubr.bf16.gmra.mrb[24].mxu0 %v1654_v19  ;;  %4557 = vmatprep.mubr.bf16.mxu1 %v1654_v19  ;;  %v5773_v19 = vpack.c.bf16 %v465_v11, %v464_v10  ;;  %v5829_v10 = vpack.c.bf16 %v1942_v0, %v1941_v63  ;;  %v2535_v63 = vld [vmem:[#allocation2 + $0x81] sm:$0xff]  ;;  %v5327_v0 = vld [vmem:[%s6197_s3 + $0x10] sm:$0xff]  }
  0x7f   : > { %4749 = vmatprep.mubr.bf16.mxu0 %v1655_v20 }
  0x85   : > { %4558 = vmatmul.mubr.bf16.gmra.mrb[28].mxu1 %v1655_v20  ;;  %v5303_v20 = vld [vmem:[%s6195_s1 + $0xb0] sm:$0xff]  }
  0x86   : > { %4750 = vmatmul.mubr.bf16.gmra.mrb[28].mxu0 %v1656_v25  ;;  %4577 = vmatprep.mubr.bf16.mxu1 %v482_v26  ;;  %v5305_v25 = vld [vmem:[%s6195_s1 + $0xb8] sm:$0xff]  }
  0x87   : > { %4769 = vmatprep.mubr.bf16.mxu0 %v5701_v27  ;;  %v468_v26 = vld [vmem:[#allocation2 + $0xd8] sm:$0xff] }
  0x88   : > { %v5799_v40 = vpack.c.bf16 %v469_v28, %v468_v26  ;;  %v5308_v26 = vld [vmem:[%s6195_s1 + $0x1c8] sm:$0xff]  }
  0x89   : > { %v5309_v28 = vld [vmem:[%s6195_s1 + $0xc8] sm:$0xff]  }
  0x8d   : > { %4578 = vmatmul.mubr.bf16.vlgmr.msra.gmra.mrb[0].mxu1 %v5704_v35 }
  0x8e   : > { %4770 = vmatmul.mubr.bf16.vlgmr.msra.gmra.mrb[0].mxu0 %v5706_v37  ;;  %4610 = vmatpush3.bf16.msra.mxu1 %v5291_v14  ;;  %v466_v14 = vld [vmem:[#allocation2 + $0xc0] sm:$0xff] }
  0x8f   : > { %4802 = vmatpush3.bf16.msra.mxu0 %v5290_v13  ;;  %4581 = vmatprep.mubr.bf16.mxu1 %v5708_v38  ;;  %v1930_v13 = vld [vmem:[#allocation2 + $0xca] sm:$0xff]  ;;  %v5780_v22 = vpack.c.bf16 %v467_v15, %v466_v14  ;;  %v1945_v15 = vld [vmem:[#allocation2 + $0x182] sm:$0xff] }
  0x90   : > { %4773 = vmatprep.mubr.bf16.mxu0 %v5710_v39  ;;  %4803 = vmatprep.subr.bf16.mxu0 %v5292_v42  ;;  %v5778_v21 = vpack.c.bf16 %v1930_v13, %v1929_v12  ;;  %v480_v13 = vld [vmem:[#allocation2 + $0x168] sm:$0xff]  ;;  %v481_v14 = vld [vmem:[#allocation2 + $0x170] sm:$0xff] }
  0x91   : > { %4611 = vmatprep.subr.bf16.mxu1 %v5293_v45 }
  0x92   : > { %4612 = vmatpush3.bf16.msra.mxu1 %v5293_v45  ;;  %v472_v45 = vld [vmem:[#allocation2 + $0x108] sm:$0xff] }
  0x93   : > { %4804 = vmatpush3.bf16.msra.mxu0 %v5292_v42  ;;  %4613 = vmatprep.subr.bf16.mxu1 %v5295_v50  ;;  %v5804_v42 = vpack.c.bf16 %v1934_v30, %v1933_v29  ;;  %v5311_v29 = vld [vmem:[%s6195_s1 + $0xd0] sm:$0xff]   ;;  %v5313_v30 = vld [vmem:[%s6195_s1 + $0xd8] sm:$0xff]  }
  0x94   : > { %4805 = vmatprep.subr.bf16.mxu0 %v5294_v51 }
  0x95   : > { %4582 = vmatmul.mubr.bf16.gmra.mrb[4].mxu1 %v5728_v52 }
  0x96   : > { %4774 = vmatmul.mubr.bf16.gmra.mrb[4].mxu0 %v5730_v53  ;;  %4585 = vmatprep.mubr.bf16.mxu1 %v5732_v54 }
  0x97   : > { %4777 = vmatprep.mubr.bf16.mxu0 %v5734_v55  ;;  %4806 = vmatpush3.bf16.msra.mxu0 %v5294_v51  ;;  %v1939_v51 = vld [vmem:[#allocation2 + $0x13a] sm:$0xff] }
  0x98   : > { %4614 = vmatpush3.bf16.msra.mxu1 %v5295_v50  ;;  %4807 = vmatprep.subr.bf16.mxu0 %v5296_v56  ;;  %v475_v50 = vld [vmem:[#allocation2 + $0x128] sm:$0xff] }
  0x99   : > { %4615 = vmatprep.subr.bf16.mxu1 %v5297_v57  ;;  %v5819_v59 = vpack.c.bf16 %v475_v50, %v474_v49  ;;  %v2530_v49 = vld [vmem:[#allocation2 + $0x49] sm:$0xff]  ;;  %v2531_v50 = vld [vmem:[#allocation2 + $0x51] sm:$0xff] }
  0x9b   : > { %4808 = vmatpush3.bf16.msra.mxu0 %v5296_v56  ;;  %v1940_v56 = vld [vmem:[#allocation2 + $0x142] sm:$0xff] }
  0x9c   : > { %4616 = vmatpush3.bf16.msra.mxu1 %v5297_v57  ;;  %4809 = vmatprep.subr.bf16.mxu0 %v5298_v2  ;;  %v5815_v57 = vpack.c.bf16 %v473_v46, %v472_v45  ;;  %v5821_v60 = vpack.c.bf16 %v1940_v56, %v1939_v51  ;;  %v2529_v46 = vld [vmem:[#allocation2 + $0x39] sm:$0xff]  ;;  %v2532_v51 = vld [vmem:[#allocation2 + $0x61] sm:$0xff]  ;;  %v2533_v56 = vld [vmem:[#allocation2 + $0x69] sm:$0xff] }
  0x9d   : > { %4586 = vmatmul.mubr.bf16.gmra.mrb[8].mxu1 %v5752_v4  ;;  %4617 = vmatprep.subr.bf16.mxu1 %v5299_v3 }
  0x9e   : > { %4778 = vmatmul.mubr.bf16.gmra.mrb[8].mxu0 %v5754_v5  ;;  %4589 = vmatprep.mubr.bf16.mxu1 %v5756_v6 }
  0x9f   : > { %4781 = vmatprep.mubr.bf16.mxu0 %v5758_v7  ;;  %4810 = vmatpush3.bf16.msra.mxu0 %v5298_v2  ;;  %v479_v2 = vld [vmem:[#allocation2 + $0x158] sm:$0xff] }
  0xa0   : > { %4618 = vmatpush3.bf16.msra.mxu1 %v5299_v3  ;;  %4811 = vmatprep.subr.bf16.mxu0 %v5300_v8  ;;  %v1943_v3 = vld [vmem:[#allocation2 + $0x16a] sm:$0xff]  ;;  %v5831_v11 = vpack.c.bf16 %v479_v2, %v478_v1  ;;  %v2537_v2 = vld [vmem:[#allocation2 + $0x99] sm:$0xff] }
  0xa1   : > { %4619 = vmatprep.subr.bf16.mxu1 %v5301_v9  ;;  %v2536_v1 = vld [vmem:[#allocation2 + $0x91] sm:$0xff] }
  0xa3   : > { %4812 = vmatpush3.bf16.msra.mxu0 %v5300_v8  ;;  %v1944_v8 = vld [vmem:[#allocation2 + $0x172] sm:$0xff] }
  0xa4   : > { %4620 = vmatpush3.bf16.msra.mxu1 %v5301_v9  ;;  %4813 = vmatprep.subr.bf16.mxu0 %v5302_v18  ;;  %v5827_v9 = vpack.c.bf16 %v477_v62, %v476_v61  ;;  %v5833_v12 = vpack.c.bf16 %v1944_v8, %v1943_v3  ;;  %v5324_v61 = vld [vmem:[%s6195_s1 + $0x208] sm:$0xff]   ;;  %v2564_v8 = vpack.c.bf16 %v2537_v2, %v2536_v1  ;;  %v5343_v1 = vld [vmem:[#allocation2 + $0x51] sm:$0xff] }
  0xa5   : > { %4590 = vmatmul.mubr.bf16.gmra.mrb[12].mxu1 %v5773_v19  ;;  %4621 = vmatprep.subr.bf16.mxu1 %v5303_v20  ;;  %v5325_v62 = vld [vmem:[%s6197_s3 + $0x8] sm:$0xff]  }
  0xa6   : > { %4782 = vmatmul.mubr.bf16.gmra.mrb[12].mxu0 %v5778_v21  ;;  %4593 = vmatprep.mubr.bf16.mxu1 %v5780_v22 }
  0xa7   : > { %4785 = vmatprep.mubr.bf16.mxu0 %v5782_v23  ;;  %4814 = vmatpush3.bf16.msra.mxu0 %v5302_v18  ;;  %v998_v18 = vld [vmem:[#allocation2 + $0xa] sm:$0xff] }
  0xa8   : > { %4622 = vmatpush3.bf16.msra.mxu1 %v5303_v20  ;;  %4815 = vmatprep.subr.bf16.mxu0 %v5304_v24  ;;  %v5839_v20 = vpack.c.bf16 %v481_v14, %v480_v13  ;;  %v2539_v13 = vld [vmem:[#allocation2 + $0xb1] sm:$0xff]  ;;  %v2540_v14 = vld [vmem:[#allocation2 + $0xc1] sm:$0xff] }
  0xa9   : > { %4623 = vmatprep.subr.bf16.mxu1 %v5305_v25 }
  0xab   : > { %4816 = vmatpush3.bf16.msra.mxu0 %v5304_v24  ;;  %v1962_v24 = vpack.c.bf16 %v1946_v16, %v1945_v15  ;;  %v2541_v15 = vld [vmem:[#allocation2 + $0xc9] sm:$0xff]  ;;  %v5330_v16 = vld [vmem:[%s6195_s1 + $0x220] sm:$0xff]  }
  0xac   : > { %4624 = vmatpush3.bf16.msra.mxu1 %v5305_v25  ;;  %4849 = vmatprep.subr.bf16.mxu0 %v5797_v36  ;;  %v1029_v25 = vpack.c.bf16 %v998_v18, %v997_v17  ;;  %v2566_v18 = vpack.c.bf16 %v2541_v15, %v2540_v14  ;;  %v5346_v15 = vld [vmem:[#allocation2 + $0x79] sm:$0xff] }
  0xad   : > { %4594 = vmatmul.mubr.bf16.gmra.mrb[16].mxu1 %v5799_v40  ;;  %4657 = vmatprep.subr.bf16.mxu1 %v5307_v41 }
  0xae   : > { %4786 = vmatmul.mubr.bf16.gmra.mrb[16].mxu0 %v5804_v42  ;;  %4597 = vmatprep.mubr.bf16.mxu1 %v5806_v43 }
  0xaf   : > { %4789 = vmatprep.mubr.bf16.mxu0 %v5808_v44 }
  0xb5   : > { %4598 = vmatmul.mubr.bf16.gmra.mrb[20].mxu1 %v5815_v57 }
  0xb6   : > { %4790 = vmatmul.mubr.bf16.gmra.mrb[20].mxu0 %v5817_v58  ;;  %4601 = vmatprep.mubr.bf16.mxu1 %v5819_v59 }
  0xb7   : > { %4793 = vmatprep.mubr.bf16.mxu0 %v5821_v60 }
  0xbd   : > { %4602 = vmatmul.mubr.bf16.gmra.mrb[24].mxu1 %v5827_v9 }
  0xbe   : > { %4794 = vmatmul.mubr.bf16.gmra.mrb[24].mxu0 %v5829_v10  ;;  %4605 = vmatprep.mubr.bf16.mxu1 %v5831_v11 }
  0xbf   : > { %4797 = vmatprep.mubr.bf16.mxu0 %v5833_v12 }
  0xc5   : > { %4606 = vmatmul.mubr.bf16.gmra.mrb[28].mxu1 %v5839_v20 }
  0xc6   : > { %4798 = vmatmul.mubr.bf16.gmra.mrb[28].mxu0 %v1962_v24  ;;  %4625 = vmatprep.mubr.bf16.mxu1 %v1029_v25  ;;  %v5333_v24 = vld [vmem:[%s6197_s3 + $0x28] sm:$0xff]   ;;  %v2542_v25 = vld [vmem:[#allocation2 + $0xd9] sm:$0xff] }
  0xc7   : > { %4817 = vmatprep.mubr.bf16.mxu0 %v5708_v38 }
  0xcd   : > { %4626 = vmatmul.mubr.bf16.vlgmr.msra.gmra.mrb[0].mxu1 %v5701_v27  ;;  %v5310_v27 = vld [vmem:[%s6195_s1 + $0x1d0] sm:$0xff]  }
  0xce   : > { %4818 = vmatmul.mubr.bf16.vlgmr.msra.gmra.mrb[0].mxu0 %v5728_v52  ;;  %4658 = vmatpush3.bf16.msra.mxu1 %v5307_v41  ;;  %v2251_v41 = vld [vmem:[#allocation2 + $0x188] sm:$0xff] }
  0xcf   : > { %4850 = vmatpush3.bf16.msra.mxu0 %v5797_v36  ;;  %4629 = vmatprep.mubr.bf16.mxu1 %v5706_v37  ;;  %v5312_v37 = vld [vmem:[%s6195_s1 + $0x1d8] sm:$0xff]   ;;  %v5322_v36 = vld [vmem:[%s6195_s1 + $0x200] sm:$0xff]  }
  0xd0   : > { %4821 = vmatprep.mubr.bf16.mxu0 %v5732_v54  ;;  %4851 = vmatprep.subr.bf16.mxu0 %v5308_v26 }
  0xd1   : > { %4659 = vmatprep.subr.bf16.mxu1 %v5309_v28 }
  0xd2   : > { %4660 = vmatpush3.bf16.msra.mxu1 %v5309_v28  ;;  %v2544_v28 = vld [vmem:[#allocation2 + $0xf1] sm:$0xff] }
  0xd3   : > { %4852 = vmatpush3.bf16.msra.mxu0 %v5308_v26  ;;  %4661 = vmatprep.subr.bf16.mxu1 %v5311_v29  ;;  %v2543_v26 = vld [vmem:[#allocation2 + $0xe1] sm:$0xff] }
  0xd4   : > { %4853 = vmatprep.subr.bf16.mxu0 %v5310_v27 }
  0xd5   : > { %4630 = vmatmul.mubr.bf16.gmra.mrb[4].mxu1 %v5710_v39  ;;  %v5315_v39 = vld [vmem:[%s6195_s1 + $0xe0] sm:$0xff]  }
  0xd6   : > { %4822 = vmatmul.mubr.bf16.gmra.mrb[4].mxu0 %v5752_v4  ;;  %4633 = vmatprep.mubr.bf16.mxu1 %v5730_v53  ;;  %v5316_v53 = vld [vmem:[%s6195_s1 + $0x1e8] sm:$0xff]  }
  0xd7   : > { %4825 = vmatprep.mubr.bf16.mxu0 %v5756_v6  ;;  %4854 = vmatpush3.bf16.msra.mxu0 %v5310_v27  ;;  %v5335_v27 = vld [vmem:[%s6197_s3 + $0x30] sm:$0xff]  }
  0xd8   : > { %4662 = vmatpush3.bf16.msra.mxu1 %v5311_v29  ;;  %4855 = vmatprep.subr.bf16.mxu0 %v5312_v37  ;;  %v2545_v29 = vld [vmem:[#allocation2 + $0xf9] sm:$0xff] }
  0xd9   : > { %4663 = vmatprep.subr.bf16.mxu1 %v5313_v30 }
  0xdb   : > { %4856 = vmatpush3.bf16.msra.mxu0 %v5312_v37  ;;  %v2567_v37 = vpack.c.bf16 %v2543_v26, %v2542_v25  ;;  %v2847_v25 = vld [vmem:[#allocation2 + $0xca] sm:$0xff] }
  0xdc   : > { %4664 = vmatpush3.bf16.msra.mxu1 %v5313_v30  ;;  %4857 = vmatprep.subr.bf16.mxu0 %v5314_v31  ;;  %v2568_v30 = vpack.c.bf16 %v2545_v29, %v2544_v28  ;;  %v5348_v26 = vld [vmem:[#allocation2 + $0x91] sm:$0xff]  ;;  %v5349_v28 = vld [vmem:[#allocation2 + $0x99] sm:$0xff] }
  0xdd   : > { %4634 = vmatmul.mubr.bf16.gmra.mrb[8].mxu1 %v5734_v55  ;;  %4665 = vmatprep.subr.bf16.mxu1 %v5315_v39  ;;  %v5319_v55 = vld [vmem:[%s6195_s1 + $0xf0] sm:$0xff]   ;;  %v3456_v29 = vpack.c.bf16 %v5349_v28, %v5348_v26 }
  0xde   : > { %4826 = vmatmul.mubr.bf16.gmra.mrb[8].mxu0 %v5773_v19  ;;  %4637 = vmatprep.mubr.bf16.mxu1 %v5754_v5  ;;  %v5320_v5 = vld [vmem:[%s6195_s1 + $0x1f8] sm:$0xff]  }
  0xdf   : > { %4829 = vmatprep.mubr.bf16.mxu0 %v5780_v22  ;;  %4858 = vmatpush3.bf16.msra.mxu0 %v5314_v31  ;;  %v5337_v31 = vld [vmem:[%s6197_s3 + $0x38] sm:$0xff]  }
  0xe0   : > { %4666 = vmatpush3.bf16.msra.mxu1 %v5315_v39  ;;  %4859 = vmatprep.subr.bf16.mxu0 %v5316_v53  ;;  %v2546_v39 = vld [vmem:[#allocation2 + $0x109] sm:$0xff] }
  0xe1   : > { %4667 = vmatprep.subr.bf16.mxu1 %v5317_v32 }
  0xe3   : > { %4860 = vmatpush3.bf16.msra.mxu0 %v5316_v53  ;;  %v2547_v53 = vld [vmem:[#allocation2 + $0x111] sm:$0xff] }
  0xe4   : > { %4668 = vmatpush3.bf16.msra.mxu1 %v5317_v32  ;;  %4861 = vmatprep.subr.bf16.mxu0 %v5318_v33  ;;  %v2548_v32 = vld [vmem:[#allocation2 + $0x121] sm:$0xff] }
  0xe5   : > { %4638 = vmatmul.mubr.bf16.gmra.mrb[12].mxu1 %v5758_v7  ;;  %4669 = vmatprep.subr.bf16.mxu1 %v5319_v55  ;;  %v5323_v7 = vld [vmem:[%s6197_s3] sm:$0xff]  }
  0xe6   : > { %4830 = vmatmul.mubr.bf16.gmra.mrb[12].mxu0 %v5799_v40  ;;  %4641 = vmatprep.mubr.bf16.mxu1 %v5778_v21  ;;  %v2250_v21 = vld [vmem:[#allocation2 + $0x180] sm:$0xff] }
  0xe7   : > { %4833 = vmatprep.mubr.bf16.mxu0 %v5806_v43  ;;  %4862 = vmatpush3.bf16.msra.mxu0 %v5318_v33  ;;  %v5916_v45 = vpack.c.bf16 %v2251_v41, %v2250_v21  ;;  %v2549_v33 = vld [vmem:[#allocation2 + $0x129] sm:$0xff] }
  0xe8   : > { %4670 = vmatpush3.bf16.msra.mxu1 %v5319_v55  ;;  %4863 = vmatprep.subr.bf16.mxu0 %v5320_v5  ;;  %v2569_v55 = vpack.c.bf16 %v2547_v53, %v2546_v39  ;;  %v2554_v41 = vld [vmem:[#allocation2 + $0x169] sm:$0xff]  ;;  %v2850_v53 = vld [vmem:[#allocation2 + $0xf2] sm:$0xff] }
  0xe9   : > { %4671 = vmatprep.subr.bf16.mxu1 %v5321_v34  ;;  %v2849_v39 = vld [vmem:[#allocation2 + $0xe2] sm:$0xff] }
  0xeb   : > { %4864 = vmatpush3.bf16.msra.mxu0 %v5320_v5  ;;  %v2570_v5 = vpack.c.bf16 %v2549_v33, %v2548_v32  ;;  %v2851_v32 = vld [vmem:[#allocation2 + $0xfa] sm:$0xff] }
  0xec   : > { %4672 = vmatpush3.bf16.msra.mxu1 %v5321_v34  ;;  %4897 = vmatprep.subr.bf16.mxu0 %v5322_v36  ;;  %v2552_v34 = vld [vmem:[#allocation2 + $0x151] sm:$0xff]  ;;  %v5352_v33 = vld [vmem:[#allocation2 + $0xc1] sm:$0xff] }
  0xed   : > { %4642 = vmatmul.mubr.bf16.gmra.mrb[16].mxu1 %v5782_v23  ;;  %4945 = vmatprep.subr.bf16.mxu1 %v5323_v7  ;;  %v2252_v23 = vld [vmem:[#allocation2 + $0x198] sm:$0xff] }
  0xee   : > { %4834 = vmatmul.mubr.bf16.gmra.mrb[16].mxu0 %v5815_v57  ;;  %4645 = vmatprep.mubr.bf16.mxu1 %v5804_v42  ;;  %v2253_v42 = vld [vmem:[#allocation2 + $0x1a0] sm:$0xff] }
  0xef   : > { %4837 = vmatprep.mubr.bf16.mxu0 %v5819_v59  ;;  %v2269_v47 = vpack.c.bf16 %v2253_v42, %v2252_v23  ;;  %v2555_v23 = vld [vmem:[#allocation2 + $0x171] sm:$0xff]  ;;  %v2556_v42 = vld [vmem:[#allocation2 + $0x181] sm:$0xff] }
  0xf5   : > { %4646 = vmatmul.mubr.bf16.gmra.mrb[20].mxu1 %v5808_v44  ;;  %v2528_v44 = vld [vmem:[#allocation2 + $0x31] sm:$0xff] }
  0xf6   : > { %4838 = vmatmul.mubr.bf16.gmra.mrb[20].mxu0 %v5827_v9  ;;  %4649 = vmatprep.mubr.bf16.mxu1 %v5817_v58  ;;  %v2560_v48 = vpack.c.bf16 %v2529_v46, %v2528_v44  ;;  %v2561_v58 = vpack.c.bf16 %v2531_v50, %v2530_v49  ;;  %v2573_v44 = vpack.c.bf16 %v2555_v23, %v2554_v41  ;;  %v5338_v50 = vld [vmem:[#allocation2 + $0x19] sm:$0xff]  ;;  %v2854_v23 = vld [vmem:[#allocation2 + $0x122] sm:$0xff] }
  0xf7   : > { %4841 = vmatprep.mubr.bf16.mxu0 %v5831_v11  ;;  %v2853_v41 = vld [vmem:[#allocation2 + $0x112] sm:$0xff] }
  0xfd   : > { %4650 = vmatmul.mubr.bf16.gmra.mrb[24].mxu1 %v5821_v60  ;;  %v2562_v60 = vpack.c.bf16 %v2533_v56, %v2532_v51 }
  0xfe   : > { %4842 = vmatmul.mubr.bf16.gmra.mrb[24].mxu0 %v5839_v20  ;;  %4653 = vmatprep.mubr.bf16.mxu1 %v5829_v10  ;;  %v5329_v10 = vld [vmem:[%s6197_s3 + $0x18] sm:$0xff]  }
  0xff   : > { %4845 = vmatprep.mubr.bf16.mxu0 %v5916_v45 }
 0x105   : > { %4654 = vmatmul.mubr.bf16.gmra.mrb[28].mxu1 %v5833_v12  ;;  %v2538_v12 = vld [vmem:[#allocation2 + $0xa9] sm:$0xff] }
 0x106   : > { %4846 = vmatmul.mubr.bf16.gmra.mrb[28].mxu0 %v2269_v47  ;;  %4673 = vmatprep.mubr.bf16.mxu1 %v5704_v35  ;;  %v2534_v35 = vld [vmem:[#allocation2 + $0x79] sm:$0xff]  ;;  %v2565_v17 = vpack.c.bf16 %v2539_v13, %v2538_v12  ;;  %v2559_v47 = vld [vmem:[#allocation2 + $0x1a1] sm:$0xff]  ;;  %v5345_v12 = vld [vmem:[#allocation2 + $0x69] sm:$0xff] }
 0x107   : > { %4865 = vmatprep.mubr.bf16.mxu0 %v2560_v48  ;;  %v2563_v3 = vpack.c.bf16 %v2535_v63, %v2534_v35  ;;  %v2834_v48 = vld [vmem:[#allocation2 + $0x32] sm:$0xff] }
 0x10d   : > { %4674 = vmatmul.mubr.bf16.vlgmr.msra.gmra.mrb[0].mxu1 %v5708_v38  ;;  %v5326_v38 = vld [vmem:[%s6195_s1 + $0x210] sm:$0xff]  }
 0x10e   : > { %4866 = vmatmul.mubr.bf16.vlgmr.msra.gmra.mrb[0].mxu0 %v2561_v58  ;;  %4946 = vmatpush3.bf16.msra.mxu1 %v5323_v7  ;;  %v2836_v58 = vld [vmem:[#allocation2 + $0x4a] sm:$0xff] }
 0x10f   : > { %4898 = vmatpush3.bf16.msra.mxu0 %v5322_v36  ;;  %4677 = vmatprep.mubr.bf16.mxu1 %v5728_v52  ;;  %v5328_v52 = vld [vmem:[%s6195_s1 + $0x218] sm:$0xff]  }
 0x110   : > { %4869 = vmatprep.mubr.bf16.mxu0 %v2562_v60  ;;  %4899 = vmatprep.subr.bf16.mxu0 %v5324_v61  ;;  %v2553_v36 = vld [vmem:[#allocation2 + $0x159] sm:$0xff]  ;;  %v2838_v60 = vld [vmem:[#allocation2 + $0x62] sm:$0xff] }
 0x111   : > { %4947 = vmatprep.subr.bf16.mxu1 %v5325_v62  ;;  %v2572_v21 = vpack.c.bf16 %v2553_v36, %v2552_v34  ;;  %v5355_v34 = vld [vmem:[#allocation2 + $0xe1] sm:$0xff] }
 0x112   : > { %4948 = vmatpush3.bf16.msra.mxu1 %v5325_v62  ;;  %v5341_v62 = vld [vmem:[#allocation2 + $0x39] sm:$0xff] }
 0x113   : > { %4900 = vmatpush3.bf16.msra.mxu0 %v5324_v61  ;;  %4949 = vmatprep.subr.bf16.mxu1 %v5327_v0  ;;  %v2839_v61 = vld [vmem:[#allocation2 + $0x6a] sm:$0xff] }
 0x114   : > { %4901 = vmatprep.subr.bf16.mxu0 %v5326_v38 }
 0x115   : > { %4678 = vmatmul.mubr.bf16.gmra.mrb[4].mxu1 %v5732_v54  ;;  %v5331_v54 = vld [vmem:[%s6197_s3 + $0x20] sm:$0xff]  }
 0x116   : > { %4870 = vmatmul.mubr.bf16.gmra.mrb[4].mxu0 %v2563_v3  ;;  %4681 = vmatprep.mubr.bf16.mxu1 %v5752_v4  ;;  %v5332_v4 = vld [vmem:[%s6195_s1 + $0x228] sm:$0xff]  }
 0x117   : > { %4873 = vmatprep.mubr.bf16.mxu0 %v2564_v8  ;;  %4902 = vmatpush3.bf16.msra.mxu0 %v5326_v38  ;;  %v2868_v38 = vpack.c.bf16 %v2839_v61, %v2838_v60  ;;  %v2841_v3 = vld [vmem:[#allocation2 + $0x82] sm:$0xff]  ;;  %v2842_v8 = vld [vmem:[#allocation2 + $0x92] sm:$0xff] }
 0x118   : > { %4950 = vmatpush3.bf16.msra.mxu1 %v5327_v0  ;;  %4903 = vmatprep.subr.bf16.mxu0 %v5328_v52  ;;  %v5342_v0 = vld [vmem:[#allocation2 + $0x49] sm:$0xff] }
 0x119   : > { %4951 = vmatprep.subr.bf16.mxu1 %v5329_v10  ;;  %v3453_v2 = vpack.c.bf16 %v5343_v1, %v5342_v0  ;;  %v2860_v0 = vld [vmem:[#allocation2 + $0x16a] sm:$0xff]  ;;  %v2861_v1 = vld [vmem:[#allocation2 + $0x172] sm:$0xff] }
 0x11b   : > { %4904 = vmatpush3.bf16.msra.mxu0 %v5328_v52  ;;  %v2843_v52 = vld [vmem:[#allocation2 + $0x9a] sm:$0xff] }
 0x11c   : > { %4952 = vmatpush3.bf16.msra.mxu1 %v5329_v10  ;;  %4905 = vmatprep.subr.bf16.mxu0 %v5330_v16  ;;  %v5344_v10 = vld [vmem:[#allocation2 + $0x61] sm:$0xff] }
 0x11d   : > { %4682 = vmatmul.mubr.bf16.gmra.mrb[8].mxu1 %v5756_v6  ;;  %4953 = vmatprep.subr.bf16.mxu1 %v5331_v54  ;;  %v5334_v6 = vld [vmem:[%s6195_s1 + $0x230] sm:$0xff]   ;;  %v3454_v13 = vpack.c.bf16 %v5345_v12, %v5344_v10 }
 0x11e   : > { %4874 = vmatmul.mubr.bf16.gmra.mrb[8].mxu0 %v2565_v17  ;;  %4685 = vmatprep.mubr.bf16.mxu1 %v5773_v19  ;;  %v5336_v19 = vld [vmem:[%s6195_s1 + $0x238] sm:$0xff]   ;;  %v2870_v17 = vpack.c.bf16 %v2843_v52, %v2842_v8  ;;  %v2879_v52 = vpack.c.bf16 %v2861_v1, %v2860_v0  ;;  %v5366_v10 = vld [vmem:[#allocation2 + $0x169] sm:$0xff] }
 0x11f   : > { %4877 = vmatprep.mubr.bf16.mxu0 %v2566_v18  ;;  %4906 = vmatpush3.bf16.msra.mxu0 %v5330_v16  ;;  %v5347_v16 = vld [vmem:[#allocation2 + $0x81] sm:$0xff]  ;;  %v2844_v18 = vld [vmem:[#allocation2 + $0xaa] sm:$0xff] }
 0x120   : > { %4954 = vmatpush3.bf16.msra.mxu1 %v5331_v54  ;;  %4907 = vmatprep.subr.bf16.mxu0 %v5332_v4  ;;  %v3455_v54 = vpack.c.bf16 %v5347_v16, %v5346_v15  ;;  %v5367_v12 = vld [vmem:[#allocation2 + $0x171] sm:$0xff]  ;;  %v2864_v15 = vld [vmem:[#allocation2 + $0x19a] sm:$0xff]  ;;  %v2865_v16 = vld [vmem:[#allocation2 + $0x1a2] sm:$0xff] }
 0x121   : > { %4955 = vmatprep.subr.bf16.mxu1 %v5333_v24 }
 0x123   : > { %4908 = vmatpush3.bf16.msra.mxu0 %v5332_v4  ;;  %v2845_v4 = vld [vmem:[#allocation2 + $0xb2] sm:$0xff] }
 0x124   : > { %4956 = vmatpush3.bf16.msra.mxu1 %v5333_v24  ;;  %4909 = vmatprep.subr.bf16.mxu0 %v5334_v6  ;;  %v2846_v24 = vld [vmem:[#allocation2 + $0xc2] sm:$0xff] }
 0x125   : > { %4686 = vmatmul.mubr.bf16.gmra.mrb[12].mxu1 %v5780_v22  ;;  %4957 = vmatprep.subr.bf16.mxu1 %v5335_v27  ;;  %v2550_v22 = vld [vmem:[#allocation2 + $0x139] sm:$0xff] }
 0x126   : > { %4878 = vmatmul.mubr.bf16.gmra.mrb[12].mxu0 %v2567_v37  ;;  %4689 = vmatprep.mubr.bf16.mxu1 %v5799_v40  ;;  %v2551_v40 = vld [vmem:[#allocation2 + $0x141] sm:$0xff]  ;;  %v5351_v37 = vld [vmem:[#allocation2 + $0xb1] sm:$0xff] }
 0x127   : > { %4881 = vmatprep.mubr.bf16.mxu0 %v2568_v30  ;;  %4910 = vmatpush3.bf16.msra.mxu0 %v5334_v6  ;;  %v2571_v7 = vpack.c.bf16 %v2551_v40, %v2550_v22  ;;  %v2871_v6 = vpack.c.bf16 %v2845_v4, %v2844_v18  ;;  %v5354_v40 = vld [vmem:[#allocation2 + $0xd9] sm:$0xff]  ;;  %v2881_v4 = vpack.c.bf16 %v2865_v16, %v2864_v15 }
 0x128   : > { %4958 = vmatpush3.bf16.msra.mxu1 %v5335_v27  ;;  %4911 = vmatprep.subr.bf16.mxu0 %v5336_v19  ;;  %v5350_v27 = vld [vmem:[#allocation2 + $0xa9] sm:$0xff]  ;;  %v3459_v36 = vpack.c.bf16 %v5355_v34, %v5354_v40 }
 0x129   : > { %4959 = vmatprep.subr.bf16.mxu1 %v5337_v31  ;;  %v3457_v30 = vpack.c.bf16 %v5351_v37, %v5350_v27 }
 0x12b   : > { %4912 = vmatpush3.bf16.msra.mxu0 %v5336_v19  ;;  %v2872_v19 = vpack.c.bf16 %v2847_v25, %v2846_v24 }
 0x12c   : > { %4960 = vmatpush3.bf16.msra.mxu1 %v5337_v31  ;;  %v2848_v31 = vld [vmem:[#allocation2 + $0xda] sm:$0xff] }
 0x12d   : > { %4690 = vmatmul.mubr.bf16.gmra.mrb[16].mxu1 %v5806_v43  ;;  %v2557_v43 = vld [vmem:[#allocation2 + $0x189] sm:$0xff]  ;;  %v2873_v22 = vpack.c.bf16 %v2849_v39, %v2848_v31 }
 0x12e   : > { %4882 = vmatmul.mubr.bf16.gmra.mrb[16].mxu0 %v2569_v55  ;;  %4693 = vmatprep.mubr.bf16.mxu1 %v5815_v57  ;;  %v2574_v46 = vpack.c.bf16 %v2557_v43, %v2556_v42  ;;  %v2558_v57 = vld [vmem:[#allocation2 + $0x199] sm:$0xff]  ;;  %v5353_v55 = vld [vmem:[#allocation2 + $0xc9] sm:$0xff]  ;;  %v5356_v43 = vld [vmem:[#allocation2 + $0xf1] sm:$0xff] }
 0x12f   : > { %4885 = vmatprep.mubr.bf16.mxu0 %v2570_v5  ;;  %v2575_v49 = vpack.c.bf16 %v2559_v47, %v2558_v57  ;;  %v3458_v5 = vpack.c.bf16 %v5353_v55, %v5352_v33  ;;  %v2855_v42 = vld [vmem:[#allocation2 + $0x12a] sm:$0xff] }
 0x130   : > { %v5358_v47 = vld [vmem:[#allocation2 + $0x109] sm:$0xff] }
 0x135   : > { %4694 = vmatmul.mubr.bf16.gmra.mrb[20].mxu1 %v5819_v59  ;;  %v2835_v59 = vld [vmem:[#allocation2 + $0x3a] sm:$0xff] }
 0x136   : > { %4886 = vmatmul.mubr.bf16.gmra.mrb[20].mxu0 %v2571_v7  ;;  %4697 = vmatprep.mubr.bf16.mxu1 %v5827_v9  ;;  %v5339_v9 = vld [vmem:[#allocation2 + $0x21] sm:$0xff]  ;;  %v2866_v56 = vpack.c.bf16 %v2835_v59, %v2834_v48  ;;  %v2874_v7 = vpack.c.bf16 %v2851_v32, %v2850_v53  ;;  %v5359_v48 = vld [vmem:[#allocation2 + $0x111] sm:$0xff] }
 0x137   : > { %4889 = vmatprep.mubr.bf16.mxu0 %v2572_v21  ;;  %v3451_v51 = vpack.c.bf16 %v5339_v9, %v5338_v50  ;;  %v2852_v21 = vld [vmem:[#allocation2 + $0x10a] sm:$0xff]  ;;  %v3461_v59 = vpack.c.bf16 %v5359_v48, %v5358_v47  ;;  %v2856_v50 = vld [vmem:[#allocation2 + $0x13a] sm:$0xff]  ;;  %v2857_v9 = vld [vmem:[#allocation2 + $0x142] sm:$0xff] }
 0x138   : > { %v2875_v57 = vpack.c.bf16 %v2853_v41, %v2852_v21  ;;  %v2877_v61 = vpack.c.bf16 %v2857_v9, %v2856_v50  ;;  %v6045_v9 = vld [vmem:[%s6196_s2] ss:$0 sm:$0xff] }
 0x13d   : > { %4698 = vmatmul.mubr.bf16.gmra.mrb[24].mxu1 %v5831_v11  ;;  %v2837_v11 = vld [vmem:[#allocation2 + $0x52] sm:$0xff] }
 0x13e   : > { %4890 = vmatmul.mubr.bf16.gmra.mrb[24].mxu0 %v2573_v44  ;;  %4701 = vmatprep.mubr.bf16.mxu1 %v5839_v20  ;;  %v5340_v20 = vld [vmem:[#allocation2 + $0x31] sm:$0xff]  ;;  %v2867_v63 = vpack.c.bf16 %v2837_v11, %v2836_v58  ;;  %v5357_v44 = vld [vmem:[#allocation2 + $0xf9] sm:$0xff]  ;;  %v5360_v58 = vld [vmem:[#allocation2 + $0x121] sm:$0xff] }
 0x13f   : > { %4893 = vmatprep.mubr.bf16.mxu0 %v2574_v46  ;;  %v3452_v35 = vpack.c.bf16 %v5341_v62, %v5340_v20  ;;  %v3460_v46 = vpack.c.bf16 %v5357_v44, %v5356_v43  ;;  %v5361_v11 = vld [vmem:[#allocation2 + $0x129] sm:$0xff]  ;;  %v5362_v20 = vld [vmem:[#allocation2 + $0x139] sm:$0xff]  ;;  %v5363_v62 = vld [vmem:[#allocation2 + $0x141] sm:$0xff] }
 0x140   : > { %v3462_v60 = vpack.c.bf16 %v5361_v11, %v5360_v58 }
 0x145   : > { %4702 = vmatmul.mubr.bf16.gmra.mrb[28].mxu1 %v5916_v45  ;;  %v2840_v45 = vld [vmem:[#allocation2 + $0x7a] sm:$0xff] }
 0x146   : > { %4894 = vmatmul.mubr.bf16.gmra.mrb[28].mxu0 %v2575_v49  ;;  %4961 = vmatprep.mubr.bf16.mxu1 %v3451_v51  ;;  %v2869_v14 = vpack.c.bf16 %v2841_v3, %v2840_v45  ;;  %v2876_v49 = vpack.c.bf16 %v2855_v42, %v2854_v23  ;;  %v2858_v51 = vld [vmem:[#allocation2 + $0x152] sm:$0xff] }
 0x147   : > { %4913 = vmatprep.mubr.bf16.mxu0 %v2866_v56  ;;  %v2859_v56 = vld [vmem:[#allocation2 + $0x15a] sm:$0xff]  ;;  %v5364_v45 = vld [vmem:[#allocation2 + $0x151] sm:$0xff] }
 0x148   : > { %v5365_v3 = vld [vmem:[#allocation2 + $0x159] sm:$0xff] }
 0x149   : > { %v3464_v8 = vpack.c.bf16 %v5365_v3, %v5364_v45 }
 0x14d   : > { %4962 = vmatmul.mubr.bf16.vlgmr.msra.gmra.mrb[32].mxu1 %v3452_v35  ;;  %v3463_v35 = vpack.c.bf16 %v5363_v62, %v5362_v20 }
 0x14e   : > { %4914 = vmatmul.mubr.bf16.vlgmr.msra.gmra.mrb[0].mxu0 %v2867_v63  ;;  %4965 = vmatprep.mubr.bf16.mxu1 %v3453_v2  ;;  %v2878_v63 = vpack.c.bf16 %v2859_v56, %v2858_v51  ;;  %v2862_v2 = vld [vmem:[#allocation2 + $0x182] sm:$0xff] }
 0x14f   : > { %4917 = vmatprep.mubr.bf16.mxu0 %v2868_v38  ;;  %v2863_v38 = vld [vmem:[#allocation2 + $0x18a] sm:$0xff] }
 0x155   : > { %4966 = vmatmul.mubr.bf16.gmra.mrb[36].mxu1 %v3454_v13  ;;  %v3465_v13 = vpack.c.bf16 %v5367_v12, %v5366_v10 }
 0x156   : > { %4918 = vmatmul.mubr.bf16.gmra.mrb[4].mxu0 %v2869_v14  ;;  %4969 = vmatprep.mubr.bf16.mxu1 %v3455_v54  ;;  %v2880_v14 = vpack.c.bf16 %v2863_v38, %v2862_v2  ;;  %v5368_v54 = vld [vmem:[#allocation2 + $0x181] sm:$0xff] }
 0x157   : > { %4921 = vmatprep.mubr.bf16.mxu0 %v2870_v17  ;;  %v5369_v17 = vld [vmem:[#allocation2 + $0x189] sm:$0xff] }
 0x158   : > { %v3466_v18 = vpack.c.bf16 %v5369_v17, %v5368_v54 }
 0x15d   : > { %4970 = vmatmul.mubr.bf16.gmra.mrb[40].mxu1 %v3456_v29 }
 0x15e   : > { %4922 = vmatmul.mubr.bf16.gmra.mrb[8].mxu0 %v2871_v6  ;;  %4973 = vmatprep.mubr.bf16.mxu1 %v3457_v30 }
 0x15f   : > { %4925 = vmatprep.mubr.bf16.mxu0 %v2872_v19 }
 0x165   : > { %4974 = vmatmul.mubr.bf16.gmra.mrb[44].mxu1 %v3458_v5 }
 0x166   : > { %4926 = vmatmul.mubr.bf16.gmra.mrb[12].mxu0 %v2873_v22  ;;  %4977 = vmatprep.mubr.bf16.mxu1 %v3459_v36 }
 0x167   : > { %4929 = vmatprep.mubr.bf16.mxu0 %v2874_v7 }
 0x16d   : > { %4978 = vmatmul.mubr.bf16.gmra.mrb[48].mxu1 %v3460_v46 }
 0x16e   : > { %4930 = vmatmul.mubr.bf16.gmra.mrb[16].mxu0 %v2875_v57  ;;  %4981 = vmatprep.mubr.bf16.mxu1 %v3461_v59  ;;  %v6040_v59 = vld [vmem:[%s6198_s4] ss:$0 sm:$0xff] }
 0x16f   : > { %4933 = vmatprep.mubr.bf16.mxu0 %v2876_v49 }
 0x175   : > { %4982 = vmatmul.mubr.bf16.gmra.mrb[52].mxu1 %v3462_v60 }
 0x176   : > { %4934 = vmatmul.mubr.bf16.gmra.mrb[20].mxu0 %v2877_v61  ;;  %4985 = vmatprep.mubr.bf16.mxu1 %v3463_v35 }
 0x177   : > { %4937 = vmatprep.mubr.bf16.mxu0 %v2878_v63 }
 0x17d   : > { %4986 = vmatmul.mubr.bf16.gmra.mrb[56].mxu1 %v3464_v8 }
 0x17e   : > { %4938 = vmatmul.mubr.bf16.gmra.mrb[24].mxu0 %v2879_v52  ;;  %4989 = vmatprep.mubr.bf16.mxu1 %v3465_v13 }
 0x17f   : > { %4941 = vmatprep.mubr.bf16.mxu0 %v2880_v14 }
 0x185   : > { %4990 = vmatmul.mubr.bf16.gmra.mrb[60].mxu1 %v3466_v18 }
 0x186   : > { %4942 = vmatmul.mubr.bf16.gmra.mrb[28].mxu0 %v2881_v4 }
 0x1e0   : > { %v4675_v24 = vpop.f32.mrb[0].mxu1 }
 0x1e1   : > { %v1450_v25 = vpop.f32.mrb[1].mxu1 }
 0x1e2   : > { %v4676_v26 = vpop.f32.mrb[2].mxu1 }
 0x1e3   : > { %v1453_v28 = vpop.f32.mrb[3].mxu1 }
 0x1e8   : > { %v5981_v29 = vpop.f32.mrb[4].mxu1 }
 0x1e9   : > { %v5983_v6 = vpop.f32.mrb[5].mxu1 }
 0x1ea   : > { %v5985_v27 = vpop.f32.mrb[6].mxu1 }
 0x1eb   : > { %v5987_v37 = vpop.f32.mrb[7].mxu1 }
 0x1f0   : > { %v5989_v30 = vpop.f32.mrb[8].mxu1 }
 0x1f1   : > { %v5991_v19 = vpop.f32.mrb[9].mxu1 }
 0x1f2   : > { %v5993_v31 = vpop.f32.mrb[10].mxu1 }
 0x1f3   : > { %v5995_v39 = vpop.f32.mrb[11].mxu1 }
 0x1f8   : > { %v5997_v53 = vpop.f32.mrb[12].mxu1 }
 0x1f9   : > { %v5999_v32 = vpop.f32.mrb[13].mxu1 }
 0x1fa   : > { %v6001_v33 = vpop.f32.mrb[14].mxu1 }
 0x1fb   : > { %v6003_v55 = vpop.f32.mrb[15].mxu1 }
 0x200   : > { %v6005_v5 = vpop.f32.mrb[16].mxu1 }
 0x201   : > { %v6007_v22 = vpop.f32.mrb[17].mxu1 }
 0x202   : > { %v6009_v40 = vpop.f32.mrb[18].mxu1 }
 0x203   : > { %v6011_v34 = vpop.f32.mrb[19].mxu1 }
 0x208   : > { %v6013_v36 = vpop.f32.mrb[20].mxu1 }
 0x209   : > { %v6015_v7 = vpop.f32.mrb[21].mxu1 }
 0x20a   : > { %v6017_v21 = vpop.f32.mrb[22].mxu1 }
 0x20b   : > { %v6019_v41 = vpop.f32.mrb[23].mxu1 }
 0x210   : > { %v6021_v23 = vpop.f32.mrb[24].mxu1 }
 0x211   : > { %v6023_v42 = vpop.f32.mrb[25].mxu1 }
 0x212   : > { %v6025_v43 = vpop.f32.mrb[26].mxu1 }
 0x213   : > { %v6027_v44 = vpop.f32.mrb[27].mxu1 }
 0x218   : > { %v6029_v46 = vpop.f32.mrb[28].mxu1 }
 0x219   : > { %v6031_v57 = vpop.f32.mrb[29].mxu1 }
 0x21a   : > { %v6033_v47 = vpop.f32.mrb[30].mxu1 }
 0x21b   : > { %v6035_v48 = vpop.f32.mrb[31].mxu1 }
 0x220   : > { %v4963_v49 = vpop.f32.mrb[32].mxu1 }
 0x221   : > { %v4915_v50 = vpop.f32.mrb[0].mxu0  ;;  %v3572_v51 = vpop.f32.mrb[33].mxu1  ;;  %v3581_v61 = vadd.f32 %v4963_v49, %v6040_v59 }
 0x222   : > { %v4993_v56 = vadd.f32 %v4915_v50, %v4675_v24  ;;  %v2981_v58 = vpop.f32.mrb[1].mxu0  ;;  %v3573_v11 = vadd.f32 %v6040_v59, %v3572_v51  ;;  %v4964_v60 = vpop.f32.mrb[34].mxu1 }
 0x223   : > { %v4994_v20 = vadd.f32 %v2981_v58, %v1450_v25  ;;  %v4916_v62 = vpop.f32.mrb[2].mxu0  ;;  %v3584_v35 = vadd.f32 %v4964_v60, %v6040_v59  ;;  %v3575_v63 = vpop.f32.mrb[35].mxu1  ;;  %v3742_v14 = vmul.f32 %v3581_v61, %v3581_v61 }
 0x224   : > { %v3149_v0 = vadd.f32 %v4993_v56, %v6045_v9  ;;  %v3740_v1 = vmul.f32 %v3573_v11, %v3573_v11  ;;  %v4995_v2 = vadd.f32 %v4916_v62, %v4676_v26  ;;  %v2984_v38 = vpop.f32.mrb[3].mxu0  ;;  %v3576_v45 = vadd.f32 %v6040_v59, %v3575_v63 }
 0x225   : > { %v3147_v3 = vadd.f32 %v4994_v20, %v6045_v9  ;;  %v4996_v8 = vadd.f32 %v2984_v38, %v1453_v28  ;;  %v3743_v15 = vmul.f32 %v3584_v35, %v3584_v35 }
 0x226   : > { %v3150_v52 = vadd.f32 %v4995_v2, %v6045_v9  ;;  %v3700_v10 = vadd.f32 %v3576_v45, %v3573_v11  ;;  %v3741_v12 = vmul.f32 %v3576_v45, %v3576_v45  ;;  %v3382_v13 = vmul.f32 %v3149_v0, %v3149_v0 }
 0x227   : > { %v3148_v16 = vadd.f32 %v4996_v8, %v6045_v9  ;;  %v3380_v54 = vmul.f32 %v3147_v3, %v3147_v3 }
 0x228   : > { %v4186_v17 = vpack.c.bf16 %v3150_v52, %v3149_v0  ;;  %v3701_v18 = vadd.f32 %v3700_v10, %v3581_v61  ;;  %v3772_v4 = vadd.f32 %v3741_v12, %v3740_v1  ;;  %v4967_v24 = vpop.f32.mrb[36].mxu1  ;;  %v3383_v25 = vmul.f32 %v3150_v52, %v3150_v52 }
 0x229   : > { %v4181_v26 = vpack.c.bf16 %v3148_v16, %v3147_v3  ;;  %v3340_v49 = vadd.f32 %v3148_v16, %v3147_v3  ;;  %v3381_v28 = vmul.f32 %v3148_v16, %v3148_v16  ;;  %v4919_v50 = vpop.f32.mrb[4].mxu0  ;;  %v3588_v51 = vpop.f32.mrb[37].mxu1  ;;  %v3597_v1 = vadd.f32 %v4967_v24, %v6040_v59 }
 0x22a   : > { %4258 = vst [vmem:[%s5445_s19 + $0x8] sm:$0xff] %v4186_v17   ;;  %v3773_v56 = vadd.f32 %v3772_v4, %v3742_v14  ;;  %v4997_v58 = vadd.f32 %v4919_v50, %v5981_v29  ;;  %v2997_v11 = vpop.f32.mrb[5].mxu0  ;;  %v3589_v60 = vadd.f32 %v6040_v59, %v3588_v51  ;;  %v3702_v20 = vadd.f32 %v3701_v18, %v3584_v35  ;;  %v4968_v62 = vpop.f32.mrb[38].mxu1 }
 0x22b   : > { %4182 = vst [vmem:[%s5445_s19] sm:$0xff] %v4181_v26   ;;  %v3341_v61 = vadd.f32 %v3340_v49, %v3149_v0  ;;  %v3412_v63 = vadd.f32 %v3381_v28, %v3380_v54  ;;  %v4998_v2 = vadd.f32 %v2997_v11, %v5983_v6  ;;  %v4920_v38 = vpop.f32.mrb[6].mxu0  ;;  %v3591_v45 = vpop.f32.mrb[39].mxu1  ;;  %v3600_v54 = vadd.f32 %v4968_v62, %v6040_v59 }
 0x22c   : > { %v3153_v3 = vadd.f32 %v4997_v58, %v6045_v9  ;;  %v3703_v8 = vadd.f32 %v3702_v20, %v3589_v60  ;;  %v3744_v10 = vmul.f32 %v3589_v60, %v3589_v60  ;;  %v3774_v12 = vadd.f32 %v3773_v56, %v3743_v15  ;;  %v3000_v29 = vpop.f32.mrb[7].mxu0 }
 0x22d   : > { %v3413_v14 = vadd.f32 %v3412_v63, %v3382_v13  ;;  %v3151_v16 = vadd.f32 %v4998_v2, %v6045_v9  ;;  %v3342_v35 = vadd.f32 %v3341_v61, %v3150_v52  ;;  %v4999_v17 = vadd.f32 %v4920_v38, %v5985_v27 }
 0x22e   : > { %v3775_v0 = vadd.f32 %v3774_v12, %v3744_v10  ;;  %v5000_v18 = vadd.f32 %v3000_v29, %v5987_v37  ;;  %v3746_v49 = vmul.f32 %v3597_v1, %v3597_v1  ;;  %v3592_v13 = vadd.f32 %v6040_v59, %v3591_v45 }
 0x22f   : > { %v3343_v6 = vadd.f32 %v3342_v35, %v3151_v16  ;;  %v3384_v4 = vmul.f32 %v3151_v16, %v3151_v16  ;;  %v3414_v24 = vadd.f32 %v3413_v14, %v3383_v25  ;;  %v3154_v26 = vadd.f32 %v4999_v17, %v6045_v9 }
 0x230   : > { %v3152_v15 = vadd.f32 %v5000_v18, %v6045_v9  ;;  %v4971_v28 = vpop.f32.mrb[40].mxu1  ;;  %v3386_v52 = vmul.f32 %v3153_v3, %v3153_v3  ;;  %v3747_v51 = vmul.f32 %v3600_v54, %v3600_v54  ;;  %v3704_v25 = vadd.f32 %v3703_v8, %v3592_v13 }
 0x231   : > { %v3415_v50 = vadd.f32 %v3414_v24, %v3384_v4  ;;  %v4196_v27 = vpack.c.bf16 %v3154_v26, %v3153_v3  ;;  %v4923_v56 = vpop.f32.mrb[8].mxu0  ;;  %v3604_v58 = vpop.f32.mrb[41].mxu1  ;;  %v3387_v61 = vmul.f32 %v3154_v26, %v3154_v26  ;;  %v3745_v63 = vmul.f32 %v3592_v13, %v3592_v13 }
 0x232   : > { %v4191_v37 = vpack.c.bf16 %v3152_v15, %v3151_v16  ;;  %v3344_v11 = vadd.f32 %v3343_v6, %v3152_v15  ;;  %v3385_v60 = vmul.f32 %v3152_v15, %v3152_v15  ;;  %v3013_v20 = vpop.f32.mrb[9].mxu0  ;;  %v4972_v62 = vpop.f32.mrb[42].mxu1  ;;  %v5001_v2 = vadd.f32 %v4923_v56, %v5989_v30 }
 0x233   : > { %4260 = vst [vmem:[%s5445_s19 + $0x18] sm:$0xff] %v4196_v27   ;;  %v5002_v38 = vadd.f32 %v3013_v20, %v5991_v19  ;;  %v4924_v45 = vpop.f32.mrb[10].mxu0  ;;  %v3607_v10 = vpop.f32.mrb[43].mxu1  ;;  %v3705_v14 = vadd.f32 %v3704_v25, %v3597_v1  ;;  %v3605_v16 = vadd.f32 %v6040_v59, %v3604_v58  ;;  %v3776_v17 = vadd.f32 %v3775_v0, %v3745_v63 }
 0x234   : > { %4259 = vst [vmem:[%s5445_s19 + $0x10] sm:$0xff] %v4191_v37   ;;  %v3345_v12 = vadd.f32 %v3344_v11, %v3153_v3  ;;  %v3416_v29 = vadd.f32 %v3415_v50, %v3385_v60  ;;  %v3016_v35 = vpop.f32.mrb[11].mxu0  ;;  %v3613_v8 = vadd.f32 %v4971_v28, %v6040_v59  ;;  %v5003_v6 = vadd.f32 %v4924_v45, %v5993_v31 }
 0x235   : > { %v3155_v18 = vadd.f32 %v5002_v38, %v6045_v9  ;;  %v3157_v30 = vadd.f32 %v5001_v2, %v6045_v9  ;;  %v3706_v24 = vadd.f32 %v3705_v14, %v3600_v54  ;;  %v3777_v15 = vadd.f32 %v3776_v17, %v3746_v49 }
 0x236   : > { %v3417_v4 = vadd.f32 %v3416_v29, %v3386_v52  ;;  %v3346_v19 = vadd.f32 %v3345_v12, %v3154_v26  ;;  %v3748_v3 = vmul.f32 %v3605_v16, %v3605_v16  ;;  %v3158_v1 = vadd.f32 %v5003_v6, %v6045_v9 }
 0x237   : > { %v3388_v13 = vmul.f32 %v3155_v18, %v3155_v18  ;;  %v3707_v56 = vadd.f32 %v3706_v24, %v3605_v16  ;;  %v3778_v28 = vadd.f32 %v3777_v15, %v3747_v51  ;;  %v3616_v37 = vadd.f32 %v4972_v62, %v6040_v59 }
 0x238   : > { %v3347_v50 = vadd.f32 %v3346_v19, %v3155_v18  ;;  %v3418_v27 = vadd.f32 %v3417_v4, %v3387_v61  ;;  %v4975_v0 = vpop.f32.mrb[44].mxu1  ;;  %v4206_v58 = vpack.c.bf16 %v3158_v1, %v3157_v30  ;;  %v5004_v31 = vadd.f32 %v3016_v35, %v5995_v39 }
 0x239   : > { %v4927_v52 = vpop.f32.mrb[12].mxu0  ;;  %v3620_v11 = vpop.f32.mrb[45].mxu1  ;;  %v3750_v26 = vmul.f32 %v3613_v8, %v3613_v8  ;;  %v3608_v49 = vadd.f32 %v6040_v59, %v3607_v10  ;;  %v3390_v61 = vmul.f32 %v3157_v30, %v3157_v30  ;;  %v3779_v63 = vadd.f32 %v3778_v28, %v3748_v3 }
 0x23a   : > { %v3419_v54 = vadd.f32 %v3418_v27, %v3388_v13  ;;  %v5005_v60 = vadd.f32 %v4927_v52, %v5997_v53  ;;  %v3029_v25 = vpop.f32.mrb[13].mxu0  ;;  %v4976_v20 = vpop.f32.mrb[46].mxu1  ;;  %4262 = vst [vmem:[%s5445_s19 + $0x28] sm:$0xff] %v4206_v58   ;;  %v3156_v51 = vadd.f32 %v5004_v31, %v6045_v9  ;;  %v3391_v38 = vmul.f32 %v3158_v1, %v3158_v1 }
 0x23b   : > { %v5006_v2 = vadd.f32 %v3029_v25, %v5999_v32  ;;  %v4928_v62 = vpop.f32.mrb[14].mxu0  ;;  %v3623_v39 = vpop.f32.mrb[47].mxu1  ;;  %v3708_v45 = vadd.f32 %v3707_v56, %v3608_v49  ;;  %v3749_v12 = vmul.f32 %v3608_v49, %v3608_v49  ;;  %v3621_v29 = vadd.f32 %v6040_v59, %v3620_v11 }
 0x23c   : > { %v3032_v10 = vpop.f32.mrb[15].mxu0  ;;  %v3751_v14 = vmul.f32 %v3616_v37, %v3616_v37  ;;  %v4201_v53 = vpack.c.bf16 %v3156_v51, %v3155_v18  ;;  %v3348_v16 = vadd.f32 %v3347_v50, %v3156_v51  ;;  %v3389_v35 = vmul.f32 %v3156_v51, %v3156_v51 }
 0x23d   : > { %v3709_v17 = vadd.f32 %v3708_v45, %v3613_v8  ;;  %v3780_v6 = vadd.f32 %v3779_v63, %v3749_v12  ;;  %v3629_v4 = vadd.f32 %v4975_v0, %v6040_v59  ;;  %v3159_v19 = vadd.f32 %v5006_v2, %v6045_v9 }
 0x23e   : > { %4261 = vst [vmem:[%s5445_s19 + $0x20] sm:$0xff] %v4201_v53   ;;  %v3349_v32 = vadd.f32 %v3348_v16, %v3157_v30  ;;  %v3420_v24 = vadd.f32 %v3419_v54, %v3389_v35  ;;  %v3161_v15 = vadd.f32 %v5005_v60, %v6045_v9  ;;  %v5007_v13 = vadd.f32 %v4928_v62, %v6001_v33 }
 0x23f   : > { %v3781_v3 = vadd.f32 %v3780_v6, %v3750_v26  ;;  %v3392_v27 = vmul.f32 %v3159_v19, %v3159_v19  ;;  %v3710_v56 = vadd.f32 %v3709_v17, %v3616_v37  ;;  %v3752_v28 = vmul.f32 %v3621_v29, %v3621_v29 }
 0x240   : > { %v4979_v18 = vpop.f32.mrb[48].mxu1  ;;  %v3421_v50 = vadd.f32 %v3420_v24, %v3390_v61  ;;  %v3350_v58 = vadd.f32 %v3349_v32, %v3158_v1  ;;  %v3162_v8 = vadd.f32 %v5007_v13, %v6045_v9  ;;  %v5008_v0 = vadd.f32 %v3032_v10, %v6003_v55 }
 0x241   : > { %v4931_v31 = vpop.f32.mrb[16].mxu0  ;;  %v3636_v52 = vpop.f32.mrb[49].mxu1  ;;  %v3754_v11 = vmul.f32 %v3629_v4, %v3629_v4  ;;  %v3711_v30 = vadd.f32 %v3710_v56, %v3621_v29  ;;  %v3782_v54 = vadd.f32 %v3781_v3, %v3751_v14  ;;  %v3624_v49 = vadd.f32 %v6040_v59, %v3623_v39 }
 0x242   : > { %v3045_v33 = vpop.f32.mrb[17].mxu0  ;;  %v4980_v26 = vpop.f32.mrb[50].mxu1  ;;  %v3351_v60 = vadd.f32 %v3350_v58, %v3159_v19  ;;  %v3422_v37 = vadd.f32 %v3421_v50, %v3391_v38  ;;  %v4216_v25 = vpack.c.bf16 %v3162_v8, %v3161_v15  ;;  %v3632_v61 = vadd.f32 %v4976_v20, %v6040_v59 }
 0x243   : > { %v4932_v1 = vpop.f32.mrb[18].mxu0  ;;  %v3639_v63 = vpop.f32.mrb[51].mxu1  ;;  %v3783_v51 = vadd.f32 %v3782_v54, %v3752_v28  ;;  %v3160_v55 = vadd.f32 %v5008_v0, %v6045_v9  ;;  %v3712_v2 = vadd.f32 %v3711_v30, %v3624_v49  ;;  %v3753_v62 = vmul.f32 %v3624_v49, %v3624_v49 }
 0x244   : > { %v3048_v45 = vpop.f32.mrb[19].mxu0  ;;  %v3394_v12 = vmul.f32 %v3161_v15, %v3161_v15  ;;  %v3423_v29 = vadd.f32 %v3422_v37, %v3392_v27  ;;  %4264 = vst [vmem:[%s5445_s19 + $0x38] sm:$0xff] %v4216_v25   ;;  %v5009_v39 = vadd.f32 %v4931_v31, %v6005_v5  ;;  %v5010_v10 = vadd.f32 %v3045_v33, %v6007_v22 }
 0x245   : > { %v4211_v38 = vpack.c.bf16 %v3160_v55, %v3159_v19  ;;  %v3352_v14 = vadd.f32 %v3351_v60, %v3160_v55  ;;  %v3393_v53 = vmul.f32 %v3160_v55, %v3160_v55  ;;  %v3713_v20 = vadd.f32 %v3712_v2, %v3629_v4 }
 0x246   : > { %v3395_v16 = vmul.f32 %v3162_v8, %v3162_v8  ;;  %v3755_v35 = vmul.f32 %v3632_v61, %v3632_v61  ;;  %v3784_v17 = vadd.f32 %v3783_v51, %v3753_v62  ;;  %v3163_v6 = vadd.f32 %v5010_v10, %v6045_v9 }
 0x247   : > { %4263 = vst [vmem:[%s5445_s19 + $0x30] sm:$0xff] %v4211_v38   ;;  %v3353_v32 = vadd.f32 %v3352_v14, %v3161_v15  ;;  %v3424_v24 = vadd.f32 %v3423_v29, %v3393_v53  ;;  %v3637_v13 = vadd.f32 %v6040_v59, %v3636_v52  ;;  %v3714_v3 = vadd.f32 %v3713_v20, %v3632_v61 }
 0x248   : > { %v4983_v27 = vpop.f32.mrb[52].mxu1  ;;  %v3785_v56 = vadd.f32 %v3784_v17, %v3754_v11  ;;  %v3645_v5 = vadd.f32 %v4979_v18, %v6040_v59  ;;  %v3396_v22 = vmul.f32 %v3163_v6, %v3163_v6  ;;  %v5011_v19 = vadd.f32 %v4932_v1, %v6009_v40 }
 0x249   : > { %v4935_v28 = vpop.f32.mrb[20].mxu0  ;;  %v3652_v4 = vpop.f32.mrb[53].mxu1  ;;  %v3425_v50 = vadd.f32 %v3424_v24, %v3394_v12  ;;  %v3354_v58 = vadd.f32 %v3353_v32, %v3162_v8  ;;  %v3715_v0 = vadd.f32 %v3714_v3, %v3637_v13  ;;  %v3756_v31 = vmul.f32 %v3637_v13, %v3637_v13 }
 0x24a   : > { %v3061_v30 = vpop.f32.mrb[21].mxu0  ;;  %v4984_v54 = vpop.f32.mrb[54].mxu1  ;;  %v3165_v15 = vadd.f32 %v5009_v39, %v6045_v9  ;;  %v3786_v49 = vadd.f32 %v3785_v56, %v3755_v35  ;;  %v3166_v52 = vadd.f32 %v5011_v19, %v6045_v9  ;;  %v5012_v11 = vadd.f32 %v3048_v45, %v6011_v34 }
 0x24b   : > { %v4936_v33 = vpop.f32.mrb[22].mxu0  ;;  %v3655_v18 = vpop.f32.mrb[55].mxu1  ;;  %v3355_v60 = vadd.f32 %v3354_v58, %v3163_v6  ;;  %v3426_v40 = vadd.f32 %v3425_v50, %v3395_v16  ;;  %v3640_v37 = vadd.f32 %v6040_v59, %v3639_v63  ;;  %v5013_v8 = vadd.f32 %v4935_v28, %v6013_v36 }
 0x24c   : > { %v3064_v25 = vpop.f32.mrb[23].mxu0  ;;  %v3758_v61 = vmul.f32 %v3645_v5, %v3645_v5  ;;  %v3787_v1 = vadd.f32 %v3786_v49, %v3756_v31  ;;  %v4226_v51 = vpack.c.bf16 %v3166_v52, %v3165_v15  ;;  %v3648_v55 = vadd.f32 %v4980_v26, %v6040_v59 }
 0x24d   : > { %v3427_v2 = vadd.f32 %v3426_v40, %v3396_v22  ;;  %v3164_v62 = vadd.f32 %v5012_v11, %v6045_v9  ;;  %v3716_v12 = vadd.f32 %v3715_v0, %v3640_v37  ;;  %v3757_v34 = vmul.f32 %v3640_v37, %v3640_v37 }
 0x24e   : > { %v3398_v45 = vmul.f32 %v3165_v15, %v3165_v15  ;;  %4266 = vst [vmem:[%s5445_s19 + $0x48] sm:$0xff] %v4226_v51   ;;  %v3399_v29 = vmul.f32 %v3166_v52, %v3166_v52  ;;  %v5014_v39 = vadd.f32 %v3061_v30, %v6015_v7  ;;  %v3653_v63 = vadd.f32 %v6040_v59, %v3652_v4 }
 0x24f   : > { %v4221_v36 = vpack.c.bf16 %v3164_v62, %v3163_v6  ;;  %v3356_v10 = vadd.f32 %v3355_v60, %v3164_v62  ;;  %v3397_v38 = vmul.f32 %v3164_v62, %v3164_v62  ;;  %v3717_v14 = vadd.f32 %v3716_v12, %v3645_v5 }
 0x250   : > { %v6115_v53 = vpop.f32.mrb[56].mxu1  ;;  %v3759_v26 = vmul.f32 %v3648_v55, %v3648_v55  ;;  %v3788_v20 = vadd.f32 %v3787_v1, %v3757_v34  ;;  %v3169_v16 = vadd.f32 %v5013_v8, %v6045_v9  ;;  %v3167_v35 = vadd.f32 %v5014_v39, %v6045_v9 }
 0x251   : > { %v4939_v17 = vpop.f32.mrb[24].mxu0  ;;  %v3668_v32 = vpop.f32.mrb[57].mxu1  ;;  %4265 = vst [vmem:[%s5445_s19 + $0x40] sm:$0xff] %v4221_v36   ;;  %v3357_v24 = vadd.f32 %v3356_v10, %v3165_v15  ;;  %v3428_v13 = vadd.f32 %v3427_v2, %v3397_v38  ;;  %v3661_v7 = vadd.f32 %v4983_v27, %v6040_v59  ;;  %v3718_v3 = vadd.f32 %v3717_v14, %v3648_v55 }
 0x252   : > { %v3077_v6 = vpop.f32.mrb[25].mxu0  ;;  %v6121_v56 = vpop.f32.mrb[58].mxu1  ;;  %v3789_v5 = vadd.f32 %v3788_v20, %v3758_v61  ;;  %v3400_v22 = vmul.f32 %v3167_v35, %v3167_v35  ;;  %v3760_v19 = vmul.f32 %v3653_v63, %v3653_v63  ;;  %v5015_v28 = vadd.f32 %v4936_v33, %v6017_v21 }
 0x253   : > { %v4940_v4 = vpop.f32.mrb[26].mxu0  ;;  %v3671_v50 = vpop.f32.mrb[59].mxu1  ;;  %v3429_v58 = vadd.f32 %v3428_v13, %v3398_v45  ;;  %v3358_v0 = vadd.f32 %v3357_v24, %v3166_v52  ;;  %v3719_v31 = vadd.f32 %v3718_v3, %v3653_v63  ;;  %v5016_v30 = vadd.f32 %v3064_v25, %v6019_v41 }
 0x254   : > { %v3080_v15 = vpop.f32.mrb[27].mxu0  ;;  %v3790_v49 = vadd.f32 %v3789_v5, %v3759_v26  ;;  %v3170_v27 = vadd.f32 %v5015_v28, %v6045_v9  ;;  %v3664_v11 = vadd.f32 %v4984_v54, %v6040_v59  ;;  %v3656_v60 = vadd.f32 %v6040_v59, %v3655_v18 }
 0x255   : > { %v3359_v40 = vadd.f32 %v3358_v0, %v3167_v35  ;;  %v3430_v37 = vadd.f32 %v3429_v58, %v3399_v29  ;;  %v3168_v21 = vadd.f32 %v5016_v30, %v6045_v9  ;;  %v5017_v33 = vadd.f32 %v4939_v17, %v6021_v23 }
 0x256   : > { %v3402_v8 = vmul.f32 %v3169_v16, %v3169_v16  ;;  %v3791_v52 = vadd.f32 %v3790_v49, %v3760_v19  ;;  %v4236_v61 = vpack.c.bf16 %v3170_v27, %v3169_v16  ;;  %v3720_v41 = vadd.f32 %v3719_v31, %v3656_v60 }
 0x257   : > { %v3431_v25 = vadd.f32 %v3430_v37, %v3400_v22  ;;  %v4231_v1 = vpack.c.bf16 %v3168_v21, %v3167_v35  ;;  %v3360_v51 = vadd.f32 %v3359_v40, %v3168_v21  ;;  %v3401_v55 = vmul.f32 %v3168_v21, %v3168_v21 }
 0x258   : > { %v6130_v2 = vpop.f32.mrb[60].mxu1  ;;  %v3762_v54 = vmul.f32 %v3661_v7, %v3661_v7  ;;  %4268 = vst [vmem:[%s5445_s19 + $0x58] sm:$0xff] %v4236_v61   ;;  %v3763_v18 = vmul.f32 %v3664_v11, %v3664_v11  ;;  %v3721_v62 = vadd.f32 %v3720_v41, %v3661_v7  ;;  %v3761_v12 = vmul.f32 %v3656_v60, %v3656_v60 }
 0x259   : > { %v4943_v34 = vpop.f32.mrb[28].mxu0  ;;  %v3684_v45 = vpop.f32.mrb[61].mxu1  ;;  %4267 = vst [vmem:[%s5445_s19 + $0x50] sm:$0xff] %v4231_v1   ;;  %v3361_v23 = vadd.f32 %v3360_v51, %v3169_v16  ;;  %v3432_v29 = vadd.f32 %v3431_v25, %v3401_v55  ;;  %v5018_v39 = vadd.f32 %v3077_v6, %v6023_v42  ;;  %v3669_v63 = vadd.f32 %v6040_v59, %v3668_v32 }
 0x25a   : > { %v3093_v36 = vpop.f32.mrb[29].mxu0  ;;  %v6136_v10 = vpop.f32.mrb[62].mxu1  ;;  %v3403_v38 = vmul.f32 %v3170_v27, %v3170_v27  ;;  %v3792_v14 = vadd.f32 %v3791_v52, %v3761_v12  ;;  %v3173_v26 = vadd.f32 %v5017_v33, %v6045_v9  ;;  %v3722_v20 = vadd.f32 %v3721_v62, %v3664_v11 }
 0x25b   : > { %v4944_v35 = vpop.f32.mrb[30].mxu0  ;;  %v3687_v17 = vpop.f32.mrb[63].mxu1  ;;  %v3433_v24 = vadd.f32 %v3432_v29, %v3402_v8  ;;  %v3677_v13 = vadd.f32 %v6115_v53, %v6040_v59  ;;  %v3171_v16 = vadd.f32 %v5018_v39, %v6045_v9  ;;  %v3362_v7 = vadd.f32 %v3361_v23, %v3170_v27 }
 0x25c   : > { %v3096_v42 = vpop.f32.mrb[31].mxu0  ;;  %v3793_v3 = vadd.f32 %v3792_v14, %v3762_v54  ;;  %v3723_v32 = vadd.f32 %v3722_v20, %v3669_v63  ;;  %v3764_v6 = vmul.f32 %v3669_v63, %v3669_v63  ;;  %v5019_v5 = vadd.f32 %v4940_v4, %v6025_v43 }
 0x25d   : > { %v3363_v22 = vadd.f32 %v3362_v7, %v3171_v16  ;;  %v3404_v19 = vmul.f32 %v3171_v16, %v3171_v16  ;;  %v3434_v28 = vadd.f32 %v3433_v24, %v3403_v38  ;;  %v5020_v58 = vadd.f32 %v3080_v15, %v6027_v44 }
 0x25e   : > { %v3794_v0 = vadd.f32 %v3793_v3, %v3763_v18  ;;  %v3174_v31 = vadd.f32 %v5019_v5, %v6045_v9  ;;  %v3680_v53 = vadd.f32 %v6121_v56, %v6040_v59  ;;  %v3672_v30 = vadd.f32 %v6040_v59, %v3671_v50 }
 0x25f   : > { %v3435_v49 = vadd.f32 %v3434_v28, %v3404_v19  ;;  %v3172_v27 = vadd.f32 %v5020_v58, %v6045_v9  ;;  %v5021_v43 = vadd.f32 %v4943_v34, %v6029_v46  ;;  %v3406_v4 = vmul.f32 %v3173_v26, %v3173_v26 }
 0x260   : > { %v3795_v11 = vadd.f32 %v3794_v0, %v3764_v6  ;;  %v4246_v60 = vpack.c.bf16 %v3174_v31, %v3173_v26  ;;  %v3724_v40 = vadd.f32 %v3723_v32, %v3672_v30  ;;  %v3765_v21 = vmul.f32 %v3672_v30, %v3672_v30 }
 0x261   : > { %v4241_v44 = vpack.c.bf16 %v3172_v27, %v3171_v16  ;;  %v3364_v15 = vadd.f32 %v3363_v22, %v3172_v27  ;;  %v3405_v37 = vmul.f32 %v3172_v27, %v3172_v27  ;;  %v3766_v33 = vmul.f32 %v3677_v13, %v3677_v13 }
 0x262   : > { %4270 = vst [vmem:[%s5445_s19 + $0x68] sm:$0xff] %v4246_v60   ;;  %v3767_v8 = vmul.f32 %v3680_v53, %v3680_v53  ;;  %v3725_v56 = vadd.f32 %v3724_v40, %v3677_v13  ;;  %v5022_v50 = vadd.f32 %v3093_v36, %v6031_v57  ;;  %v3796_v41 = vadd.f32 %v3795_v11, %v3765_v21 }
 0x263   : > { %4269 = vst [vmem:[%s5445_s19 + $0x60] sm:$0xff] %v4241_v44   ;;  %v3365_v52 = vadd.f32 %v3364_v15, %v3173_v26  ;;  %v3436_v61 = vadd.f32 %v3435_v49, %v3405_v37  ;;  %v3685_v46 = vadd.f32 %v6040_v59, %v3684_v45  ;;  %v3407_v25 = vmul.f32 %v3174_v31, %v3174_v31 }
 0x264   : > { %v3175_v1 = vadd.f32 %v5022_v50, %v6045_v9  ;;  %v3726_v51 = vadd.f32 %v3725_v56, %v3680_v53  ;;  %v5023_v55 = vadd.f32 %v4944_v35, %v6033_v47  ;;  %v3797_v18 = vadd.f32 %v3796_v41, %v3766_v33 }
 0x265   : > { %v3437_v54 = vadd.f32 %v3436_v61, %v3406_v4  ;;  %v3366_v62 = vadd.f32 %v3365_v52, %v3174_v31  ;;  %v3768_v12 = vmul.f32 %v3685_v46, %v3685_v46  ;;  %v3177_v34 = vadd.f32 %v5021_v43, %v6045_v9  ;;  %v3699_v52 = vld [vmem:[%s6202_s8] sm:$0x1] }
 0x266   : > { %v3408_v57 = vmul.f32 %v3175_v1, %v3175_v1  ;;  %v3727_v23 = vadd.f32 %v3726_v51, %v3685_v46  ;;  %v3178_v29 = vadd.f32 %v5023_v55, %v6045_v9  ;;  %v3798_v45 = vadd.f32 %v3797_v18, %v3767_v8  ;;  %v3339_v61 = vld [vmem:[%s6200_s6] sm:$0x1] }
 0x267   : > { %v3367_v39 = vadd.f32 %v3366_v62, %v3175_v1  ;;  %v3438_v63 = vadd.f32 %v3437_v54, %v3407_v25  ;;  %v5024_v36 = vadd.f32 %v3096_v42, %v6035_v48  ;;  %v3693_v38 = vadd.f32 %v6130_v2, %v6040_v59  ;;  %v3739_v51 = vld [vmem:[%s6203_s9] sm:$0x1] }
 0x268   : > { %v4256_v47 = vpack.c.bf16 %v3178_v29, %v3177_v34  ;;  %v3688_v14 = vadd.f32 %v6040_v59, %v3687_v17  ;;  %v3799_v20 = vadd.f32 %v3798_v45, %v3768_v12  ;;  %v3696_v24 = vadd.f32 %v6136_v10, %v6040_v59  ;;  %v3379_v55 = vld [vmem:[%s6201_s7] sm:$0x1] }
 0x269   : > { %v3439_v26 = vadd.f32 %v3438_v63, %v3408_v57  ;;  %v3176_v35 = vadd.f32 %v5024_v36, %v6045_v9  ;;  %v3770_v42 = vmul.f32 %v3693_v38, %v3693_v38  ;;  %v3410_v6 = vmul.f32 %v3177_v34, %v3177_v34 }
 0x26a   : > { %4272 = vst [vmem:[%s5445_s19 + $0x78] sm:$0xff] %v4256_v47   ;;  %v3728_v13 = vadd.f32 %v3727_v23, %v3688_v14  ;;  %v3769_v16 = vmul.f32 %v3688_v14, %v3688_v14  ;;  %v3771_v22 = vmul.f32 %v3696_v24, %v3696_v24  ;;  %v3411_v9 = vmul.f32 %v3178_v29, %v3178_v29 }
 0x26b   : > { %v4251_v7 = vpack.c.bf16 %v3176_v35, %v3175_v1  ;;  %v3368_v3 = vadd.f32 %v3367_v39, %v3176_v35  ;;  %v3409_v48 = vmul.f32 %v3176_v35, %v3176_v35 }
 0x26c   : > { %v3729_v32 = vadd.f32 %v3728_v13, %v3693_v38  ;;  %v3800_v2 = vadd.f32 %v3799_v20, %v3769_v16 }
 0x26d   : > { %4271 = vst [vmem:[%s5445_s19 + $0x70] sm:$0xff] %v4251_v7   ;;  %v3369_v5 = vadd.f32 %v3368_v3, %v3177_v34  ;;  %v3440_v17 = vadd.f32 %v3439_v26, %v3409_v48 }
 0x26e   : > { %v3730_v19 = vadd.f32 %v3729_v32, %v3696_v24  ;;  %v3801_v28 = vadd.f32 %v3800_v2, %v3770_v42 }
 0x26f   : > { %v3370_v58 = vadd.f32 %v3369_v5, %v3178_v29  ;;  %v3441_v0 = vadd.f32 %v3440_v17, %v3410_v6 }
 0x270   : > { %v3731_v31 = vrot.slane %v3730_v19, 4  ;;  %v3802_v59 = vadd.f32 %v3801_v28, %v3771_v22 }
 0x271   : > { %v3371_v10 = vrot.slane %v3370_v58, 4  ;;  %v3442_v53 = vadd.f32 %v3441_v0, %v3411_v9 }
 0x272   : > { %v3732_v30 = vadd.f32 %v3731_v31, %v3730_v19  ;;  %v3803_v49 = vrot.slane %v3802_v59, 4 }
 0x273   : > { %v3372_v27 = vadd.f32 %v3371_v10, %v3370_v58  ;;  %v3443_v43 = vrot.slane %v3442_v53, 4 }
 0x274   : > { %v3733_v4 = vrot.slane %v3732_v30, 2  ;;  %v3804_v11 = vadd.f32 %v3803_v49, %v3802_v59 }
 0x275   : > { %v3373_v60 = vrot.slane %v3372_v27, 2  ;;  %v3444_v40 = vadd.f32 %v3443_v43, %v3442_v53 }
 0x276   : > { %v3734_v44 = vadd.f32 %v3733_v4, %v3732_v30  ;;  %v3805_v15 = vrot.slane %v3804_v11, 2 }
 0x277   : > { %v3374_v37 = vadd.f32 %v3373_v60, %v3372_v27  ;;  %v3445_v21 = vrot.slane %v3444_v40, 2 }
 0x278   : > { %v3735_v33 = vrot.slane %v3734_v44, 1  ;;  %v3806_v8 = vadd.f32 %v3805_v15, %v3804_v11 }
 0x279   : > { %v3375_v56 = vrot.slane %v3374_v37, 1  ;;  %v3446_v50 = vadd.f32 %v3445_v21, %v3444_v40 }
 0x27a   : > { %v3736_v41 = vadd.f32 %v3735_v33, %v3734_v44  ;;  %v3807_v46 = vrot.slane %v3806_v8, 1 }
 0x27b   : > { %v3376_v25 = vadd.f32 %v3375_v56, %v3374_v37  ;;  %v3447_v1 = vrot.slane %v3446_v50, 1 }
 0x27c   : > { %v3737_v54 = vadd.f32 %v3736_v41, %v3699_v52  ;;  %v3808_v18 = vadd.f32 %v3807_v46, %v3806_v8 }
 0x27d   : > { %v3377_v62 = vadd.f32 %v3376_v25, %v3339_v61  ;;  %v3448_v12 = vadd.f32 %v3447_v1, %v3446_v50 }
 0x27e   : > { %3738 = vst [vmem:[%s6202_s8] sm:$0x1] %v3737_v54  ;;  %v3809_v34 = vadd.f32 %v3808_v18, %v3739_v51 }
 0x27f   : > { %3378 = vst [vmem:[%s6200_s6] sm:$0x1] %v3377_v62  ;;  %v3449_v57 = vadd.f32 %v3448_v12, %v3379_v55 }
 0x280   : > { %3810 = vst [vmem:[%s6203_s9] sm:$0x1] %v3809_v34 }
 0x281   : > { %3450 = vst [vmem:[%s6201_s7] sm:$0x1] %v3449_v57 }
 0x282 PF: > { %s20_s30 = sadd.s32 1, %s5376_s30  }
 0x283   : > { %p17_p5 = scmp.ge.s32.totalorder %s20_s30, 4  }
 0x285   :  { %19 = sbr.rel (!%p17_p5) target bundleno = 1 (0x1), region = 116 }

</bundles_post_ra>
